<compile_context>
chip_gen: v6e
topology: v6e:2x2x1
jax: 0.10.0
libtpu: 0.0.40
codegen_flags: <defaults>
</compile_context>

<pallas_src>
import functools

import jax
import jax.numpy as jnp
from jax.experimental import pallas as pl
from jax.experimental.pallas import tpu as pltpu


def _round_up(x, m):
    return ((x + m - 1) // m) * m


# ----------------------------------------------------------------------------
# Kernel 1: backbone stand-in + LSTM input projection, fused, T-chunked.
#   x block     : (tile_b, T_CHUNK, C, HW)  bf16
#   gates_x out : (T_CHUNK, tile_b, 4H)     bf16, written in (T, B, 4H) layout
# ----------------------------------------------------------------------------
def backbone_proj_kernel(x_ref, wb_ref, bb_ref, wih_ref, bg_ref, gx_ref):
    t_chunk = gx_ref.shape[0]
    for t in range(t_chunk):                     # static unrolled chunk loop
        xt = x_ref[:, t, :, :].astype(jnp.float32)          # (tile_b, C, HW)
        pooled = jnp.mean(xt, axis=-1)                      # (tile_b, C) f32
        feats = jnp.maximum(
            jnp.dot(pooled.astype(jnp.bfloat16), wb_ref[...],
                    preferred_element_type=jnp.float32) + bb_ref[...],
            0.0)                                            # (tile_b, F) f32
        # gates_x = feats @ W_ih + (b_ih + b_hh)
        gx = (jnp.dot(feats.astype(jnp.bfloat16), wih_ref[...],
                      preferred_element_type=jnp.float32) + bg_ref[...])
        gx_ref[t] = gx.astype(gx_ref.dtype)                 # (tile_b, 4H)


# ----------------------------------------------------------------------------
# Kernel 2: LSTM recurrence (T-chunked, streamed) + classifier on last hidden.
# ----------------------------------------------------------------------------
def lstm_cls_kernel(gx_ref, whh_ref, wcls_ref, bcls_ref, out_ref,
                    h_scr, c_scr, *, seq_len, mask_tail):
    tc = pl.program_id(1)
    t_chunk = gx_ref.shape[0]
    Hd = whh_ref.shape[0]

    # h/c scratch persists across the inner ("arbitrary") time axis of the
    # grid; re-initialize it at the start of every batch tile.
    @pl.when(tc == 0)
    def _init():
        h_scr[...] = jnp.zeros_like(h_scr)
        c_scr[...] = jnp.zeros_like(c_scr)

    for t in range(t_chunk):                     # static unrolled chunk loop
        # gates_x already contains x_t @ W_ih + (b_ih + b_hh) from kernel 1.
        gates = gx_ref[t].astype(jnp.float32) + jnp.dot(
            h_scr[...].astype(jnp.bfloat16), whh_ref[...],
            preferred_element_type=jnp.float32)             # (tile_b, 4H) f32
        # PyTorch gate order: i, f, g, o.
        # NOTE: gate slices are lane-aligned only when Hd % 128 == 0
        # (true for Hd=128); other sizes stay correct but may relayout.
        i_g = jax.nn.sigmoid(gates[:, 0 * Hd:1 * Hd])
        f_g = jax.nn.sigmoid(gates[:, 1 * Hd:2 * Hd])
        g_g = jnp.tanh(gates[:, 2 * Hd:3 * Hd])
        o_g = jax.nn.sigmoid(gates[:, 3 * Hd:4 * Hd])
        c_new = f_g * c_scr[...] + i_g * g_g
        h_new = o_g * jnp.tanh(c_new)
        if mask_tail:
            valid = (tc * t_chunk + t) < seq_len
            c_scr[...] = jnp.where(valid, c_new, c_scr[...])
            h_scr[...] = jnp.where(valid, h_new, h_scr[...])
        else:
            c_scr[...] = c_new
            h_scr[...] = h_new

    @pl.when(tc == pl.num_programs(1) - 1)
    def _final():
        # classifier on the last hidden state (== lstm_out[:, -1, :])
        out_ref[...] = (jnp.dot(h_scr[...], wcls_ref[...],
                                preferred_element_type=jnp.float32)
                        + bcls_ref[...])


# ----------------------------------------------------------------------------
# Full module forward
# ----------------------------------------------------------------------------
def dual_path_lstm_forward(x, params, *, t_chunk_target=16):
    B, T, C, H, W = x.shape
    HW = H * W
    F = params["w_backbone"].shape[1]
    Hd = params["w_hh"].shape[0]
    G = 4 * Hd
    num_classes = params["w_cls"].shape[1]

    # ---- tiling choices -----------------------------------------------------
    # Batch tile: fill the 256-wide MXU M dimension on v6e/v7x for large B,
    # otherwise one sublane-aligned tile (8-row multiple).
    b8 = _round_up(B, 8)
    if b8 <= 256:
        tile_b, B_pad = b8, b8
    else:
        tile_b = 256
        B_pad = _round_up(B, tile_b)
    nb = B_pad // tile_b

    # Time chunk: amortize per-grid-step overhead and coarsen DMAs; any pad
    # steps are masked out of the recurrence.
    t_chunk = min(t_chunk_target, T)
    T_pad = _round_up(T, t_chunk)
    n_tc = T_pad // t_chunk
    mask_tail = (T_pad != T)

    cls_pad = _round_up(num_classes, 128)        # lane-dense classifier output

    # ---- input / weight prep (bf16 operands, f32 accumulation) -------------
    x_flat = x.reshape(B, T, C, HW).astype(jnp.bfloat16)
    if B_pad != B or T_pad != T:
        x_flat = jnp.pad(x_flat,
                         ((0, B_pad - B), (0, T_pad - T), (0, 0), (0, 0)))

    wb = params["w_backbone"].astype(jnp.bfloat16)
    wih = params["w_ih"].astype(jnp.bfloat16)
    whh = params["w_hh"].astype(jnp.bfloat16)
    bb = params["b_backbone"].astype(jnp.float32)
    bg = params["b_gates"].astype(jnp.float32)

    # ---- Kernel 1: (B_pad, T_pad, C, HW) -> gates_x (T_pad, B_pad, 4H) bf16 -
    # Time-chunk axis first so v7x's second TensorCore gets work even if nb==1.
    gates_x = pl.pallas_call(
        backbone_proj_kernel,
        out_shape=jax.ShapeDtypeStruct((T_pad, B_pad, G), jnp.bfloat16),
        grid_spec=pltpu.PrefetchScalarGridSpec(
            num_scalar_prefetch=0,
            grid=(n_tc, nb),
            in_specs=[
                pl.BlockSpec((tile_b, t_chunk, C, HW),
                             lambda tc, b: (b, tc, 0, 0)),
                pl.BlockSpec((C, F), lambda tc, b: (0, 0)),
                pl.BlockSpec((1, F), lambda tc, b: (0, 0)),
                pl.BlockSpec((F, G), lambda tc, b: (0, 0)),
                pl.BlockSpec((1, G), lambda tc, b: (0, 0)),
            ],
            out_specs=pl.BlockSpec((t_chunk, tile_b, G),
                                   lambda tc, b: (tc, b, 0)),
        ),
        compiler_params=pltpu.CompilerParams(
            dimension_semantics=("parallel", "parallel")),
    )(x_flat, wb, bb, wih, bg)

    # Lane-dense (128-wide) classifier weights; padding sliced off below.
    w_cls_pad = jnp.zeros((Hd, cls_pad), jnp.float32).at[:, :num_classes].set(
        params["w_cls"].astype(jnp.float32))
    b_cls_pad = jnp.zeros((1, cls_pad), jnp.float32).at[:, :num_classes].set(
        params["b_cls"].astype(jnp.float32))

    # ---- Kernel 2: recurrence over T (chunk-streamed) + classifier ---------
    kernel2 = functools.partial(lstm_cls_kernel,
                                seq_len=T, mask_tail=mask_tail)
    out_pad = pl.pallas_call(
        kernel2,
        out_shape=jax.ShapeDtypeStruct((B_pad, cls_pad), jnp.float32),
        grid_spec=pltpu.PrefetchScalarGridSpec(
            num_scalar_prefetch=0,
            grid=(nb, n_tc),
            in_specs=[
                pl.BlockSpec((t_chunk, tile_b, G), lambda b, tc: (tc, b, 0)),
                pl.BlockSpec((Hd, G), lambda b, tc: (0, 0)),
                pl.BlockSpec((Hd, cls_pad), lambda b, tc: (0, 0)),
                pl.BlockSpec((1, cls_pad), lambda b, tc: (0, 0)),
            ],
            out_specs=pl.BlockSpec((tile_b, cls_pad), lambda b, tc: (b, 0)),
            scratch_shapes=[pltpu.VMEM((tile_b, Hd), jnp.float32),
                            pltpu.VMEM((tile_b, Hd), jnp.float32)],
        ),
        compiler_params=pltpu.CompilerParams(
            dimension_semantics=("parallel", "arbitrary")),
    )(gates_x, whh, w_cls_pad, b_cls_pad)

    return out_pad[:B, :num_classes]


# ----------------------------------------------------------------------------
# Pure-JAX f32 reference for a sanity check
# ----------------------------------------------------------------------------
def reference_forward(x, params):
    B, T, C, H, W = x.shape
    pooled = jnp.mean(x.reshape(B * T, C, H * W), axis=-1)
    feats = jnp.maximum(pooled @ params["w_backbone"] + params["b_backbone"], 0.0)
    feats = feats.reshape(B, T, -1)
    Hd = params["w_hh"].shape[0]
    h = jnp.zeros((B, Hd), jnp.float32)
    c = jnp.zeros((B, Hd), jnp.float32)
    for t in range(T):
        g = feats[:, t, :] @ params["w_ih"] + h @ params["w_hh"] + params["b_gates"]
        i = jax.nn.sigmoid(g[:, 0 * Hd:1 * Hd])
        f = jax.nn.sigmoid(g[:, 1 * Hd:2 * Hd])
        gg = jnp.tanh(g[:, 2 * Hd:3 * Hd])
        o = jax.nn.sigmoid(g[:, 3 * Hd:4 * Hd])
        c = f * c + i * gg
        h = o * jnp.tanh(c)
    return h @ params["w_cls"] + params["b_cls"]


if __name__ == "__main__":
    # small shapes consistent with the forward: (batch, seq, C, H, W)
    B, T, C, H, W = 2, 8, 4, 16, 16
    feature_dim, lstm_hidden, num_classes = 256, 128, 5

    key = jax.random.PRNGKey(0)
    keys = jax.random.split(key, 8)

    x = jax.random.normal(keys[0], (B, T, C, H, W), jnp.float32)

    # deterministic synthetic parameters (shapes follow the module __init__)
    params = {
        "w_backbone": 0.1 * jax.random.normal(keys[1], (C, feature_dim), jnp.float32),
        "b_backbone": 0.1 * jax.random.normal(keys[2], (1, feature_dim), jnp.float32),
        # nn.LSTM weights stored transposed for x @ W: (F, 4H), (H, 4H);
        # b_gates = b_ih + b_hh combined, gate order i,f,g,o.
        "w_ih": 0.05 * jax.random.normal(keys[3], (feature_dim, 4 * lstm_hidden), jnp.float32),
        "w_hh": 0.05 * jax.random.normal(keys[4], (lstm_hidden, 4 * lstm_hidden), jnp.float32),
        "b_gates": 0.05 * jax.random.normal(keys[5], (1, 4 * lstm_hidden), jnp.float32),
        "w_cls": 0.1 * jax.random.normal(keys[6], (lstm_hidden, num_classes), jnp.float32),
        "b_cls": 0.1 * jax.random.normal(keys[7], (1, num_classes), jnp.float32),
    }

    out = dual_path_lstm_forward(x, params)
    out = jax.block_until_ready(out)

    ref = reference_forward(x, params)
    assert out.shape == (B, num_classes), out.shape
    # bf16 matmul operands / bf16 gates_x intermediate with f32 accumulation:
    # compare against the pure-f32 reference at a bf16-appropriate tolerance.
    assert jnp.allclose(out, ref, atol=5e-3, rtol=5e-3), (out, ref)

    print("KERNEL_OK")
</pallas_src>

<mosaic_0001>
module attributes {stable_mosaic.version = 11 : i64} {
  func.func @backbone_proj_kernel(%arg0: i32, %arg1: i32, %arg2: memref<8x8x4x256xbf16, #tpu.memory_space<vmem>>, %arg3: memref<4x256xbf16, #tpu.memory_space<vmem>>, %arg4: memref<1x256xf32, #tpu.memory_space<vmem>>, %arg5: memref<256x512xbf16, #tpu.memory_space<vmem>>, %arg6: memref<1x512xf32, #tpu.memory_space<vmem>>, %arg7: memref<8x8x512xbf16, #tpu.memory_space<vmem>>) attributes {dimension_semantics = [#tpu.dimension_semantics<parallel>, #tpu.dimension_semantics<parallel>], iteration_bounds = array<i64: 1, 1>, scalar_prefetch = 0 : i64, scratch_operands = 0 : i64, tpu.core_type = #tpu.core_type<tc>, window_params = [{transform_indices = @transform_0, window_bounds = array<i64: 8, 8, 4, 256>}, {pipeline_mode = #tpu.pipeline_mode<synchronous>, transform_indices = @transform_1, window_bounds = array<i64: 4, 256>}, {pipeline_mode = #tpu.pipeline_mode<synchronous>, transform_indices = @transform_2, window_bounds = array<i64: 1, 256>}, {pipeline_mode = #tpu.pipeline_mode<synchronous>, transform_indices = @transform_3, window_bounds = array<i64: 256, 512>}, {pipeline_mode = #tpu.pipeline_mode<synchronous>, transform_indices = @transform_4, window_bounds = array<i64: 1, 512>}, {transform_indices = @transform_5, window_bounds = array<i64: 8, 8, 512>}]} {
    %c0 = arith.constant 0 : index
    %c0_0 = arith.constant 0 : index
    %c0_1 = arith.constant 0 : index
    %c0_2 = arith.constant 0 : index
    %0 = vector.load %arg2[%c0, %c0_0, %c0_1, %c0_2] : memref<8x8x4x256xbf16, #tpu.memory_space<vmem>>, vector<8x1x4x256xbf16>
    %1 = vector.shape_cast %0 : vector<8x1x4x256xbf16> to vector<8x4x256xbf16>
    %2 = arith.extf %1 : vector<8x4x256xbf16> to vector<8x4x256xf32>
    %cst = arith.constant dense<0.000000e+00> : vector<8x4xf32>
    %3 = vector.multi_reduction <add>, %2, %cst [2] : vector<8x4x256xf32> to vector<8x4xf32>
    %cst_3 = arith.constant 2.560000e+02 : f32
    %4 = vector.broadcast %cst_3 : f32 to vector<8x4xf32>
    %5 = arith.divf %3, %4 : vector<8x4xf32>
    %6 = arith.truncf %5 : vector<8x4xf32> to vector<8x4xbf16>
    %c0_4 = arith.constant 0 : index
    %c0_5 = arith.constant 0 : index
    %7 = vector.load %arg3[%c0_4, %c0_5] : memref<4x256xbf16, #tpu.memory_space<vmem>>, vector<4x256xbf16>
    %cst_6 = arith.constant dense<0.000000e+00> : vector<8x256xf32>
    %8 = tpu.matmul %6, %7, %cst_6 {dimension_numbers = #tpu.dot_dimension_numbers<[1], [0], [0], [1], [0, 0, 1, 1], [], []>} : vector<8x4xbf16>, vector<4x256xbf16>, vector<8x256xf32> -> vector<8x256xf32>
    %c0_7 = arith.constant 0 : index
    %c0_8 = arith.constant 0 : index
    %9 = vector.load %arg4[%c0_7, %c0_8] : memref<1x256xf32, #tpu.memory_space<vmem>>, vector<1x256xf32>
    %10 = vector.broadcast %9 : vector<1x256xf32> to vector<8x256xf32>
    %11 = arith.addf %8, %10 : vector<8x256xf32>
    %cst_9 = arith.constant 0.000000e+00 : f32
    %12 = vector.broadcast %cst_9 : f32 to vector<8x256xf32>
    %13 = arith.maximumf %11, %12 : vector<8x256xf32>
    %14 = arith.truncf %13 : vector<8x256xf32> to vector<8x256xbf16>
    %c0_10 = arith.constant 0 : index
    %c0_11 = arith.constant 0 : index
    %15 = vector.load %arg5[%c0_10, %c0_11] : memref<256x512xbf16, #tpu.memory_space<vmem>>, vector<256x512xbf16>
    %cst_12 = arith.constant dense<0.000000e+00> : vector<8x512xf32>
    %16 = tpu.matmul %14, %15, %cst_12 {dimension_numbers = #tpu.dot_dimension_numbers<[1], [0], [0], [1], [0, 0, 1, 1], [], []>} : vector<8x256xbf16>, vector<256x512xbf16>, vector<8x512xf32> -> vector<8x512xf32>
    %c0_13 = arith.constant 0 : index
    %c0_14 = arith.constant 0 : index
    %17 = vector.load %arg6[%c0_13, %c0_14] : memref<1x512xf32, #tpu.memory_space<vmem>>, vector<1x512xf32>
    %18 = vector.broadcast %17 : vector<1x512xf32> to vector<8x512xf32>
    %19 = arith.addf %16, %18 : vector<8x512xf32>
    %20 = arith.truncf %19 : vector<8x512xf32> to vector<8x512xbf16>
    %c0_15 = arith.constant 0 : index
    %c0_16 = arith.constant 0 : index
    %c0_17 = arith.constant 0 : index
    %21 = vector.load %arg7[%c0_15, %c0_16, %c0_17] : memref<8x8x512xbf16, #tpu.memory_space<vmem>>, vector<1x8x512xbf16>
    %22 = vector.shape_cast %21 : vector<1x8x512xbf16> to vector<8x512xbf16>
    %23 = vector.shape_cast %20 : vector<8x512xbf16> to vector<1x8x512xbf16>
    tpu.vector_store %arg7[%c0_15, %c0_16, %c0_17], %23 {strides = array<i32>} : memref<8x8x512xbf16, #tpu.memory_space<vmem>>, vector<1x8x512xbf16>,
    %c0_18 = arith.constant 0 : index
    %c1 = arith.constant 1 : index
    %c0_19 = arith.constant 0 : index
    %c0_20 = arith.constant 0 : index
    %24 = vector.load %arg2[%c0_18, %c1, %c0_19, %c0_20] : memref<8x8x4x256xbf16, #tpu.memory_space<vmem>>, vector<8x1x4x256xbf16>
    %25 = vector.shape_cast %24 : vector<8x1x4x256xbf16> to vector<8x4x256xbf16>
    %26 = arith.extf %25 : vector<8x4x256xbf16> to vector<8x4x256xf32>
    %cst_21 = arith.constant dense<0.000000e+00> : vector<8x4xf32>
    %27 = vector.multi_reduction <add>, %26, %cst_21 [2] : vector<8x4x256xf32> to vector<8x4xf32>
    %cst_22 = arith.constant 2.560000e+02 : f32
    %28 = vector.broadcast %cst_22 : f32 to vector<8x4xf32>
    %29 = arith.divf %27, %28 : vector<8x4xf32>
    %30 = arith.truncf %29 : vector<8x4xf32> to vector<8x4xbf16>
    %c0_23 = arith.constant 0 : index
    %c0_24 = arith.constant 0 : index
    %31 = vector.load %arg3[%c0_23, %c0_24] : memref<4x256xbf16, #tpu.memory_space<vmem>>, vector<4x256xbf16>
    %cst_25 = arith.constant dense<0.000000e+00> : vector<8x256xf32>
    %32 = tpu.matmul %30, %31, %cst_25 {dimension_numbers = #tpu.dot_dimension_numbers<[1], [0], [0], [1], [0, 0, 1, 1], [], []>} : vector<8x4xbf16>, vector<4x256xbf16>, vector<8x256xf32> -> vector<8x256xf32>
    %c0_26 = arith.constant 0 : index
    %c0_27 = arith.constant 0 : index
    %33 = vector.load %arg4[%c0_26, %c0_27] : memref<1x256xf32, #tpu.memory_space<vmem>>, vector<1x256xf32>
    %34 = vector.broadcast %33 : vector<1x256xf32> to vector<8x256xf32>
    %35 = arith.addf %32, %34 : vector<8x256xf32>
    %cst_28 = arith.constant 0.000000e+00 : f32
    %36 = vector.broadcast %cst_28 : f32 to vector<8x256xf32>
    %37 = arith.maximumf %35, %36 : vector<8x256xf32>
    %38 = arith.truncf %37 : vector<8x256xf32> to vector<8x256xbf16>
    %c0_29 = arith.constant 0 : index
    %c0_30 = arith.constant 0 : index
    %39 = vector.load %arg5[%c0_29, %c0_30] : memref<256x512xbf16, #tpu.memory_space<vmem>>, vector<256x512xbf16>
    %cst_31 = arith.constant dense<0.000000e+00> : vector<8x512xf32>
    %40 = tpu.matmul %38, %39, %cst_31 {dimension_numbers = #tpu.dot_dimension_numbers<[1], [0], [0], [1], [0, 0, 1, 1], [], []>} : vector<8x256xbf16>, vector<256x512xbf16>, vector<8x512xf32> -> vector<8x512xf32>
    %c0_32 = arith.constant 0 : index
    %c0_33 = arith.constant 0 : index
    %41 = vector.load %arg6[%c0_32, %c0_33] : memref<1x512xf32, #tpu.memory_space<vmem>>, vector<1x512xf32>
    %42 = vector.broadcast %41 : vector<1x512xf32> to vector<8x512xf32>
    %43 = arith.addf %40, %42 : vector<8x512xf32>
    %44 = arith.truncf %43 : vector<8x512xf32> to vector<8x512xbf16>
    %c1_34 = arith.constant 1 : index
    %c0_35 = arith.constant 0 : index
    %c0_36 = arith.constant 0 : index
    %45 = vector.load %arg7[%c1_34, %c0_35, %c0_36] : memref<8x8x512xbf16, #tpu.memory_space<vmem>>, vector<1x8x512xbf16>
    %46 = vector.shape_cast %45 : vector<1x8x512xbf16> to vector<8x512xbf16>
    %47 = vector.shape_cast %44 : vector<8x512xbf16> to vector<1x8x512xbf16>
    tpu.vector_store %arg7[%c1_34, %c0_35, %c0_36], %47 {strides = array<i32>} : memref<8x8x512xbf16, #tpu.memory_space<vmem>>, vector<1x8x512xbf16>,
    %c0_37 = arith.constant 0 : index
    %c2 = arith.constant 2 : index
    %c0_38 = arith.constant 0 : index
    %c0_39 = arith.constant 0 : index
    %48 = vector.load %arg2[%c0_37, %c2, %c0_38, %c0_39] : memref<8x8x4x256xbf16, #tpu.memory_space<vmem>>, vector<8x1x4x256xbf16>
    %49 = vector.shape_cast %48 : vector<8x1x4x256xbf16> to vector<8x4x256xbf16>
    %50 = arith.extf %49 : vector<8x4x256xbf16> to vector<8x4x256xf32>
    %cst_40 = arith.constant dense<0.000000e+00> : vector<8x4xf32>
    %51 = vector.multi_reduction <add>, %50, %cst_40 [2] : vector<8x4x256xf32> to vector<8x4xf32>
    %cst_41 = arith.constant 2.560000e+02 : f32
    %52 = vector.broadcast %cst_41 : f32 to vector<8x4xf32>
    %53 = arith.divf %51, %52 : vector<8x4xf32>
    %54 = arith.truncf %53 : vector<8x4xf32> to vector<8x4xbf16>
    %c0_42 = arith.constant 0 : index
    %c0_43 = arith.constant 0 : index
    %55 = vector.load %arg3[%c0_42, %c0_43] : memref<4x256xbf16, #tpu.memory_space<vmem>>, vector<4x256xbf16>
    %cst_44 = arith.constant dense<0.000000e+00> : vector<8x256xf32>
    %56 = tpu.matmul %54, %55, %cst_44 {dimension_numbers = #tpu.dot_dimension_numbers<[1], [0], [0], [1], [0, 0, 1, 1], [], []>} : vector<8x4xbf16>, vector<4x256xbf16>, vector<8x256xf32> -> vector<8x256xf32>
    %c0_45 = arith.constant 0 : index
    %c0_46 = arith.constant 0 : index
    %57 = vector.load %arg4[%c0_45, %c0_46] : memref<1x256xf32, #tpu.memory_space<vmem>>, vector<1x256xf32>
    %58 = vector.broadcast %57 : vector<1x256xf32> to vector<8x256xf32>
    %59 = arith.addf %56, %58 : vector<8x256xf32>
    %cst_47 = arith.constant 0.000000e+00 : f32
    %60 = vector.broadcast %cst_47 : f32 to vector<8x256xf32>
    %61 = arith.maximumf %59, %60 : vector<8x256xf32>
    %62 = arith.truncf %61 : vector<8x256xf32> to vector<8x256xbf16>
    %c0_48 = arith.constant 0 : index
    %c0_49 = arith.constant 0 : index
    %63 = vector.load %arg5[%c0_48, %c0_49] : memref<256x512xbf16, #tpu.memory_space<vmem>>, vector<256x512xbf16>
    %cst_50 = arith.constant dense<0.000000e+00> : vector<8x512xf32>
    %64 = tpu.matmul %62, %63, %cst_50 {dimension_numbers = #tpu.dot_dimension_numbers<[1], [0], [0], [1], [0, 0, 1, 1], [], []>} : vector<8x256xbf16>, vector<256x512xbf16>, vector<8x512xf32> -> vector<8x512xf32>
    %c0_51 = arith.constant 0 : index
    %c0_52 = arith.constant 0 : index
    %65 = vector.load %arg6[%c0_51, %c0_52] : memref<1x512xf32, #tpu.memory_space<vmem>>, vector<1x512xf32>
    %66 = vector.broadcast %65 : vector<1x512xf32> to vector<8x512xf32>
    %67 = arith.addf %64, %66 : vector<8x512xf32>
    %68 = arith.truncf %67 : vector<8x512xf32> to vector<8x512xbf16>
    %c2_53 = arith.constant 2 : index
    %c0_54 = arith.constant 0 : index
    %c0_55 = arith.constant 0 : index
    %69 = vector.load %arg7[%c2_53, %c0_54, %c0_55] : memref<8x8x512xbf16, #tpu.memory_space<vmem>>, vector<1x8x512xbf16>
    %70 = vector.shape_cast %69 : vector<1x8x512xbf16> to vector<8x512xbf16>
    %71 = vector.shape_cast %68 : vector<8x512xbf16> to vector<1x8x512xbf16>
    tpu.vector_store %arg7[%c2_53, %c0_54, %c0_55], %71 {strides = array<i32>} : memref<8x8x512xbf16, #tpu.memory_space<vmem>>, vector<1x8x512xbf16>,
    %c0_56 = arith.constant 0 : index
    %c3 = arith.constant 3 : index
    %c0_57 = arith.constant 0 : index
    %c0_58 = arith.constant 0 : index
    %72 = vector.load %arg2[%c0_56, %c3, %c0_57, %c0_58] : memref<8x8x4x256xbf16, #tpu.memory_space<vmem>>, vector<8x1x4x256xbf16>
    %73 = vector.shape_cast %72 : vector<8x1x4x256xbf16> to vector<8x4x256xbf16>
    %74 = arith.extf %73 : vector<8x4x256xbf16> to vector<8x4x256xf32>
    %cst_59 = arith.constant dense<0.000000e+00> : vector<8x4xf32>
    %75 = vector.multi_reduction <add>, %74, %cst_59 [2] : vector<8x4x256xf32> to vector<8x4xf32>
    %cst_60 = arith.constant 2.560000e+02 : f32
    %76 = vector.broadcast %cst_60 : f32 to vector<8x4xf32>
    %77 = arith.divf %75, %76 : vector<8x4xf32>
    %78 = arith.truncf %77 : vector<8x4xf32> to vector<8x4xbf16>
    %c0_61 = arith.constant 0 : index
    %c0_62 = arith.constant 0 : index
    %79 = vector.load %arg3[%c0_61, %c0_62] : memref<4x256xbf16, #tpu.memory_space<vmem>>, vector<4x256xbf16>
    %cst_63 = arith.constant dense<0.000000e+00> : vector<8x256xf32>
    %80 = tpu.matmul %78, %79, %cst_63 {dimension_numbers = #tpu.dot_dimension_numbers<[1], [0], [0], [1], [0, 0, 1, 1], [], []>} : vector<8x4xbf16>, vector<4x256xbf16>, vector<8x256xf32> -> vector<8x256xf32>
    %c0_64 = arith.constant 0 : index
    %c0_65 = arith.constant 0 : index
    %81 = vector.load %arg4[%c0_64, %c0_65] : memref<1x256xf32, #tpu.memory_space<vmem>>, vector<1x256xf32>
    %82 = vector.broadcast %81 : vector<1x256xf32> to vector<8x256xf32>
    %83 = arith.addf %80, %82 : vector<8x256xf32>
    %cst_66 = arith.constant 0.000000e+00 : f32
    %84 = vector.broadcast %cst_66 : f32 to vector<8x256xf32>
    %85 = arith.maximumf %83, %84 : vector<8x256xf32>
    %86 = arith.truncf %85 : vector<8x256xf32> to vector<8x256xbf16>
    %c0_67 = arith.constant 0 : index
    %c0_68 = arith.constant 0 : index
    %87 = vector.load %arg5[%c0_67, %c0_68] : memref<256x512xbf16, #tpu.memory_space<vmem>>, vector<256x512xbf16>
    %cst_69 = arith.constant dense<0.000000e+00> : vector<8x512xf32>
    %88 = tpu.matmul %86, %87, %cst_69 {dimension_numbers = #tpu.dot_dimension_numbers<[1], [0], [0], [1], [0, 0, 1, 1], [], []>} : vector<8x256xbf16>, vector<256x512xbf16>, vector<8x512xf32> -> vector<8x512xf32>
    %c0_70 = arith.constant 0 : index
    %c0_71 = arith.constant 0 : index
    %89 = vector.load %arg6[%c0_70, %c0_71] : memref<1x512xf32, #tpu.memory_space<vmem>>, vector<1x512xf32>
    %90 = vector.broadcast %89 : vector<1x512xf32> to vector<8x512xf32>
    %91 = arith.addf %88, %90 : vector<8x512xf32>
    %92 = arith.truncf %91 : vector<8x512xf32> to vector<8x512xbf16>
    %c3_72 = arith.constant 3 : index
    %c0_73 = arith.constant 0 : index
    %c0_74 = arith.constant 0 : index
    %93 = vector.load %arg7[%c3_72, %c0_73, %c0_74] : memref<8x8x512xbf16, #tpu.memory_space<vmem>>, vector<1x8x512xbf16>
    %94 = vector.shape_cast %93 : vector<1x8x512xbf16> to vector<8x512xbf16>
    %95 = vector.shape_cast %92 : vector<8x512xbf16> to vector<1x8x512xbf16>
    tpu.vector_store %arg7[%c3_72, %c0_73, %c0_74], %95 {strides = array<i32>} : memref<8x8x512xbf16, #tpu.memory_space<vmem>>, vector<1x8x512xbf16>,
    %c0_75 = arith.constant 0 : index
    %c4 = arith.constant 4 : index
    %c0_76 = arith.constant 0 : index
    %c0_77 = arith.constant 0 : index
    %96 = vector.load %arg2[%c0_75, %c4, %c0_76, %c0_77] : memref<8x8x4x256xbf16, #tpu.memory_space<vmem>>, vector<8x1x4x256xbf16>
    %97 = vector.shape_cast %96 : vector<8x1x4x256xbf16> to vector<8x4x256xbf16>
    %98 = arith.extf %97 : vector<8x4x256xbf16> to vector<8x4x256xf32>
    %cst_78 = arith.constant dense<0.000000e+00> : vector<8x4xf32>
    %99 = vector.multi_reduction <add>, %98, %cst_78 [2] : vector<8x4x256xf32> to vector<8x4xf32>
    %cst_79 = arith.constant 2.560000e+02 : f32
    %100 = vector.broadcast %cst_79 : f32 to vector<8x4xf32>
    %101 = arith.divf %99, %100 : vector<8x4xf32>
    %102 = arith.truncf %101 : vector<8x4xf32> to vector<8x4xbf16>
    %c0_80 = arith.constant 0 : index
    %c0_81 = arith.constant 0 : index
    %103 = vector.load %arg3[%c0_80, %c0_81] : memref<4x256xbf16, #tpu.memory_space<vmem>>, vector<4x256xbf16>
    %cst_82 = arith.constant dense<0.000000e+00> : vector<8x256xf32>
    %104 = tpu.matmul %102, %103, %cst_82 {dimension_numbers = #tpu.dot_dimension_numbers<[1], [0], [0], [1], [0, 0, 1, 1], [], []>} : vector<8x4xbf16>, vector<4x256xbf16>, vector<8x256xf32> -> vector<8x256xf32>
    %c0_83 = arith.constant 0 : index
    %c0_84 = arith.constant 0 : index
    %105 = vector.load %arg4[%c0_83, %c0_84] : memref<1x256xf32, #tpu.memory_space<vmem>>, vector<1x256xf32>
    %106 = vector.broadcast %105 : vector<1x256xf32> to vector<8x256xf32>
    %107 = arith.addf %104, %106 : vector<8x256xf32>
    %cst_85 = arith.constant 0.000000e+00 : f32
    %108 = vector.broadcast %cst_85 : f32 to vector<8x256xf32>
    %109 = arith.maximumf %107, %108 : vector<8x256xf32>
    %110 = arith.truncf %109 : vector<8x256xf32> to vector<8x256xbf16>
    %c0_86 = arith.constant 0 : index
    %c0_87 = arith.constant 0 : index
    %111 = vector.load %arg5[%c0_86, %c0_87] : memref<256x512xbf16, #tpu.memory_space<vmem>>, vector<256x512xbf16>
    %cst_88 = arith.constant dense<0.000000e+00> : vector<8x512xf32>
    %112 = tpu.matmul %110, %111, %cst_88 {dimension_numbers = #tpu.dot_dimension_numbers<[1], [0], [0], [1], [0, 0, 1, 1], [], []>} : vector<8x256xbf16>, vector<256x512xbf16>, vector<8x512xf32> -> vector<8x512xf32>
    %c0_89 = arith.constant 0 : index
    %c0_90 = arith.constant 0 : index
    %113 = vector.load %arg6[%c0_89, %c0_90] : memref<1x512xf32, #tpu.memory_space<vmem>>, vector<1x512xf32>
    %114 = vector.broadcast %113 : vector<1x512xf32> to vector<8x512xf32>
    %115 = arith.addf %112, %114 : vector<8x512xf32>
    %116 = arith.truncf %115 : vector<8x512xf32> to vector<8x512xbf16>
    %c4_91 = arith.constant 4 : index
    %c0_92 = arith.constant 0 : index
    %c0_93 = arith.constant 0 : index
    %117 = vector.load %arg7[%c4_91, %c0_92, %c0_93] : memref<8x8x512xbf16, #tpu.memory_space<vmem>>, vector<1x8x512xbf16>
    %118 = vector.shape_cast %117 : vector<1x8x512xbf16> to vector<8x512xbf16>
    %119 = vector.shape_cast %116 : vector<8x512xbf16> to vector<1x8x512xbf16>
    tpu.vector_store %arg7[%c4_91, %c0_92, %c0_93], %119 {strides = array<i32>} : memref<8x8x512xbf16, #tpu.memory_space<vmem>>, vector<1x8x512xbf16>,
    %c0_94 = arith.constant 0 : index
    %c5 = arith.constant 5 : index
    %c0_95 = arith.constant 0 : index
    %c0_96 = arith.constant 0 : index
    %120 = vector.load %arg2[%c0_94, %c5, %c0_95, %c0_96] : memref<8x8x4x256xbf16, #tpu.memory_space<vmem>>, vector<8x1x4x256xbf16>
    %121 = vector.shape_cast %120 : vector<8x1x4x256xbf16> to vector<8x4x256xbf16>
    %122 = arith.extf %121 : vector<8x4x256xbf16> to vector<8x4x256xf32>
    %cst_97 = arith.constant dense<0.000000e+00> : vector<8x4xf32>
    %123 = vector.multi_reduction <add>, %122, %cst_97 [2] : vector<8x4x256xf32> to vector<8x4xf32>
    %cst_98 = arith.constant 2.560000e+02 : f32
    %124 = vector.broadcast %cst_98 : f32 to vector<8x4xf32>
    %125 = arith.divf %123, %124 : vector<8x4xf32>
    %126 = arith.truncf %125 : vector<8x4xf32> to vector<8x4xbf16>
    %c0_99 = arith.constant 0 : index
    %c0_100 = arith.constant 0 : index
    %127 = vector.load %arg3[%c0_99, %c0_100] : memref<4x256xbf16, #tpu.memory_space<vmem>>, vector<4x256xbf16>
    %cst_101 = arith.constant dense<0.000000e+00> : vector<8x256xf32>
    %128 = tpu.matmul %126, %127, %cst_101 {dimension_numbers = #tpu.dot_dimension_numbers<[1], [0], [0], [1], [0, 0, 1, 1], [], []>} : vector<8x4xbf16>, vector<4x256xbf16>, vector<8x256xf32> -> vector<8x256xf32>
    %c0_102 = arith.constant 0 : index
    %c0_103 = arith.constant 0 : index
    %129 = vector.load %arg4[%c0_102, %c0_103] : memref<1x256xf32, #tpu.memory_space<vmem>>, vector<1x256xf32>
    %130 = vector.broadcast %129 : vector<1x256xf32> to vector<8x256xf32>
    %131 = arith.addf %128, %130 : vector<8x256xf32>
    %cst_104 = arith.constant 0.000000e+00 : f32
    %132 = vector.broadcast %cst_104 : f32 to vector<8x256xf32>
    %133 = arith.maximumf %131, %132 : vector<8x256xf32>
    %134 = arith.truncf %133 : vector<8x256xf32> to vector<8x256xbf16>
    %c0_105 = arith.constant 0 : index
    %c0_106 = arith.constant 0 : index
    %135 = vector.load %arg5[%c0_105, %c0_106] : memref<256x512xbf16, #tpu.memory_space<vmem>>, vector<256x512xbf16>
    %cst_107 = arith.constant dense<0.000000e+00> : vector<8x512xf32>
    %136 = tpu.matmul %134, %135, %cst_107 {dimension_numbers = #tpu.dot_dimension_numbers<[1], [0], [0], [1], [0, 0, 1, 1], [], []>} : vector<8x256xbf16>, vector<256x512xbf16>, vector<8x512xf32> -> vector<8x512xf32>
    %c0_108 = arith.constant 0 : index
    %c0_109 = arith.constant 0 : index
    %137 = vector.load %arg6[%c0_108, %c0_109] : memref<1x512xf32, #tpu.memory_space<vmem>>, vector<1x512xf32>
    %138 = vector.broadcast %137 : vector<1x512xf32> to vector<8x512xf32>
    %139 = arith.addf %136, %138 : vector<8x512xf32>
    %140 = arith.truncf %139 : vector<8x512xf32> to vector<8x512xbf16>
    %c5_110 = arith.constant 5 : index
    %c0_111 = arith.constant 0 : index
    %c0_112 = arith.constant 0 : index
    %141 = vector.load %arg7[%c5_110, %c0_111, %c0_112] : memref<8x8x512xbf16, #tpu.memory_space<vmem>>, vector<1x8x512xbf16>
    %142 = vector.shape_cast %141 : vector<1x8x512xbf16> to vector<8x512xbf16>
    %143 = vector.shape_cast %140 : vector<8x512xbf16> to vector<1x8x512xbf16>
    tpu.vector_store %arg7[%c5_110, %c0_111, %c0_112], %143 {strides = array<i32>} : memref<8x8x512xbf16, #tpu.memory_space<vmem>>, vector<1x8x512xbf16>,
    %c0_113 = arith.constant 0 : index
    %c6 = arith.constant 6 : index
    %c0_114 = arith.constant 0 : index
    %c0_115 = arith.constant 0 : index
    %144 = vector.load %arg2[%c0_113, %c6, %c0_114, %c0_115] : memref<8x8x4x256xbf16, #tpu.memory_space<vmem>>, vector<8x1x4x256xbf16>
    %145 = vector.shape_cast %144 : vector<8x1x4x256xbf16> to vector<8x4x256xbf16>
    %146 = arith.extf %145 : vector<8x4x256xbf16> to vector<8x4x256xf32>
    %cst_116 = arith.constant dense<0.000000e+00> : vector<8x4xf32>
    %147 = vector.multi_reduction <add>, %146, %cst_116 [2] : vector<8x4x256xf32> to vector<8x4xf32>
    %cst_117 = arith.constant 2.560000e+02 : f32
    %148 = vector.broadcast %cst_117 : f32 to vector<8x4xf32>
    %149 = arith.divf %147, %148 : vector<8x4xf32>
    %150 = arith.truncf %149 : vector<8x4xf32> to vector<8x4xbf16>
    %c0_118 = arith.constant 0 : index
    %c0_119 = arith.constant 0 : index
    %151 = vector.load %arg3[%c0_118, %c0_119] : memref<4x256xbf16, #tpu.memory_space<vmem>>, vector<4x256xbf16>
    %cst_120 = arith.constant dense<0.000000e+00> : vector<8x256xf32>
    %152 = tpu.matmul %150, %151, %cst_120 {dimension_numbers = #tpu.dot_dimension_numbers<[1], [0], [0], [1], [0, 0, 1, 1], [], []>} : vector<8x4xbf16>, vector<4x256xbf16>, vector<8x256xf32> -> vector<8x256xf32>
    %c0_121 = arith.constant 0 : index
    %c0_122 = arith.constant 0 : index
    %153 = vector.load %arg4[%c0_121, %c0_122] : memref<1x256xf32, #tpu.memory_space<vmem>>, vector<1x256xf32>
    %154 = vector.broadcast %153 : vector<1x256xf32> to vector<8x256xf32>
    %155 = arith.addf %152, %154 : vector<8x256xf32>
    %cst_123 = arith.constant 0.000000e+00 : f32
    %156 = vector.broadcast %cst_123 : f32 to vector<8x256xf32>
    %157 = arith.maximumf %155, %156 : vector<8x256xf32>
    %158 = arith.truncf %157 : vector<8x256xf32> to vector<8x256xbf16>
    %c0_124 = arith.constant 0 : index
    %c0_125 = arith.constant 0 : index
    %159 = vector.load %arg5[%c0_124, %c0_125] : memref<256x512xbf16, #tpu.memory_space<vmem>>, vector<256x512xbf16>
    %cst_126 = arith.constant dense<0.000000e+00> : vector<8x512xf32>
    %160 = tpu.matmul %158, %159, %cst_126 {dimension_numbers = #tpu.dot_dimension_numbers<[1], [0], [0], [1], [0, 0, 1, 1], [], []>} : vector<8x256xbf16>, vector<256x512xbf16>, vector<8x512xf32> -> vector<8x512xf32>
    %c0_127 = arith.constant 0 : index
    %c0_128 = arith.constant 0 : index
    %161 = vector.load %arg6[%c0_127, %c0_128] : memref<1x512xf32, #tpu.memory_space<vmem>>, vector<1x512xf32>
    %162 = vector.broadcast %161 : vector<1x512xf32> to vector<8x512xf32>
    %163 = arith.addf %160, %162 : vector<8x512xf32>
    %164 = arith.truncf %163 : vector<8x512xf32> to vector<8x512xbf16>
    %c6_129 = arith.constant 6 : index
    %c0_130 = arith.constant 0 : index
    %c0_131 = arith.constant 0 : index
    %165 = vector.load %arg7[%c6_129, %c0_130, %c0_131] : memref<8x8x512xbf16, #tpu.memory_space<vmem>>, vector<1x8x512xbf16>
    %166 = vector.shape_cast %165 : vector<1x8x512xbf16> to vector<8x512xbf16>
    %167 = vector.shape_cast %164 : vector<8x512xbf16> to vector<1x8x512xbf16>
    tpu.vector_store %arg7[%c6_129, %c0_130, %c0_131], %167 {strides = array<i32>} : memref<8x8x512xbf16, #tpu.memory_space<vmem>>, vector<1x8x512xbf16>,
    %c0_132 = arith.constant 0 : index
    %c7 = arith.constant 7 : index
    %c0_133 = arith.constant 0 : index
    %c0_134 = arith.constant 0 : index
    %168 = vector.load %arg2[%c0_132, %c7, %c0_133, %c0_134] : memref<8x8x4x256xbf16, #tpu.memory_space<vmem>>, vector<8x1x4x256xbf16>
    %169 = vector.shape_cast %168 : vector<8x1x4x256xbf16> to vector<8x4x256xbf16>
    %170 = arith.extf %169 : vector<8x4x256xbf16> to vector<8x4x256xf32>
    %cst_135 = arith.constant dense<0.000000e+00> : vector<8x4xf32>
    %171 = vector.multi_reduction <add>, %170, %cst_135 [2] : vector<8x4x256xf32> to vector<8x4xf32>
    %cst_136 = arith.constant 2.560000e+02 : f32
    %172 = vector.broadcast %cst_136 : f32 to vector<8x4xf32>
    %173 = arith.divf %171, %172 : vector<8x4xf32>
    %174 = arith.truncf %173 : vector<8x4xf32> to vector<8x4xbf16>
    %c0_137 = arith.constant 0 : index
    %c0_138 = arith.constant 0 : index
    %175 = vector.load %arg3[%c0_137, %c0_138] : memref<4x256xbf16, #tpu.memory_space<vmem>>, vector<4x256xbf16>
    %cst_139 = arith.constant dense<0.000000e+00> : vector<8x256xf32>
    %176 = tpu.matmul %174, %175, %cst_139 {dimension_numbers = #tpu.dot_dimension_numbers<[1], [0], [0], [1], [0, 0, 1, 1], [], []>} : vector<8x4xbf16>, vector<4x256xbf16>, vector<8x256xf32> -> vector<8x256xf32>
    %c0_140 = arith.constant 0 : index
    %c0_141 = arith.constant 0 : index
    %177 = vector.load %arg4[%c0_140, %c0_141] : memref<1x256xf32, #tpu.memory_space<vmem>>, vector<1x256xf32>
    %178 = vector.broadcast %177 : vector<1x256xf32> to vector<8x256xf32>
    %179 = arith.addf %176, %178 : vector<8x256xf32>
    %cst_142 = arith.constant 0.000000e+00 : f32
    %180 = vector.broadcast %cst_142 : f32 to vector<8x256xf32>
    %181 = arith.maximumf %179, %180 : vector<8x256xf32>
    %182 = arith.truncf %181 : vector<8x256xf32> to vector<8x256xbf16>
    %c0_143 = arith.constant 0 : index
    %c0_144 = arith.constant 0 : index
    %183 = vector.load %arg5[%c0_143, %c0_144] : memref<256x512xbf16, #tpu.memory_space<vmem>>, vector<256x512xbf16>
    %cst_145 = arith.constant dense<0.000000e+00> : vector<8x512xf32>
    %184 = tpu.matmul %182, %183, %cst_145 {dimension_numbers = #tpu.dot_dimension_numbers<[1], [0], [0], [1], [0, 0, 1, 1], [], []>} : vector<8x256xbf16>, vector<256x512xbf16>, vector<8x512xf32> -> vector<8x512xf32>
    %c0_146 = arith.constant 0 : index
    %c0_147 = arith.constant 0 : index
    %185 = vector.load %arg6[%c0_146, %c0_147] : memref<1x512xf32, #tpu.memory_space<vmem>>, vector<1x512xf32>
    %186 = vector.broadcast %185 : vector<1x512xf32> to vector<8x512xf32>
    %187 = arith.addf %184, %186 : vector<8x512xf32>
    %188 = arith.truncf %187 : vector<8x512xf32> to vector<8x512xbf16>
    %c7_148 = arith.constant 7 : index
    %c0_149 = arith.constant 0 : index
    %c0_150 = arith.constant 0 : index
    %189 = vector.load %arg7[%c7_148, %c0_149, %c0_150] : memref<8x8x512xbf16, #tpu.memory_space<vmem>>, vector<1x8x512xbf16>
    %190 = vector.shape_cast %189 : vector<1x8x512xbf16> to vector<8x512xbf16>
    %191 = vector.shape_cast %188 : vector<8x512xbf16> to vector<1x8x512xbf16>
    tpu.vector_store %arg7[%c7_148, %c0_149, %c0_150], %191 {strides = array<i32>} : memref<8x8x512xbf16, #tpu.memory_space<vmem>>, vector<1x8x512xbf16>,
    return
  }
  func.func @transform_0(%arg0: i32, %arg1: i32) -> (i32, i32, i32, i32) {
    %c0_i32 = arith.constant 0 : i32
    %c0_i32_0 = arith.constant 0 : i32
    %c0_i32_1 = arith.constant 0 : i32
    return %arg1, %arg0, %c0_i32, %c0_i32_0 : i32, i32, i32, i32
  }
  func.func @transform_1(%arg0: i32, %arg1: i32) -> (i32, i32) {
    %c0_i32 = arith.constant 0 : i32
    %c0_i32_0 = arith.constant 0 : i32
    %c0_i32_1 = arith.constant 0 : i32
    return %c0_i32, %c0_i32_0 : i32, i32
  }
  func.func @transform_2(%arg0: i32, %arg1: i32) -> (i32, i32) {
    %c0_i32 = arith.constant 0 : i32
    %c0_i32_0 = arith.constant 0 : i32
    %c0_i32_1 = arith.constant 0 : i32
    return %c0_i32, %c0_i32_0 : i32, i32
  }
  func.func @transform_3(%arg0: i32, %arg1: i32) -> (i32, i32) {
    %c0_i32 = arith.constant 0 : i32
    %c0_i32_0 = arith.constant 0 : i32
    %c0_i32_1 = arith.constant 0 : i32
    return %c0_i32, %c0_i32_0 : i32, i32
  }
  func.func @transform_4(%arg0: i32, %arg1: i32) -> (i32, i32) {
    %c0_i32 = arith.constant 0 : i32
    %c0_i32_0 = arith.constant 0 : i32
    %c0_i32_1 = arith.constant 0 : i32
    return %c0_i32, %c0_i32_0 : i32, i32
  }
  func.func @transform_5(%arg0: i32, %arg1: i32) -> (i32, i32, i32) {
    %c0_i32 = arith.constant 0 : i32
    %c0_i32_0 = arith.constant 0 : i32
    return %arg0, %arg1, %c0_i32 : i32, i32, i32
  }
}

</mosaic_0001>

<bundles_post_ra>
// kernel: tpu_custom_call.1
= control target key start
LH: loop header
LB: loop body
LE: loop exit
PB: predicated region body
PF: predicated region fallthrough
CT: control target
= control target key end

     0   :  { %10 = vsyncpa [#allocation3], 0  ;;  %s8650_s0 = inlined_call_operand.hbm [shape: bf16[8,8,4,256], index: 0, kind: input, shape index: {}]   ;;  %s8651_s1 = inlined_call_operand.hbm [shape: bf16[4,256], index: 1, kind: input, shape index: {}]   ;;  %s8652_s2 = inlined_call_operand.vmem [shape: f32[1,256], index: 2, kind: input, shape index: {}]   ;;  %s8653_s3 = inlined_call_operand.hbm [shape: bf16[256,512], index: 3, kind: input, shape index: {}]   ;;  %s8654_s4 = inlined_call_operand.vmem [shape: f32[1,512], index: 4, kind: input, shape index: {}]   ;;  %s8655_s5 = inlined_call_operand.hbm [shape: bf16[8,8,512], index: 5, kind: output, shape index: {}]  }
   0x1   :  { %11 = vsyncpa [#allocation6], 0 }
   0x2   :  { %12 = vsyncpa [#allocation4], 0  ;;  %s7025_s18 = smov [#allocation5]   ;;  %s7026_s20 = smov [#allocation2]  }
   0x3   :  { %s31_s19 = sshll.u32 %s7025_s18, 4  ;;  %s18_s21 = sshll.u32 %s7026_s20, 4  ;;  %s32_s19 = int_to_ptr.vmem [resolvable:$true] %s31_s19  ;;  %s19_s21 = int_to_ptr.vmem [resolvable:$true] %s18_s21 }
   0x4   :  { %s6947_s22 = scalar_lea.vmem %s32_s19, 64  ;;  %p6952_p1 = scmp.lt.s32.totalorder %s32_s19, %s32_s19 }
   0x5   :  { %p6948_p0 = scmp.ne.s32.totalorder %s32_s19, %s6947_s22  ;;  %p6953_p2 = scmp.lt.s32.totalorder %s6947_s22, %s6947_s22 }
   0x7   :  { %p6954_p3 = por %p6953_p2, %p6952_p1 }
   0x9   :  { %p6955_p4 = pnand %p6954_p3, %p6948_p0 }
   0xb   :  { %6958 = shalt.err (!%p6955_p4)
}
   0xc   :  { %34 = dma.hbm_to_vmem [thread:$0]  %s8651_s1, 64, %s32_s19, [#allocation6]  }
   0xd   :  { %s6967_s25 = scalar_lea.vmem %s19_s21, 4096  ;;  %p6972_p6 = scmp.lt.s32.totalorder %s19_s21, %s19_s21 }
   0xe   :  { %p6968_p5 = scmp.ne.s32.totalorder %s19_s21, %s6967_s25  ;;  %p6973_p7 = scmp.lt.s32.totalorder %s6967_s25, %s6967_s25 }
  0x10   :  { %p6974_p8 = por %p6973_p7, %p6972_p6 }
  0x12   :  { %p6975_p9 = pnand %p6974_p8, %p6968_p5 }
  0x14   :  { %6978 = shalt.err (!%p6975_p9)
}
  0x15   :  { %s7027_s26 = smov 64   ;;  %s7028_s27 = smov 4  }
  0x16   :  { %24 = dma.hbm_to_vmem [thread:$0]  %s8650_s0, 4096, %s19_s21, [#allocation3], %s7027_s26, %s7027_s26, %s7028_s27  }
  0x17   :  { %s7029_s30 = smov [#allocation7]  }
  0x18   :  { %s42_s6 = sshll.u32 %s7029_s30, 4  ;;  %s43_s6 = int_to_ptr.vmem [resolvable:$true] %s42_s6 }
  0x19   :  { %s6987_s7 = scalar_lea.vmem %s43_s6, 8192  ;;  %p6992_p11 = scmp.lt.s32.totalorder %s43_s6, %s43_s6 }
  0x1a   :  { %p6988_p10 = scmp.ne.s32.totalorder %s43_s6, %s6987_s7  ;;  %p6993_p12 = scmp.lt.s32.totalorder %s6987_s7, %s6987_s7 }
  0x1c   :  { %p6994_p13 = por %p6993_p12, %p6992_p11 }
  0x1e   :  { %p6995_p0 = pnand %p6994_p13, %p6988_p10 }
  0x20   :  { %6998 = shalt.err (!%p6995_p0)
}
  0x21   :  { %s7030_s1 = smov 256   ;;  %s7031_s8 = smov 16  }
  0x22   :  { %48 = dma.hbm_to_vmem [thread:$0]  %s8653_s3, 8192, %s43_s6, [#allocation6], %s7030_s1, %s7030_s1, %s7031_s8  }
  0x23   :  { %7019 = dma.done.wait [#allocation3], 4096  }
  0x24   :  { %7020 = vsyncadd [#allocation3], 4294963200 }
  0x25   :  { %7021 = dma.done.wait [#allocation6], 8256  }
  0x26   :  { %7022 = vsyncadd [#allocation6], 4294959040  ;;  %v7076_v0 = vld [vmem:[#allocation2] sm:$0xff]   ;;  %vm101_vm0 = vcmask 1043456   ;;  %vm250_vm1 = vcmask 1041408   ;;  %v8656_v51 = vmov 0  }
  0x27   :  { %v7078_v1 = vld [vmem:[#allocation2 + $0x40] sm:$0xff]   ;;  %v69_v3 = vunpack.c.l.bf16 %v7076_v0  ;;  %289 = vmatprep.mubr.bf16.mxu0 %v8656_v51  ;;  %v817_v52 = vunpack.c.h.bf16 %v7076_v0  ;;  %v7112_v56 = vld [vmem:[#allocation7 + $0xe4] ss:$16 sps:$4 sm:$0xff]   ;;  %vm222_vm2 = vcmask 1041409   ;;  %vm224_vm3 = vcmask 1042434   ;;  %s7033_s14 = smov [#allocation8]  }
  0x28   :  { %v62_v2 = vld [vmem:[#allocation2 + $0x20] sm:$0xff]   ;;  %v71_v4 = vunpack.c.l.bf16 %v7078_v1  ;;  %v819_v54 = vunpack.c.h.bf16 %v7078_v1  ;;  %v7118_v62 = vld [vmem:[#allocation7 + $0xc4] ss:$16 sps:$4 sm:$0xff]   ;;  %708 = vmatprep.subr.bf16.mxu1 %v7112_v56  ;;  %vm226_vm4 = vcmask 1043459   ;;  %vm228_vm5 = vcmask 1044484   ;;  %s5965_s15 = sshll.u32 %s7033_s14, 4  ;;  %s5966_s15 = int_to_ptr.vmem [resolvable:$true] %s5965_s15 }
  0x29   :  { %v70_v5 = vunpack.c.l.bf16 %v62_v2  ;;  %v64_v6 = vld [vmem:[#allocation2 + $0x60] sm:$0xff]   ;;  %v85_v12 = vcombine.high %v69_v3, %v69_v3  ;;  %v102_v13 = vsel %vm101_vm0, %v69_v3, 0.0  ;;  %v818_v53 = vunpack.c.h.bf16 %v62_v2  ;;  %v7324_v51 = vld [vmem:[#allocation7 + $0x128] ss:$16 sps:$4 sm:$0xff]   ;;  %p7004_p2 = scmp.lt.s32.totalorder %s5966_s15, %s5966_s15 }
  0x2a   :  { %v65_v7 = vld [vmem:[#allocation2 + $0x80] sm:$0xff]   ;;  %v72_v9 = vunpack.c.l.bf16 %v64_v6  ;;  %v87_v14 = vcombine.high %v71_v4, %v71_v4  ;;  %v112_v15 = vsel %vm101_vm0, %v71_v4, 0.0  ;;  %v820_v55 = vunpack.c.h.bf16 %v64_v6  ;;  %8852 = vst [vmem:[#allocation34_spill] sm:$0xff] %v7324_v51 }
  0x2b   :  { %v66_v8 = vld [vmem:[#allocation2 + $0xa0] sm:$0xff]   ;;  %v73_v10 = vunpack.c.l.bf16 %v65_v7  ;;  %v86_v18 = vcombine.high %v70_v5, %v70_v5  ;;  %v107_v19 = vsel %vm101_vm0, %v70_v5, 0.0  ;;  %v103_v21 = vsel %vm101_vm0, %v85_v12, 0.0 }
  0x2c   :  { %v74_v11 = vunpack.c.l.bf16 %v66_v8  ;;  %v67_v16 = vld [vmem:[#allocation2 + $0xc0] sm:$0xff]   ;;  %v88_v20 = vcombine.high %v72_v9, %v72_v9  ;;  %v113_v22 = vsel %vm101_vm0, %v87_v14, 0.0  ;;  %v117_v23 = vsel %vm101_vm0, %v72_v9, 0.0 }
  0x2d   :  { %v7084_v17 = vld [vmem:[#allocation2 + $0xe0] sm:$0xff]   ;;  %v89_v24 = vcombine.high %v73_v10, %v73_v10  ;;  %v104_v25 = vadd.f32 %v103_v21, %v102_v13  ;;  %v114_v26 = vadd.f32 %v113_v22, %v112_v15  ;;  %v108_v27 = vsel %vm101_vm0, %v86_v18, 0.0 }
  0x2e   :  { %v118_v28 = vsel %vm101_vm0, %v88_v20, 0.0  ;;  %v122_v29 = vsel %vm101_vm0, %v73_v10, 0.0  ;;  %v90_v30 = vcombine.high %v74_v11, %v74_v11  ;;  %v109_v31 = vadd.f32 %v108_v27, %v107_v19  ;;  %v5978_v48 = vld.sshfl [vmem:[#allocation5] sm:$0x33 pattern:$0x76325410] }
  0x2f   :  { %105 = vadd.xlane.f32.xlu0 %v104_v25  ;;  %115 = vadd.xlane.f32.xlu1 %v114_v26  ;;  %v119_v32 = vadd.f32 %v118_v28, %v117_v23  ;;  %v75_v33 = vunpack.c.l.bf16 %v67_v16  ;;  %v76_v34 = vunpack.c.l.bf16 %v7084_v17  ;;  %v123_v35 = vsel %vm101_vm0, %v89_v24, 0.0  ;;  %v7114_v57 = vld [vmem:[#allocation7 + $0xe0] ss:$16 sps:$4 sm:$0xff]   ;;  %v7116_v61 = vld [vmem:[#allocation7 + $0xec] ss:$16 sps:$4 sm:$0xff]  }
  0x30   :  { %v127_v36 = vsel %vm101_vm0, %v74_v11, 0.0  ;;  %v128_v37 = vsel %vm101_vm0, %v90_v30, 0.0  ;;  %v124_v40 = vadd.f32 %v123_v35, %v122_v29  ;;  %v7101_v49 = vcombine.high %v5978_v48, %v5978_v48  ;;  %v7123_v1 = vld [vmem:[#allocation7 + $0xc0] ss:$16 sps:$4 sm:$0xff]   ;;  %709 = vmatpush1.bf16.msra.mxu1 %v7114_v57  ;;  %v7145_v27 = vld [vmem:[#allocation7 + $0x84] ss:$16 sps:$4 sm:$0xff]  }
  0x31   :  { %v91_v38 = vcombine.high %v75_v33, %v75_v33  ;;  %v92_v39 = vcombine.high %v76_v34, %v76_v34  ;;  %v129_v41 = vadd.f32 %v128_v37, %v127_v36  ;;  %v132_v42 = vsel %vm101_vm0, %v75_v33, 0.0  ;;  %710 = vmatprep.subr.bf16.mxu1 %v7118_v62  ;;  %v7137_v18 = vld [vmem:[#allocation7 + $0xa0] ss:$16 sps:$4 sm:$0xff]   ;;  %v7155_v35 = vld [vmem:[#allocation7 + $0x64] ss:$16 sps:$4 sm:$0xff]  }
  0x32   :  { %v137_v44 = vsel %vm101_vm0, %v76_v34, 0.0  ;;  %5979 = vmatprep.subr.msk.bf16.mxu0 %vm250_vm1, %v7101_v49  ;;  %v7106_v50 = vsel %vm250_vm1, %v5978_v48, 0  ;;  %v821_v58 = vunpack.c.h.bf16 %v65_v7  ;;  %v822_v59 = vunpack.c.h.bf16 %v66_v8  ;;  %v7147_v28 = vld [vmem:[#allocation7 + $0x80] ss:$16 sps:$4 sm:$0xff]  }
  0x33   :  { %110 = vadd.xlane.f32.xlu0 %v109_v31  ;;  %120 = vadd.xlane.f32.xlu1 %v119_v32  ;;  %v133_v43 = vsel %vm101_vm0, %v91_v38, 0.0  ;;  %v138_v45 = vsel %vm101_vm0, %v92_v39, 0.0  ;;  %v823_v60 = vunpack.c.h.bf16 %v67_v16  ;;  %v833_v63 = vcombine.high %v817_v52, %v817_v52  ;;  %v7135_v16 = vld [vmem:[#allocation7 + $0xa4] ss:$16 sps:$4 sm:$0xff]   ;;  %v7157_v36 = vld [vmem:[#allocation7 + $0x60] ss:$16 sps:$4 sm:$0xff]  }
  0x34   :  { %v134_v46 = vadd.f32 %v133_v43, %v132_v42  ;;  %v139_v47 = vadd.f32 %v138_v45, %v137_v44  ;;  %272 = vmatpush1.bf16.msra.mxu0 %v7106_v50  ;;  %v849_v3 = vsel %vm101_vm0, %v817_v52, 0.0  ;;  %v834_v4 = vcombine.high %v818_v53, %v818_v53  ;;  %711 = vmatpush1.bf16.msra.mxu1 %v7123_v1  ;;  %v7161_v39 = vld [vmem:[#allocation7 + $0x44] ss:$16 sps:$4 sm:$0xff]   ;;  %v7169_v42 = vld [vmem:[#allocation7 + $0x20] ss:$16 sps:$4 sm:$0xff]  }
  0x35   :  { %v854_v0 = vsel %vm101_vm0, %v818_v53, 0.0  ;;  %v835_v2 = vcombine.high %v819_v54, %v819_v54  ;;  %v859_v5 = vsel %vm101_vm0, %v819_v54, 0.0  ;;  %v836_v6 = vcombine.high %v820_v55, %v820_v55  ;;  %749 = vmatprep.subr.bf16.mxu0 %v7116_v61  ;;  %712 = vmatprep.subr.bf16.mxu1 %v7135_v16  ;;  %v7173_v43 = vld [vmem:[#allocation7 + $0x4] ss:$16 sps:$4 sm:$0xff]   ;;  %v7175_v44 = vld [vmem:[#allocation7] ss:$16 sps:$4 sm:$0xff]  }
  0x36   :  { %v824_v7 = vunpack.c.h.bf16 %v7084_v17  ;;  %v850_v8 = vsel %vm101_vm0, %v833_v63, 0.0  ;;  %v855_v9 = vsel %vm101_vm0, %v834_v4, 0.0  ;;  %v864_v10 = vsel %vm101_vm0, %v820_v55, 0.0  ;;  %v7179_v45 = vld [vmem:[#allocation7 + $0x1e4] ss:$16 sps:$4 sm:$0xff]  }
  0x37   :  { %125 = vadd.xlane.f32.xlu0 %v124_v40  ;;  %130 = vadd.xlane.f32.xlu1 %v129_v41  ;;  %v837_v11 = vcombine.high %v821_v58, %v821_v58  ;;  %v851_v12 = vadd.f32 %v850_v8, %v849_v3  ;;  %v856_v13 = vadd.f32 %v855_v9, %v854_v0  ;;  %v860_v14 = vsel %vm101_vm0, %v835_v2, 0.0  ;;  %v7163_v40 = vld [vmem:[#allocation7 + $0x40] ss:$16 sps:$4 sm:$0xff]   ;;  %v7167_v41 = vld [vmem:[#allocation7 + $0x24] ss:$16 sps:$4 sm:$0xff]  }
  0x38   :  { %v865_v15 = vsel %vm101_vm0, %v836_v6, 0.0  ;;  %v838_v17 = vcombine.high %v822_v59, %v822_v59  ;;  %v861_v19 = vadd.f32 %v860_v14, %v859_v5  ;;  %v869_v21 = vsel %vm101_vm0, %v821_v58, 0.0  ;;  %713 = vmatpush1.bf16.msra.mxu1 %v7137_v18  ;;  %v7187_v48 = vld [vmem:[#allocation7 + $0x1c0] ss:$16 sps:$4 sm:$0xff]   ;;  %v7191_v52 = vld [vmem:[#allocation7 + $0x1a4] ss:$16 sps:$4 sm:$0xff]  }
  0x39   :  { %v866_v20 = vadd.f32 %v865_v15, %v864_v10  ;;  %v870_v22 = vsel %vm101_vm0, %v837_v11, 0.0  ;;  %v874_v23 = vsel %vm101_vm0, %v822_v59, 0.0  ;;  %v839_v25 = vcombine.high %v823_v60, %v823_v60  ;;  %714 = vmatprep.subr.bf16.mxu1 %v7145_v27  ;;  %v7193_v53 = vld [vmem:[#allocation7 + $0x1a0] ss:$16 sps:$4 sm:$0xff]   ;;  %v7197_v54 = vld [vmem:[#allocation7 + $0x184] ss:$16 sps:$4 sm:$0xff]  }
  0x3a   :  { %v875_v24 = vsel %vm101_vm0, %v838_v17, 0.0  ;;  %v840_v26 = vcombine.high %v824_v7, %v824_v7  ;;  %v871_v29 = vadd.f32 %v870_v22, %v869_v21  ;;  %v879_v31 = vsel %vm101_vm0, %v823_v60, 0.0  ;;  %8830 = vst [vmem:[#allocation12_spill] sm:$0xff] %v7193_v53  ;;  %8831 = vst [vmem:[#allocation13_spill] sm:$0xff] %v7197_v54  ;;  %v7199_v55 = vld [vmem:[#allocation7 + $0x180] ss:$16 sps:$4 sm:$0xff]  }
  0x3b   :  { %135 = vadd.xlane.f32.xlu0 %v134_v46  ;;  %140 = vadd.xlane.f32.xlu1 %v139_v47  ;;  %v876_v30 = vadd.f32 %v875_v24, %v874_v23  ;;  %v880_v32 = vsel %vm101_vm0, %v839_v25, 0.0  ;;  %v884_v33 = vsel %vm101_vm0, %v824_v7, 0.0  ;;  %v7181_v46 = vld [vmem:[#allocation7 + $0x1e0] ss:$16 sps:$4 sm:$0xff]   ;;  %v7185_v47 = vld [vmem:[#allocation7 + $0x1c4] ss:$16 sps:$4 sm:$0xff]   ;;  %v162_v3 = vlaneseq }
  0x3c   :  { %v885_v34 = vsel %vm101_vm0, %v840_v26, 0.0  ;;  %v881_v37 = vadd.f32 %v880_v32, %v879_v31  ;;  %715 = vmatpush1.bf16.msra.mxu1 %v7147_v28  ;;  %8832 = vst [vmem:[#allocation14_spill] sm:$0xff] %v7199_v55  ;;  %v7203_v58 = vld [vmem:[#allocation7 + $0x164] ss:$16 sps:$4 sm:$0xff]   ;;  %v7205_v59 = vld [vmem:[#allocation7 + $0x160] ss:$16 sps:$4 sm:$0xff]  }
  0x3d   :  { %v886_v38 = vadd.f32 %v885_v34, %v884_v33  ;;  %716 = vmatprep.subr.bf16.mxu1 %v7155_v35  ;;  %8833 = vst [vmem:[#allocation15_spill] sm:$0xff] %v7203_v58  ;;  %8834 = vst [vmem:[#allocation16_spill] sm:$0xff] %v7205_v59  ;;  %v7209_v60 = vld [vmem:[#allocation7 + $0x144] ss:$16 sps:$4 sm:$0xff]   ;;  %v7211_v63 = vld [vmem:[#allocation7 + $0x140] ss:$16 sps:$4 sm:$0xff]  }
  0x3e   :  { %8835 = vst [vmem:[#allocation17_spill] sm:$0xff] %v7209_v60  ;;  %8836 = vst [vmem:[#allocation18_spill] sm:$0xff] %v7211_v63  ;;  %v7216_v6 = vshrl.u32 %v162_v3, 7  ;;  %v189_v7 = vand.u32 127, %v162_v3  ;;  %vm230_vm6 = vcmask 1045509   ;;  %vm232_vm7 = vcmask 1046534  }
  0x3f   :  { %852 = vadd.xlane.f32.xlu0 %v851_v12  ;;  %857 = vadd.xlane.f32.xlu1 %v856_v13  ;;  %vm234_vm8 = vcmask 1047559   ;;  %vm246_vm9 = vcmask 31744  }
  0x40   :  { %717 = vmatpush1.bf16.msra.mxu1 %v7157_v36  ;;  %8837 = vst [vmem:[#allocation19_spill] sm:$0xff] %v7216_v6  ;;  %v7219_v14 = vsub.s32 %v189_v7, %v7216_v6 }
  0x41   :  { %718 = vmatprep.subr.bf16.mxu1 %v7161_v39 }
  0x43   :  { %862 = vadd.xlane.f32.xlu0 %v861_v19  ;;  %867 = vadd.xlane.f32.xlu1 %v866_v20 }
  0x44   :  { %719 = vmatpush1.bf16.msra.mxu1 %v7163_v40 }
  0x45   :  { %720 = vmatprep.subr.bf16.mxu1 %v7167_v41 }
  0x47   :  { %872 = vadd.xlane.f32.xlu0 %v871_v29  ;;  %877 = vadd.xlane.f32.xlu1 %v876_v30 }
  0x48   :  { %721 = vmatpush1.bf16.msra.mxu1 %v7169_v42 }
  0x49   :  { %722 = vmatprep.subr.bf16.mxu1 %v7173_v43 }
  0x4b   :  { %882 = vadd.xlane.f32.xlu0 %v881_v37  ;;  %887 = vadd.xlane.f32.xlu1 %v886_v38 }
  0x4c   :  { %723 = vmatpush1.bf16.msra.mxu1 %v7175_v44 }
  0x4d   :  { %724 = vmatprep.subr.bf16.mxu1 %v7179_v45 }
  0x50   :  { %725 = vmatpush2.bf16.msra.mxu1 %v7181_v46 }
  0x51   :  { %726 = vmatprep.subr.bf16.mxu1 %v7185_v47 }
  0x54   :  { %727 = vmatpush2.bf16.msra.mxu1 %v7187_v48 }
  0x55   :  { %728 = vmatprep.subr.bf16.mxu1 %v7191_v52 }
  0x58   :  { %729 = vmatpush2.bf16.msra.mxu1 %v7193_v53 }
  0x59   :  { %730 = vmatprep.subr.bf16.mxu1 %v7197_v54 }
  0x5c   :  { %731 = vmatpush2.bf16.msra.mxu1 %v7199_v55 }
  0x5d   :  { %732 = vmatprep.subr.bf16.mxu1 %v7203_v58 }
  0x60   :  { %733 = vmatpush2.bf16.msra.mxu1 %v7205_v59 }
  0x61   :  { %734 = vmatprep.subr.bf16.mxu1 %v7209_v60 }
  0x64   :  { %735 = vmatpush2.bf16.msra.mxu1 %v7211_v63  ;;  %v7336_v63 = vld [vmem:[#allocation7 + $0x108] ss:$16 sps:$4 sm:$0xff]  }
  0x65   :  { %8856 = vst [vmem:[#allocation38_spill] sm:$0xff] %v7336_v63 }
  0xb8   :  { %v106_v4 = vpop.xlane.xlu0 %105  ;;  %v116_v0 = vpop.xlane.xlu1 %115 }
  0xb9   :  { %v143_v2 = vmul.f32 0.00390625, %v106_v4  ;;  %v145_v5 = vmul.f32 0.00390625, %v116_v0 }
  0xbb   :  { %v151_v8 = vpack.c.bf16 %v143_v2, %v143_v2  ;;  %v153_v9 = vpack.c.bf16 %v145_v5, %v145_v5 }
  0xbc   :  { %v111_v10 = vpop.xlane.xlu0 %110  ;;  %v121_v11 = vpop.xlane.xlu1 %120 }
  0xbd   :  { %v144_v12 = vmul.f32 0.00390625, %v111_v10  ;;  %v146_v13 = vmul.f32 0.00390625, %v121_v11  ;;  %v180_v15 = vunpack.c.l.b16 %v151_v8  ;;  %v182_v20 = vunpack.c.l.b16 %v153_v9 }
  0xbf   :  { %v152_v17 = vpack.c.bf16 %v144_v12, %v144_v12  ;;  %v154_v19 = vpack.c.bf16 %v146_v13, %v146_v13  ;;  %v193_v29 = vrot.slane %v180_v15, %v7219_v14  ;;  %v201_v34 = vrot.slane %v182_v20, %v7219_v14 }
  0xc0   :  { %v126_v21 = vpop.xlane.xlu0 %125  ;;  %v131_v22 = vpop.xlane.xlu1 %130 }
  0xc1   :  { %v181_v23 = vunpack.c.l.b16 %v152_v17  ;;  %v183_v24 = vunpack.c.l.b16 %v154_v19  ;;  %v147_v25 = vmul.f32 0.00390625, %v126_v21  ;;  %v148_v26 = vmul.f32 0.00390625, %v131_v22 }
  0xc3   :  { %v197_v30 = vrot.slane %v181_v23, %v7219_v14  ;;  %v205_v31 = vrot.slane %v183_v24, %v7219_v14  ;;  %v155_v32 = vpack.c.bf16 %v147_v25, %v147_v25  ;;  %v156_v33 = vpack.c.bf16 %v148_v26, %v148_v26  ;;  %v7236_v24 = vld [vmem:[#allocation7 + $0xe8] ss:$16 sps:$4 sm:$0xff]   ;;  %v7238_v26 = vld [vmem:[#allocation7 + $0xcc] ss:$16 sps:$4 sm:$0xff]  }
  0xc4   :  { %v136_v37 = vpop.xlane.xlu0 %135  ;;  %v141_v38 = vpop.xlane.xlu1 %140 }
  0xc5   :  { %v223_v3 = vsel %vm222_vm2, %v197_v30, %v193_v29  ;;  %v184_v4 = vunpack.c.l.b16 %v155_v32  ;;  %v185_v0 = vunpack.c.l.b16 %v156_v33  ;;  %v149_v2 = vmul.f32 0.00390625, %v136_v37  ;;  %v7242_v29 = vld [vmem:[#allocation7 + $0xc8] ss:$16 sps:$4 sm:$0xff]   ;;  %v7245_v30 = vld [vmem:[#allocation7 + $0xac] ss:$16 sps:$4 sm:$0xff]  }
  0xc6   :  { %v225_v5 = vsel %vm224_vm3, %v201_v34, %v223_v3  ;;  %v150_v7 = vmul.f32 0.00390625, %v141_v38  ;;  %v7251_v32 = vld [vmem:[#allocation7 + $0x8c] ss:$16 sps:$4 sm:$0xff]   ;;  %v7254_v33 = vld [vmem:[#allocation7 + $0x88] ss:$16 sps:$4 sm:$0xff]  }
  0xc7   :  { %v227_v8 = vsel %vm226_vm4, %v205_v31, %v225_v5  ;;  %v209_v9 = vrot.slane %v184_v4, %v7219_v14  ;;  %v157_v10 = vpack.c.bf16 %v149_v2, %v149_v2  ;;  %v213_v11 = vrot.slane %v185_v0, %v7219_v14  ;;  %v7248_v31 = vld [vmem:[#allocation7 + $0xa8] ss:$16 sps:$4 sm:$0xff]   ;;  %v7257_v34 = vld [vmem:[#allocation7 + $0x6c] ss:$16 sps:$4 sm:$0xff]  }
  0xc8   :  { %v158_v12 = vpack.c.bf16 %v150_v7, %v150_v7  ;;  %v7260_v37 = vld [vmem:[#allocation7 + $0x68] ss:$16 sps:$4 sm:$0xff]   ;;  %v7263_v38 = vld [vmem:[#allocation7 + $0x4c] ss:$16 sps:$4 sm:$0xff]  }
  0xc9   :  { %v229_v13 = vsel %vm228_vm5, %v209_v9, %v227_v8  ;;  %v186_v15 = vunpack.c.l.b16 %v157_v10  ;;  %v7266_v3 = vld [vmem:[#allocation7 + $0x48] ss:$16 sps:$4 sm:$0xff]   ;;  %v7269_v4 = vld [vmem:[#allocation7 + $0x2c] ss:$16 sps:$4 sm:$0xff]  }
  0xca   :  { %v187_v17 = vunpack.c.l.b16 %v158_v12  ;;  %v231_v20 = vsel %vm230_vm6, %v213_v11, %v229_v13  ;;  %v7272_v0 = vld [vmem:[#allocation7 + $0x28] ss:$16 sps:$4 sm:$0xff]   ;;  %v7275_v2 = vld [vmem:[#allocation7 + $0xc] ss:$16 sps:$4 sm:$0xff]  }
  0xcb   :  { %v217_v19 = vrot.slane %v186_v15, %v7219_v14  ;;  %v7278_v5 = vld [vmem:[#allocation7 + $0x8] ss:$16 sps:$4 sm:$0xff]   ;;  %v7281_v7 = vld [vmem:[#allocation7 + $0x1ec] ss:$16 sps:$4 sm:$0xff]  }
  0xcc   :  { %v221_v21 = vrot.slane %v187_v17, %v7219_v14  ;;  %v7284_v8 = vld [vmem:[#allocation7 + $0x1e8] ss:$16 sps:$4 sm:$0xff]   ;;  %v7287_v9 = vld [vmem:[#allocation7 + $0x1cc] ss:$16 sps:$4 sm:$0xff]  }
  0xcd   :  { %v233_v22 = vsel %vm232_vm7, %v217_v19, %v231_v20  ;;  %8838 = vst [vmem:[#allocation20_spill] sm:$0xff] %v7284_v8  ;;  %8839 = vst [vmem:[#allocation21_spill] sm:$0xff] %v7287_v9  ;;  %v7290_v10 = vld [vmem:[#allocation7 + $0x1c8] ss:$16 sps:$4 sm:$0xff]   ;;  %v7293_v11 = vld [vmem:[#allocation7 + $0x1ac] ss:$16 sps:$4 sm:$0xff]  }
  0xce   :  { %v235_v23 = vsel %vm234_vm8, %v221_v21, %v233_v22  ;;  %8840 = vst [vmem:[#allocation22_spill] sm:$0xff] %v7290_v10  ;;  %8841 = vst [vmem:[#allocation23_spill] sm:$0xff] %v7293_v11  ;;  %v7296_v12 = vld [vmem:[#allocation7 + $0x1a8] ss:$16 sps:$4 sm:$0xff]   ;;  %v7299_v13 = vld [vmem:[#allocation7 + $0x18c] ss:$16 sps:$4 sm:$0xff]  }
  0xcf   :  { %v236_v25 = vpack.c.b16 %v235_v23, %v235_v23  ;;  %8842 = vst [vmem:[#allocation24_spill] sm:$0xff] %v7296_v12  ;;  %8843 = vst [vmem:[#allocation25_spill] sm:$0xff] %v7299_v13  ;;  %v7302_v15 = vld [vmem:[#allocation7 + $0x188] ss:$16 sps:$4 sm:$0xff]   ;;  %v7305_v17 = vld [vmem:[#allocation7 + $0x16c] ss:$16 sps:$4 sm:$0xff]  }
  0xd0   :  { %8844 = vst [vmem:[#allocation26_spill] sm:$0xff] %v7302_v15  ;;  %8845 = vst [vmem:[#allocation27_spill] sm:$0xff] %v7305_v17  ;;  %v7308_v19 = vld [vmem:[#allocation7 + $0x168] ss:$16 sps:$4 sm:$0xff]   ;;  %v7311_v20 = vld [vmem:[#allocation7 + $0x14c] ss:$16 sps:$4 sm:$0xff]  }
  0xd1   :  { %5980 = vmatmul.mubr.msk.bf16.vlgmr.msra.gmra.mxu0 %vm246_vm9, %v236_v25  ;;  %8846 = vst [vmem:[#allocation28_spill] sm:$0xff] %v7308_v19  ;;  %8847 = vst [vmem:[#allocation29_spill] sm:$0xff] %v7311_v20  ;;  %v7314_v21 = vld [vmem:[#allocation7 + $0x148] ss:$16 sps:$4 sm:$0xff]   ;;  %v7318_v22 = vld [vmem:[#allocation7 + $0x124] ss:$16 sps:$4 sm:$0xff]  }
  0xd2   :  { %750 = vmatpush1.bf16.msra.mxu0 %v7236_v24  ;;  %8848 = vst [vmem:[#allocation30_spill] sm:$0xff] %v7314_v21  ;;  %8849 = vst [vmem:[#allocation31_spill] sm:$0xff] %v7318_v22  ;;  %v7320_v23 = vld [vmem:[#allocation7 + $0x12c] ss:$16 sps:$4 sm:$0xff]   ;;  %v7322_v25 = vld [vmem:[#allocation7 + $0x120] ss:$16 sps:$4 sm:$0xff]   ;;  %736 = vmatprep.subr.bf16.mxu1 %v7318_v22 }
  0xd3   :  { %751 = vmatprep.subr.bf16.mxu0 %v7238_v26  ;;  %8850 = vst [vmem:[#allocation32_spill] sm:$0xff] %v7320_v23  ;;  %8851 = vst [vmem:[#allocation33_spill] sm:$0xff] %v7322_v25  ;;  %737 = vmatpush2.bf16.msra.mxu1 %v7322_v25  ;;  %v7349_v25 = vld [vmem:[#allocation2 + $0x48] sm:$0xff]  }
  0xd4   :  { %8859 = vst [vmem:[#allocation41_spill] sm:$0xff] %v7349_v25 }
  0xd6   :  { %752 = vmatpush1.bf16.msra.mxu0 %v7242_v29 }
  0xd7   :  { %753 = vmatprep.subr.bf16.mxu0 %v7245_v30 }
  0xda   :  { %754 = vmatpush1.bf16.msra.mxu0 %v7248_v31 }
  0xdb   :  { %755 = vmatprep.subr.bf16.mxu0 %v7251_v32 }
  0xde   :  { %756 = vmatpush1.bf16.msra.mxu0 %v7254_v33 }
  0xdf   :  { %757 = vmatprep.subr.bf16.mxu0 %v7257_v34 }
  0xe2   :  { %758 = vmatpush1.bf16.msra.mxu0 %v7260_v37 }
  0xe3   :  { %759 = vmatprep.subr.bf16.mxu0 %v7263_v38 }
  0xe6   :  { %760 = vmatpush1.bf16.msra.mxu0 %v7266_v3 }
  0xe7   :  { %761 = vmatprep.subr.bf16.mxu0 %v7269_v4 }
  0xea   :  { %762 = vmatpush1.bf16.msra.mxu0 %v7272_v0 }
  0xeb   :  { %763 = vmatprep.subr.bf16.mxu0 %v7275_v2 }
  0xee   :  { %764 = vmatpush1.bf16.msra.mxu0 %v7278_v5 }
  0xef   :  { %765 = vmatprep.subr.bf16.mxu0 %v7281_v7 }
  0xf2   :  { %766 = vmatpush2.bf16.msra.mxu0 %v7284_v8 }
  0xf3   :  { %767 = vmatprep.subr.bf16.mxu0 %v7287_v9 }
  0xf6   :  { %768 = vmatpush2.bf16.msra.mxu0 %v7290_v10 }
  0xf7   :  { %769 = vmatprep.subr.bf16.mxu0 %v7293_v11 }
  0xfa   :  { %770 = vmatpush2.bf16.msra.mxu0 %v7296_v12 }
  0xfb   :  { %771 = vmatprep.subr.bf16.mxu0 %v7299_v13 }
  0xfe   :  { %772 = vmatpush2.bf16.msra.mxu0 %v7302_v15 }
  0xff   :  { %773 = vmatprep.subr.bf16.mxu0 %v7305_v17  ;;  %v7358_v17 = vld [vmem:[#allocation2 + $0xa8] sm:$0xff]  }
 0x100   :  { %8862 = vst [vmem:[#allocation44_spill] sm:$0xff] %v7358_v17  ;;  %v1558_v15 = vunpack.c.l.bf16 %v7358_v17  ;;  %v7371_v17 = vld [vmem:[#allocation2 + $0xe8] sm:$0xff]  }
 0x101   :  { %8864 = vst [vmem:[#allocation46_spill] sm:$0xff] %v7371_v17 }
 0x102   :  { %774 = vmatpush2.bf16.msra.mxu0 %v7308_v19  ;;  %v7330_v19 = vld [vmem:[#allocation7 + $0x104] ss:$16 sps:$4 sm:$0xff]   ;;  %v1574_v53 = vcombine.high %v1558_v15, %v1558_v15 }
 0x103   :  { %775 = vmatprep.subr.bf16.mxu0 %v7311_v20  ;;  %8853 = vst [vmem:[#allocation35_spill] sm:$0xff] %v7330_v19  ;;  %v7332_v20 = vld [vmem:[#allocation7 + $0x10c] ss:$16 sps:$4 sm:$0xff]   ;;  %738 = vmatprep.subr.bf16.mxu1 %v7330_v19 }
 0x104   :  { %8854 = vst [vmem:[#allocation36_spill] sm:$0xff] %v7332_v20 }
 0x106   :  { %776 = vmatpush2.bf16.msra.mxu0 %v7314_v21  ;;  %v7334_v21 = vld [vmem:[#allocation7 + $0x100] ss:$16 sps:$4 sm:$0xff]  }
 0x107   :  { %777 = vmatprep.subr.bf16.mxu0 %v7320_v23  ;;  %8855 = vst [vmem:[#allocation37_spill] sm:$0xff] %v7334_v21  ;;  %739 = vmatpush2.bf16.msra.mxu1 %v7334_v21  ;;  %v7347_v23 = vld [vmem:[#allocation2 + $0x28] sm:$0xff]  }
 0x108   :  { %6048 = vmatprep.subr.msk.bf16.mxu1 %vm250_vm1, %v7101_v49  ;;  %8858 = vst [vmem:[#allocation40_spill] sm:$0xff] %v7347_v23  ;;  %v1554_v19 = vunpack.c.l.bf16 %v7347_v23  ;;  %v7354_v21 = vld [vmem:[#allocation2 + $0x68] sm:$0xff]  }
 0x109   :  { %8860 = vst [vmem:[#allocation42_spill] sm:$0xff] %v7354_v21  ;;  %v1556_v49 = vunpack.c.l.bf16 %v7354_v21 }
 0x10a   :  { %778 = vmatpush2.bf16.msra.mxu0 %v7324_v51  ;;  %v7345_v51 = vld [vmem:[#allocation2 + $0x8] sm:$0xff]   ;;  %v1590_v23 = vsel %vm101_vm0, %v1554_v19, 0.0 }
 0x10b   :  { %779 = vmatprep.subr.bf16.mxu0 %v7332_v20  ;;  %8857 = vst [vmem:[#allocation39_spill] sm:$0xff] %v7345_v51  ;;  %v1553_v22 = vunpack.c.l.bf16 %v7345_v51  ;;  %v1555_v20 = vunpack.c.l.bf16 %v7349_v25  ;;  %v1570_v51 = vcombine.high %v1554_v19, %v1554_v19  ;;  %v1572_v12 = vcombine.high %v1556_v49, %v1556_v49 }
 0x10c   :  { %v1600_v21 = vsel %vm101_vm0, %v1556_v49, 0.0  ;;  %v1560_v49 = vunpack.c.l.bf16 %v7371_v17 }
 0x10d   :  { %v1569_v60 = vcombine.high %v1553_v22, %v1553_v22  ;;  %v1585_v59 = vsel %vm101_vm0, %v1553_v22, 0.0  ;;  %v1571_v13 = vcombine.high %v1555_v20, %v1555_v20  ;;  %v1595_v25 = vsel %vm101_vm0, %v1555_v20, 0.0 }
 0x10e   :  { %780 = vmatpush2.bf16.msra.mxu0 %v7336_v63  ;;  %v7356_v63 = vld [vmem:[#allocation2 + $0x88] sm:$0xff]   ;;  %v1591_v55 = vsel %vm101_vm0, %v1570_v51, 0.0  ;;  %v1601_v19 = vsel %vm101_vm0, %v1572_v12, 0.0 }
 0x10f   :  { %1443 = vmatprep.subr.bf16.mxu0 %v7112_v56  ;;  %8861 = vst [vmem:[#allocation43_spill] sm:$0xff] %v7356_v63  ;;  %v1557_v56 = vunpack.c.l.bf16 %v7356_v63  ;;  %v1586_v58 = vsel %vm101_vm0, %v1569_v60, 0.0  ;;  %v7369_v63 = vld [vmem:[#allocation2 + $0xc8] sm:$0xff]   ;;  %v1592_v22 = vadd.f32 %v1591_v55, %v1590_v23  ;;  %v1596_v54 = vsel %vm101_vm0, %v1571_v13, 0.0 }
 0x110   :  { %8863 = vst [vmem:[#allocation45_spill] sm:$0xff] %v7369_v63  ;;  %v1587_v10 = vadd.f32 %v1586_v58, %v1585_v59  ;;  %v1597_v20 = vadd.f32 %v1596_v54, %v1595_v25  ;;  %v1602_v60 = vadd.f32 %v1601_v19, %v1600_v21  ;;  %v1559_v51 = vunpack.c.l.bf16 %v7369_v63 }
 0x111   :  { %v1573_v11 = vcombine.high %v1557_v56, %v1557_v56  ;;  %1593 = vadd.xlane.f32.xlu1 %v1592_v22  ;;  %v1605_v9 = vsel %vm101_vm0, %v1557_v56, 0.0  ;;  %v1610_v58 = vsel %vm101_vm0, %v1558_v15, 0.0  ;;  %v1611_v55 = vsel %vm101_vm0, %v1574_v53, 0.0  ;;  %v853_v53 = vpop.xlane.xlu0 %852  ;;  %v858_v56 = vpop.xlane.xlu1 %857 }
 0x112   :  { %1588 = vadd.xlane.f32.xlu0 %v1587_v10  ;;  %v1575_v59 = vcombine.high %v1559_v51, %v1559_v51  ;;  %v1576_v13 = vcombine.high %v1560_v49, %v1560_v49  ;;  %v1612_v12 = vadd.f32 %v1611_v55, %v1610_v58  ;;  %v1615_v54 = vsel %vm101_vm0, %v1559_v51, 0.0 }
 0x113   :  { %v1606_v8 = vsel %vm101_vm0, %v1573_v11, 0.0  ;;  %v1620_v23 = vsel %vm101_vm0, %v1560_v49, 0.0  ;;  %v889_v22 = vmul.f32 0.00390625, %v853_v53  ;;  %v890_v19 = vmul.f32 0.00390625, %v858_v56 }
 0x114   :  { %v1607_v10 = vadd.f32 %v1606_v8, %v1605_v9  ;;  %v1616_v21 = vsel %vm101_vm0, %v1575_v59, 0.0  ;;  %v1621_v25 = vsel %vm101_vm0, %v1576_v13, 0.0 }
 0x115   :  { %1603 = vadd.xlane.f32.xlu1 %v1602_v60  ;;  %v1617_v11 = vadd.f32 %v1616_v21, %v1615_v54  ;;  %v1622_v15 = vadd.f32 %v1621_v25, %v1620_v23  ;;  %v863_v8 = vpop.xlane.xlu0 %862  ;;  %v897_v60 = vpack.c.bf16 %v889_v22, %v889_v22  ;;  %v898_v51 = vpack.c.bf16 %v890_v19, %v890_v19 }
 0x116   :  { %1598 = vadd.xlane.f32.xlu0 %v1597_v20  ;;  %v891_v9 = vmul.f32 0.00390625, %v863_v8  ;;  %v868_v20 = vpop.xlane.xlu1 %867  ;;  %v7388_v22 = vsub.s32 0, %v7216_v6 }
 0x117   :  { %v892_v58 = vmul.f32 0.00390625, %v868_v20  ;;  %v926_v59 = vunpack.c.l.b16 %v897_v60  ;;  %v927_v13 = vunpack.c.l.b16 %v898_v51  ;;  %v160_v20 = vld [vmem:[%s8652_s2] sm:$0x3] }
 0x118   :  { %v899_v49 = vpack.c.bf16 %v891_v9, %v891_v9  ;;  %8865 = vst [vmem:[#allocation47_spill] sm:$0xff] %v7388_v22 }
 0x119   :  { %1613 = vadd.xlane.f32.xlu1 %v1612_v12  ;;  %v873_v55 = vpop.xlane.xlu0 %872  ;;  %v900_v54 = vpack.c.bf16 %v892_v58, %v892_v58  ;;  %v937_v23 = vrot.slane %v926_v59, %v7219_v14  ;;  %v941_v25 = vrot.slane %v927_v13, %v7219_v14  ;;  %v7396_v58 = vsub.s32 1, %v7216_v6 }
 0x11a   :  { %1608 = vadd.xlane.f32.xlu0 %v1607_v10  ;;  %v893_v10 = vmul.f32 0.00390625, %v873_v55  ;;  %v878_v12 = vpop.xlane.xlu1 %877  ;;  %v928_v21 = vunpack.c.l.b16 %v899_v49  ;;  %v165_v13 = vrot.slane %v160_v20, %v7388_v22 }
 0x11b   :  { %v929_v56 = vunpack.c.l.b16 %v900_v54  ;;  %v966_v60 = vsel %vm222_vm2, %v941_v25, %v937_v23  ;;  %8866 = vst [vmem:[#allocation48_spill] sm:$0xff] %v7396_v58 }
 0x11c   :  { %v901_v53 = vpack.c.bf16 %v893_v10, %v893_v10  ;;  %v945_v19 = vrot.slane %v928_v21, %v7219_v14  ;;  %v169_v21 = vrot.slane %v160_v20, %v7396_v58 }
 0x11d   :  { %1623 = vadd.xlane.f32.xlu1 %v1622_v15  ;;  %v883_v15 = vpop.xlane.xlu0 %882  ;;  %v949_v49 = vrot.slane %v929_v56, %v7219_v14 }
 0x11e   :  { %1618 = vadd.xlane.f32.xlu0 %v1617_v11  ;;  %v894_v11 = vmul.f32 0.00390625, %v878_v12  ;;  %v895_v8 = vmul.f32 0.00390625, %v883_v15  ;;  %v888_v9 = vpop.xlane.xlu1 %887  ;;  %v930_v55 = vunpack.c.l.b16 %v901_v53  ;;  %v967_v10 = vsel %vm224_vm3, %v945_v19, %v966_v60 }
 0x11f   :  { %v896_v59 = vmul.f32 0.00390625, %v888_v9  ;;  %v968_v23 = vsel %vm226_vm4, %v949_v49, %v967_v10 }
 0x120   :  { %v902_v51 = vpack.c.bf16 %v894_v11, %v894_v11  ;;  %v903_v12 = vpack.c.bf16 %v895_v8, %v895_v8  ;;  %v953_v15 = vrot.slane %v930_v55, %v7219_v14 }
 0x121   :  { %v904_v25 = vpack.c.bf16 %v896_v59, %v896_v59 }
 0x122   :  { %v931_v54 = vunpack.c.l.b16 %v902_v51  ;;  %v932_v6 = vunpack.c.l.b16 %v903_v12  ;;  %v969_v22 = vsel %vm228_vm5, %v953_v15, %v968_v23  ;;  %v8900_v12 = vld [vmem:[#allocation45_spill] sm:$0xff] }
 0x123   :  { %v933_v8 = vunpack.c.l.b16 %v904_v25 }
 0x124   :  { %v957_v56 = vrot.slane %v931_v54, %v7219_v14  ;;  %v961_v20 = vrot.slane %v932_v6, %v7219_v14  ;;  %v2295_v54 = vunpack.c.h.bf16 %v8900_v12 }
 0x126   :  { %v970_v55 = vsel %vm230_vm6, %v957_v56, %v969_v22 }
 0x127   :  { %v971_v59 = vsel %vm232_vm7, %v961_v20, %v970_v55 }
 0x191   :  { %v291_v17 = vpop.f32.mrf.mxu0 }
 0x192   :  { %v292_v11 = vadd.f32 %v291_v17, %v165_v13  ;;  %v965_v17 = vrot.slane %v933_v8, %v7219_v14  ;;  %v8867_v13 = vmov 0  }
 0x193   :  { %v293_v53 = vpop.f32.mrf.mxu0 }
 0x194   :  { %v294_v9 = vadd.f32 %v293_v53, %v169_v21  ;;  %v298_v63 = vmax.f32 %v292_v11, 0.0  ;;  %v972_v6 = vsel %vm234_vm8, %v965_v17, %v971_v59 }
 0x195   :  { %v295_v19 = vpop.f32.mrf.mxu0 }
 0x196   :  { %v299_v60 = vmax.f32 %v294_v9, 0.0  ;;  %v300_v49 = vpack.c.bf16 %v298_v63, %v298_v63  ;;  %v973_v63 = vpack.c.b16 %v972_v6, %v972_v6  ;;  %v8901_v9 = vld [vmem:[#allocation46_spill] sm:$0xff] }
 0x197   :  { %v296_v51 = vpop.f32.mrf.mxu0  ;;  %v2296_v19 = vunpack.c.h.bf16 %v8901_v9 }
 0x198   :  { %v301_v58 = vpack.c.bf16 %v299_v60, %v299_v60 }
 0x19a   :  { %740 = vmatprep.mubr.bf16.mxu1 %v301_v58  ;;  %781 = vmatprep.mubr.bf16.mxu0 %v301_v58  ;;  %v8899_v58 = vld [vmem:[#allocation44_spill] sm:$0xff] }
 0x19b   :  { %741 = vmatmul.mubr.bf16.vlgmr.msra.gmra.mxu1 %v300_v49  ;;  %782 = vmatmul.mubr.bf16.vlgmr.msra.gmra.mxu0 %v300_v49  ;;  %v2294_v10 = vunpack.c.h.bf16 %v8899_v58 }
 0x19c   :  { %1007 = vmatpush1.bf16.msra.mxu1 %v7106_v50  ;;  %1024 = vmatprep.mubr.bf16.mxu1 %v8867_v13  ;;  %v8868_v50 = vld [vmem:[#allocation20_spill] sm:$0xff] }
 0x19d   :  { %1444 = vmatpush1.bf16.msra.mxu0 %v7114_v57  ;;  %1484 = vmatprep.subr.bf16.mxu1 %v7116_v61  ;;  %v8869_v57 = vld [vmem:[#allocation21_spill] sm:$0xff]  ;;  %v8870_v61 = vld [vmem:[#allocation12_spill] sm:$0xff]  ;;  %v2310_v6 = vcombine.high %v2294_v10, %v2294_v10 }
 0x19e   :  { %1445 = vmatprep.subr.bf16.mxu0 %v7118_v62  ;;  %v8871_v62 = vld [vmem:[#allocation13_spill] sm:$0xff] }
 0x1a1   :  { %1446 = vmatpush1.bf16.msra.mxu0 %v7123_v1  ;;  %v8872_v1 = vld [vmem:[#allocation22_spill] sm:$0xff] }
 0x1a2   :  { %1447 = vmatprep.subr.bf16.mxu0 %v7135_v16  ;;  %v8873_v16 = vld [vmem:[#allocation23_spill] sm:$0xff] }
 0x1a3   :  { %6049 = vmatmul.mubr.msk.bf16.vlgmr.msra.gmra.mxu1 %vm246_vm9, %v973_v63 }
 0x1a4   :  { %1485 = vmatpush1.bf16.msra.mxu1 %v7236_v24  ;;  %v8890_v24 = vld [vmem:[#allocation37_spill] sm:$0xff] }
 0x1a5   :  { %1486 = vmatprep.subr.bf16.mxu1 %v7238_v26  ;;  %1448 = vmatpush1.bf16.msra.mxu0 %v7137_v18  ;;  %v8874_v18 = vld [vmem:[#allocation14_spill] sm:$0xff] }
 0x1a6   :  { %1449 = vmatprep.subr.bf16.mxu0 %v7145_v27  ;;  %v8875_v27 = vld [vmem:[#allocation15_spill] sm:$0xff]  ;;  %v8891_v26 = vld [vmem:[#allocation34_spill] sm:$0xff] }
 0x1a8   :  { %1487 = vmatpush1.bf16.msra.mxu1 %v7242_v29  ;;  %v8892_v29 = vld [vmem:[#allocation36_spill] sm:$0xff] }
 0x1a9   :  { %1488 = vmatprep.subr.bf16.mxu1 %v7245_v30  ;;  %1450 = vmatpush1.bf16.msra.mxu0 %v7147_v28  ;;  %v8876_v28 = vld [vmem:[#allocation24_spill] sm:$0xff]  ;;  %v8893_v30 = vld [vmem:[#allocation38_spill] sm:$0xff] }
 0x1aa   :  { %1451 = vmatprep.subr.bf16.mxu0 %v7155_v35  ;;  %v8877_v35 = vld [vmem:[#allocation25_spill] sm:$0xff] }
 0x1ac   :  { %1489 = vmatpush1.bf16.msra.mxu1 %v7248_v31  ;;  %v7477_v31 = vld.sshfl [vmem:[#allocation5] sm:$0x33 pattern:$0x76325410] }
 0x1ad   :  { %1490 = vmatprep.subr.bf16.mxu1 %v7251_v32  ;;  %1452 = vmatpush1.bf16.msra.mxu0 %v7157_v36  ;;  %v8878_v36 = vld [vmem:[#allocation16_spill] sm:$0xff]  ;;  %v7481_v32 = vcombine.high %v7477_v31, %v7477_v31 }
 0x1ae   :  { %1453 = vmatprep.subr.bf16.mxu0 %v7161_v39  ;;  %v8879_v39 = vld [vmem:[#allocation17_spill] sm:$0xff] }
 0x1b0   :  { %1491 = vmatpush1.bf16.msra.mxu1 %v7254_v33  ;;  %v8894_v33 = vld [vmem:[#allocation39_spill] sm:$0xff] }
 0x1b1   :  { %1492 = vmatprep.subr.bf16.mxu1 %v7257_v34  ;;  %1454 = vmatpush1.bf16.msra.mxu0 %v7163_v40  ;;  %v8880_v40 = vld [vmem:[#allocation26_spill] sm:$0xff]  ;;  %v2289_v34 = vunpack.c.h.bf16 %v8894_v33 }
 0x1b2   :  { %1455 = vmatprep.subr.bf16.mxu0 %v7167_v41  ;;  %v8881_v41 = vld [vmem:[#allocation27_spill] sm:$0xff] }
 0x1b3   :  { %v2305_v21 = vcombine.high %v2289_v34, %v2289_v34  ;;  %v2321_v15 = vsel %vm101_vm0, %v2289_v34, 0.0 }
 0x1b4   :  { %1493 = vmatpush1.bf16.msra.mxu1 %v7260_v37  ;;  %v8895_v37 = vld [vmem:[#allocation40_spill] sm:$0xff] }
 0x1b5   :  { %1494 = vmatprep.subr.bf16.mxu1 %v7263_v38  ;;  %1456 = vmatpush1.bf16.msra.mxu0 %v7169_v42  ;;  %v8882_v42 = vld [vmem:[#allocation18_spill] sm:$0xff]  ;;  %v2290_v38 = vunpack.c.h.bf16 %v8895_v37  ;;  %v2322_v8 = vsel %vm101_vm0, %v2305_v21, 0.0  ;;  %v8905_v21 = vld [vmem:[#allocation47_spill] sm:$0xff] }
 0x1b6   :  { %1457 = vmatprep.subr.bf16.mxu0 %v7173_v43  ;;  %v8883_v43 = vld [vmem:[#allocation31_spill] sm:$0xff]  ;;  %v2323_v55 = vadd.f32 %v2322_v8, %v2321_v15 }
 0x1b7   :  { %v2306_v23 = vcombine.high %v2290_v38, %v2290_v38  ;;  %v2326_v25 = vsel %vm101_vm0, %v2290_v38, 0.0  ;;  %v8902_v38 = vld [vmem:[#allocation19_spill] sm:$0xff] }
 0x1b8   :  { %1495 = vmatpush1.bf16.msra.mxu1 %v7266_v3  ;;  %v8896_v3 = vld [vmem:[#allocation41_spill] sm:$0xff]  ;;  %2324 = vadd.xlane.f32.xlu0 %v2323_v55 }
 0x1b9   :  { %1496 = vmatprep.subr.bf16.mxu1 %v7269_v4  ;;  %1458 = vmatpush1.bf16.msra.mxu0 %v7175_v44  ;;  %v8884_v44 = vld [vmem:[#allocation28_spill] sm:$0xff]  ;;  %v2291_v4 = vunpack.c.h.bf16 %v8896_v3  ;;  %v2327_v60 = vsel %vm101_vm0, %v2306_v23, 0.0  ;;  %v7513_v3 = vsub.s32 2, %v8902_v38 }
 0x1ba   :  { %1459 = vmatprep.subr.bf16.mxu0 %v7179_v45  ;;  %v8885_v45 = vld [vmem:[#allocation29_spill] sm:$0xff]  ;;  %v2328_v49 = vadd.f32 %v2327_v60, %v2326_v25  ;;  %v8906_v25 = vld [vmem:[#allocation48_spill] sm:$0xff] }
 0x1bb   :  { %v2307_v11 = vcombine.high %v2291_v4, %v2291_v4  ;;  %v2331_v53 = vsel %vm101_vm0, %v2291_v4, 0.0  ;;  %8903 = vst [vmem:[#allocation20_spill] sm:$0xff] %v7513_v3  ;;  %v7516_v4 = vsub.s32 3, %v8902_v38 }
 0x1bc   :  { %1497 = vmatpush1.bf16.msra.mxu1 %v7272_v0  ;;  %v8897_v0 = vld [vmem:[#allocation42_spill] sm:$0xff]  ;;  %2329 = vadd.xlane.f32.xlu1 %v2328_v49 }
 0x1bd   :  { %1498 = vmatprep.subr.bf16.mxu1 %v7275_v2  ;;  %1460 = vmatpush2.bf16.msra.mxu0 %v7181_v46  ;;  %v8886_v46 = vld [vmem:[#allocation33_spill] sm:$0xff]  ;;  %v2292_v2 = vunpack.c.h.bf16 %v8897_v0  ;;  %v2332_v17 = vsel %vm101_vm0, %v2307_v11, 0.0  ;;  %8904 = vst [vmem:[#allocation21_spill] sm:$0xff] %v7516_v4 }
 0x1be   :  { %1461 = vmatprep.subr.bf16.mxu0 %v7185_v47  ;;  %v8887_v47 = vld [vmem:[#allocation35_spill] sm:$0xff]  ;;  %v2333_v63 = vadd.f32 %v2332_v17, %v2331_v53 }
 0x1bf   :  { %v2308_v56 = vcombine.high %v2292_v2, %v2292_v2  ;;  %v2336_v20 = vsel %vm101_vm0, %v2292_v2, 0.0 }
 0x1c0   :  { %1499 = vmatpush1.bf16.msra.mxu1 %v7278_v5  ;;  %v7489_v5 = vld [vmem:[#allocation7 + $0xe4] ss:$16 sps:$4 sm:$0xff]   ;;  %2334 = vadd.xlane.f32.xlu0 %v2333_v63  ;;  %v906_v63 = vld [vmem:[%s8652_s2] sm:$0x3] }
 0x1c1   :  { %1500 = vmatprep.subr.bf16.mxu1 %v7281_v7  ;;  %1462 = vmatpush2.bf16.msra.mxu0 %v7187_v48  ;;  %v8888_v48 = vld [vmem:[#allocation30_spill] sm:$0xff]  ;;  %v8898_v7 = vld [vmem:[#allocation43_spill] sm:$0xff]  ;;  %v2337_v59 = vsel %vm101_vm0, %v2308_v56, 0.0 }
 0x1c2   :  { %1463 = vmatprep.subr.bf16.mxu0 %v7191_v52  ;;  %v8889_v52 = vld [vmem:[#allocation32_spill] sm:$0xff]  ;;  %v2293_v22 = vunpack.c.h.bf16 %v8898_v7  ;;  %v366_v7 = vld [vmem:[%s8654_s4] sm:$0xf] }
 0x1c3   :  { %v371_v15 = vrot.slane %v366_v7, %v8905_v21  ;;  %v379_v23 = vrot.slane %v366_v7, %v7513_v3  ;;  %v375_v11 = vrot.slane %v366_v7, %v8906_v25  ;;  %v383_v53 = vrot.slane %v366_v7, %v7516_v4 }
 0x1c4   :  { %1501 = vmatpush2.bf16.msra.mxu1 %v8868_v50  ;;  %v2309_v51 = vcombine.high %v2293_v22, %v2293_v22  ;;  %v2338_v50 = vadd.f32 %v2337_v59, %v2336_v20 }
 0x1c5   :  { %1502 = vmatprep.subr.bf16.mxu1 %v8869_v57  ;;  %1464 = vmatpush2.bf16.msra.mxu0 %v8870_v61  ;;  %v2341_v57 = vsel %vm101_vm0, %v2293_v22, 0.0 }
 0x1c6   :  { %1465 = vmatprep.subr.bf16.mxu0 %v8871_v62  ;;  %v2342_v61 = vsel %vm101_vm0, %v2309_v51, 0.0  ;;  %v2346_v62 = vsel %vm101_vm0, %v2294_v10, 0.0  ;;  %2339 = vadd.xlane.f32.xlu1 %v2338_v50 }
 0x1c8   :  { %1503 = vmatpush2.bf16.msra.mxu1 %v8872_v1  ;;  %v2347_v1 = vsel %vm101_vm0, %v2310_v6, 0.0 }
 0x1c9   :  { %1504 = vmatprep.subr.bf16.mxu1 %v8873_v16  ;;  %1466 = vmatpush2.bf16.msra.mxu0 %v8874_v18  ;;  %v2311_v16 = vcombine.high %v2295_v54, %v2295_v54  ;;  %v2312_v18 = vcombine.high %v2296_v19, %v2296_v19 }
 0x1ca   :  { %1467 = vmatprep.subr.bf16.mxu0 %v8875_v27  ;;  %v2343_v27 = vadd.f32 %v2342_v61, %v2341_v57 }
 0x1cc   :  { %1505 = vmatpush2.bf16.msra.mxu1 %v8876_v28  ;;  %v2348_v28 = vadd.f32 %v2347_v1, %v2346_v62  ;;  %2344 = vadd.xlane.f32.xlu0 %v2343_v27 }
 0x1cd   :  { %1506 = vmatprep.subr.bf16.mxu1 %v8877_v35  ;;  %1468 = vmatpush2.bf16.msra.mxu0 %v8878_v36  ;;  %v2351_v35 = vsel %vm101_vm0, %v2295_v54, 0.0  ;;  %v2352_v36 = vsel %vm101_vm0, %v2311_v16, 0.0 }
 0x1ce   :  { %1469 = vmatprep.subr.bf16.mxu0 %v8879_v39  ;;  %v2356_v39 = vsel %vm101_vm0, %v2296_v19, 0.0  ;;  %2349 = vadd.xlane.f32.xlu1 %v2348_v28 }
 0x1d0   :  { %1507 = vmatpush2.bf16.msra.mxu1 %v8880_v40  ;;  %v2357_v40 = vsel %vm101_vm0, %v2312_v18, 0.0 }
 0x1d1   :  { %1508 = vmatprep.subr.bf16.mxu1 %v8881_v41  ;;  %1470 = vmatpush2.bf16.msra.mxu0 %v8882_v42  ;;  %v2353_v41 = vadd.f32 %v2352_v36, %v2351_v35  ;;  %v2358_v42 = vadd.f32 %v2357_v40, %v2356_v39  ;;  %v911_v39 = vrot.slane %v906_v63, %v8905_v21 }
 0x1d2   :  { %1471 = vmatprep.subr.bf16.mxu0 %v8883_v43  ;;  %v1589_v43 = vpop.xlane.xlu0 %1588 }
 0x1d3   :  { %2354 = vadd.xlane.f32.xlu0 %v2353_v41  ;;  %2359 = vadd.xlane.f32.xlu1 %v2358_v42 }
 0x1d4   :  { %1509 = vmatpush2.bf16.msra.mxu1 %v8884_v44  ;;  %v1594_v44 = vpop.xlane.xlu1 %1593 }
 0x1d5   :  { %1510 = vmatprep.subr.bf16.mxu1 %v8885_v45  ;;  %1472 = vmatpush2.bf16.msra.mxu0 %v8886_v46  ;;  %v1625_v45 = vmul.f32 0.00390625, %v1589_v43  ;;  %v1626_v46 = vmul.f32 0.00390625, %v1594_v44 }
 0x1d6   :  { %1473 = vmatprep.subr.bf16.mxu0 %v8887_v47  ;;  %v1599_v47 = vpop.xlane.xlu0 %1598 }
 0x1d8   :  { %1511 = vmatpush2.bf16.msra.mxu1 %v8888_v48  ;;  %v1604_v48 = vpop.xlane.xlu1 %1603 }
 0x1d9   :  { %1512 = vmatprep.subr.bf16.mxu1 %v8889_v52  ;;  %1474 = vmatpush2.bf16.msra.mxu0 %v8890_v24  ;;  %v1633_v52 = vpack.c.bf16 %v1625_v45, %v1625_v45  ;;  %v1634_v24 = vpack.c.bf16 %v1626_v46, %v1626_v46  ;;  %v915_v45 = vrot.slane %v906_v63, %v8906_v25  ;;  %v7588_v63 = vld [vmem:[#allocation7 + $0xa8] ss:$16 sps:$4 sm:$0xff]  }
 0x1da   :  { %6117 = vmatprep.subr.msk.bf16.mxu0 %vm250_vm1, %v7481_v32 }
 0x1db   :  { %v1662_v33 = vunpack.c.l.b16 %v1633_v52  ;;  %v1663_v34 = vunpack.c.l.b16 %v1634_v24 }
 0x1dc   :  { %1513 = vmatpush2.bf16.msra.mxu1 %v8891_v26  ;;  %v1627_v26 = vmul.f32 0.00390625, %v1599_v47  ;;  %v1614_v0 = vpop.xlane.xlu1 %1613 }
 0x1dd   :  { %1514 = vmatprep.subr.bf16.mxu1 %v8892_v29  ;;  %v1628_v29 = vmul.f32 0.00390625, %v1604_v48  ;;  %v1673_v58 = vrot.slane %v1662_v33, %v7219_v14  ;;  %v1677_v10 = vrot.slane %v1663_v34, %v7219_v14  ;;  %v1630_v54 = vmul.f32 0.00390625, %v1614_v0 }
 0x1de   :  { %v1635_v37 = vpack.c.bf16 %v1627_v26, %v1627_v26 }
 0x1df   :  { %v1636_v2 = vpack.c.bf16 %v1628_v29, %v1628_v29  ;;  %v1702_v51 = vsel %vm222_vm2, %v1677_v10, %v1673_v58  ;;  %v1638_v59 = vpack.c.bf16 %v1630_v54, %v1630_v54  ;;  %v7544_v54 = vsel %vm250_vm1, %v7477_v31, 0  ;;  %v7558_v31 = vld [vmem:[#allocation7 + $0xc0] ss:$16 sps:$4 sm:$0xff]  }
 0x1e0   :  { %1515 = vmatpush2.bf16.msra.mxu1 %v8893_v30  ;;  %v1609_v30 = vpop.xlane.xlu0 %1608  ;;  %v1664_v12 = vunpack.c.l.b16 %v1635_v37  ;;  %v1624_v20 = vpop.xlane.xlu1 %1623 }
 0x1e1   :  { %2179 = vmatprep.subr.bf16.mxu1 %v7489_v5  ;;  %v1629_v22 = vmul.f32 0.00390625, %v1609_v30  ;;  %v1665_v9 = vunpack.c.l.b16 %v1636_v2  ;;  %v1632_v36 = vmul.f32 0.00390625, %v1624_v20  ;;  %v1667_v44 = vunpack.c.l.b16 %v1638_v59  ;;  %v7567_v20 = vld [vmem:[#allocation7 + $0xcc] ss:$16 sps:$4 sm:$0xff]   ;;  %v7582_v59 = vld [vmem:[#allocation7 + $0x80] ss:$16 sps:$4 sm:$0xff]  }
 0x1e2   :  { %v1681_v55 = vrot.slane %v1664_v12, %v7219_v14 }
 0x1e3   :  { %v1637_v60 = vpack.c.bf16 %v1629_v22, %v1629_v22  ;;  %v1685_v1 = vrot.slane %v1665_v9, %v7219_v14  ;;  %v1640_v52 = vpack.c.bf16 %v1632_v36, %v1632_v36  ;;  %v1693_v30 = vrot.slane %v1667_v44, %v7219_v14  ;;  %v7621_v36 = vld [vmem:[#allocation7 + $0x4] ss:$16 sps:$4 sm:$0xff]   ;;  %v7640_v44 = vld [vmem:[#allocation7 + $0xc] ss:$16 sps:$4 sm:$0xff]  }
 0x1e4   :  { %v1619_v56 = vpop.xlane.xlu0 %1618  ;;  %v1703_v40 = vsel %vm224_vm3, %v1681_v55, %v1702_v51  ;;  %v7569_v51 = vld [vmem:[#allocation7 + $0xa0] ss:$16 sps:$4 sm:$0xff]   ;;  %v7572_v55 = vld [vmem:[#allocation7 + $0x84] ss:$16 sps:$4 sm:$0xff]   ;;  %8910 = vst [vmem:[#allocation23_spill] sm:$0xff] %v7640_v44 }
 0x1e5   :  { %v1631_v6 = vmul.f32 0.00390625, %v1619_v56  ;;  %v1666_v16 = vunpack.c.l.b16 %v1637_v60  ;;  %v1704_v48 = vsel %vm226_vm4, %v1685_v1, %v1703_v40  ;;  %v1669_v0 = vunpack.c.l.b16 %v1640_v52  ;;  %v7604_v1 = vld [vmem:[#allocation7 + $0x6c] ss:$16 sps:$4 sm:$0xff]   ;;  %v7654_v52 = vld [vmem:[#allocation7 + $0x1c0] ss:$16 sps:$4 sm:$0xff]  }
 0x1e6   :  { %v7628_v40 = vld [vmem:[#allocation7 + $0x2c] ss:$16 sps:$4 sm:$0xff]   ;;  %8915 = vst [vmem:[#allocation16_spill] sm:$0xff] %v7654_v52 }
 0x1e7   :  { %v1639_v43 = vpack.c.bf16 %v1631_v6, %v1631_v6  ;;  %v1689_v46 = vrot.slane %v1666_v16, %v7219_v14  ;;  %v7585_v6 = vld [vmem:[#allocation7 + $0x64] ss:$16 sps:$4 sm:$0xff]   ;;  %v7606_v16 = vld [vmem:[#allocation7 + $0x40] ss:$16 sps:$4 sm:$0xff]  }
 0x1e9   :  { %v1668_v26 = vunpack.c.l.b16 %v1639_v43  ;;  %v1705_v34 = vsel %vm228_vm5, %v1689_v46, %v1704_v48  ;;  %v7636_v43 = vld [vmem:[#allocation7 + $0x28] ss:$16 sps:$4 sm:$0xff]   ;;  %v7645_v46 = vld [vmem:[#allocation7 + $0x1c4] ss:$16 sps:$4 sm:$0xff]   ;;  %v7652_v48 = vld [vmem:[#allocation7 + $0x1ec] ss:$16 sps:$4 sm:$0xff]  }
 0x1ea   :  { %v1706_v58 = vsel %vm230_vm6, %v1693_v30, %v1705_v34  ;;  %8909 = vst [vmem:[#allocation22_spill] sm:$0xff] %v7636_v43  ;;  %8912 = vst [vmem:[#allocation15_spill] sm:$0xff] %v7645_v46  ;;  %v7666_v30 = vld [vmem:[#allocation7 + $0x1a0] ss:$16 sps:$4 sm:$0xff]   ;;  %v7672_v34 = vld [vmem:[#allocation7 + $0x1c8] ss:$16 sps:$4 sm:$0xff]  }
 0x1eb   :  { %v1697_v7 = vrot.slane %v1668_v26, %v7219_v14  ;;  %8914 = vst [vmem:[#allocation25_spill] sm:$0xff] %v7652_v48  ;;  %v7660_v26 = vld [vmem:[#allocation7 + $0x1e8] ss:$16 sps:$4 sm:$0xff]   ;;  %8919 = vst [vmem:[#allocation18_spill] sm:$0xff] %v7666_v30 }
 0x1ec   :  { %8917 = vst [vmem:[#allocation26_spill] sm:$0xff] %v7660_v26  ;;  %8921 = vst [vmem:[#allocation28_spill] sm:$0xff] %v7672_v34 }
 0x1ed   :  { %v1707_v56 = vsel %vm232_vm7, %v1697_v7, %v1706_v58  ;;  %v7689_v7 = vld [vmem:[#allocation7 + $0x188] ss:$16 sps:$4 sm:$0xff]   ;;  %v7695_v58 = vld [vmem:[#allocation7 + $0x16c] ss:$16 sps:$4 sm:$0xff]  }
 0x1ee   :  { %8926 = vst [vmem:[#allocation32_spill] sm:$0xff] %v7689_v7  ;;  %8928 = vst [vmem:[#allocation34_spill] sm:$0xff] %v7695_v58 }
 0x25b   :  { %v742_v19 = vpop.f32.mrf.mxu1  ;;  %v783_v8 = vpop.f32.mrf.mxu0 }
 0x25c   :  { %v743_v50 = vadd.f32 %v742_v19, %v371_v15  ;;  %v784_v57 = vadd.f32 %v783_v8, %v379_v23  ;;  %v7546_v15 = vld [vmem:[#allocation7 + $0xe0] ss:$16 sps:$4 sm:$0xff]   ;;  %v7548_v23 = vld [vmem:[#allocation7 + $0xec] ss:$16 sps:$4 sm:$0xff]   ;;  %v7562_v19 = vld [vmem:[#allocation7 + $0xa4] ss:$16 sps:$4 sm:$0xff]  }
 0x25d   :  { %v744_v49 = vpop.f32.mrf.mxu1  ;;  %v785_v17 = vpop.f32.mrf.mxu0  ;;  %v7564_v8 = vld [vmem:[#allocation7 + $0xe8] ss:$16 sps:$4 sm:$0xff]  }
 0x25e   :  { %v745_v61 = vadd.f32 %v744_v49, %v375_v11  ;;  %v786_v62 = vadd.f32 %v785_v17, %v383_v53  ;;  %v1701_v11 = vrot.slane %v1669_v0, %v7219_v14  ;;  %v7551_v53 = vld [vmem:[#allocation7 + $0xc4] ss:$16 sps:$4 sm:$0xff]   ;;  %v7576_v49 = vld [vmem:[#allocation7 + $0xc8] ss:$16 sps:$4 sm:$0xff]   ;;  %v7580_v17 = vld [vmem:[#allocation7 + $0xac] ss:$16 sps:$4 sm:$0xff]  }
 0x25f   :  { %v746_v18 = vpop.f32.mrf.mxu1  ;;  %v787_v27 = vpop.f32.mrf.mxu0  ;;  %v7682_v0 = vld [vmem:[#allocation7 + $0x1a8] ss:$16 sps:$4 sm:$0xff]  }
 0x260   :  { %v6530_v28 = vpack.c.bf16 %v745_v61, %v743_v50  ;;  %v6531_v35 = vpack.c.bf16 %v786_v62, %v784_v57  ;;  %v1708_v9 = vsel %vm234_vm8, %v1701_v11, %v1707_v56  ;;  %v7592_v50 = vld [vmem:[#allocation7 + $0x8c] ss:$16 sps:$4 sm:$0xff]   ;;  %v7594_v57 = vld [vmem:[#allocation7 + $0x60] ss:$16 sps:$4 sm:$0xff]   ;;  %v7597_v61 = vld [vmem:[#allocation7 + $0x44] ss:$16 sps:$4 sm:$0xff]  }
 0x261   :  { %v747_v41 = vpop.f32.mrf.mxu1  ;;  %v788_v42 = vpop.f32.mrf.mxu0  ;;  %v1709_v60 = vpack.c.b16 %v1708_v9, %v1708_v9  ;;  %v7600_v62 = vld [vmem:[#allocation7 + $0x88] ss:$16 sps:$4 sm:$0xff]   ;;  %v7609_v18 = vld [vmem:[#allocation7 + $0x24] ss:$16 sps:$4 sm:$0xff]   ;;  %8924 = vst [vmem:[#allocation35_spill] sm:$0xff] %v7682_v0 }
 0x262   :  { %806 = vst [vmem:[#allocation8] sm:$0xff] %v6530_v28  ;;  %807 = vst [vmem:[#allocation8 + $0x8] sm:$0xff] %v6531_v35  ;;  %v7612_v27 = vld [vmem:[#allocation7 + $0x68] ss:$16 sps:$4 sm:$0xff]   ;;  %v7616_v28 = vld [vmem:[#allocation7 + $0x4c] ss:$16 sps:$4 sm:$0xff]  }
 0x263   :  { %v1026_v47 = vpop.f32.mrf.mxu1  ;;  %v7618_v35 = vld [vmem:[#allocation7 + $0x20] ss:$16 sps:$4 sm:$0xff]   ;;  %v7633_v42 = vld [vmem:[#allocation7 + $0x1e4] ss:$16 sps:$4 sm:$0xff]   ;;  %v7707_v56 = vld [vmem:[#allocation7 + $0x14c] ss:$16 sps:$4 sm:$0xff]  }
 0x264   :  { %v1027_v24 = vadd.f32 %v1026_v47, %v911_v39  ;;  %v7624_v39 = vld [vmem:[#allocation7 + $0x48] ss:$16 sps:$4 sm:$0xff]   ;;  %v7630_v41 = vld [vmem:[#allocation7] ss:$16 sps:$4 sm:$0xff]   ;;  %8908 = vst [vmem:[#allocation13_spill] sm:$0xff] %v7633_v42  ;;  %8932 = vst [vmem:[#allocation40_spill] sm:$0xff] %v7707_v56 }
 0x265   :  { %v1028_v29 = vpop.f32.mrf.mxu1  ;;  %8907 = vst [vmem:[#allocation12_spill] sm:$0xff] %v7630_v41  ;;  %v7648_v47 = vld [vmem:[#allocation7 + $0x8] ss:$16 sps:$4 sm:$0xff]   ;;  %v7705_v11 = vld [vmem:[#allocation7 + $0x144] ss:$16 sps:$4 sm:$0xff]  }
 0x266   :  { %v1029_v33 = vadd.f32 %v1028_v29, %v915_v45  ;;  %v1033_v37 = vmax.f32 %v1027_v24, 0.0  ;;  %v7642_v45 = vld [vmem:[#allocation7 + $0x1e0] ss:$16 sps:$4 sm:$0xff]   ;;  %8913 = vst [vmem:[#allocation24_spill] sm:$0xff] %v7648_v47  ;;  %v7657_v24 = vld [vmem:[#allocation7 + $0x1a4] ss:$16 sps:$4 sm:$0xff]  }
 0x267   :  { %v1030_v38 = vpop.f32.mrf.mxu1  ;;  %8911 = vst [vmem:[#allocation14_spill] sm:$0xff] %v7642_v45  ;;  %8916 = vst [vmem:[#allocation17_spill] sm:$0xff] %v7657_v24  ;;  %v7664_v29 = vld [vmem:[#allocation7 + $0x1cc] ss:$16 sps:$4 sm:$0xff]   ;;  %v7709_v9 = vld [vmem:[#allocation7 + $0x140] ss:$16 sps:$4 sm:$0xff]  }
 0x268   :  { %v1034_v2 = vmax.f32 %v1029_v33, 0.0  ;;  %v1035_v12 = vpack.c.bf16 %v1033_v37, %v1033_v37  ;;  %8918 = vst [vmem:[#allocation27_spill] sm:$0xff] %v7664_v29  ;;  %v7669_v33 = vld [vmem:[#allocation7 + $0x184] ss:$16 sps:$4 sm:$0xff]   ;;  %v7676_v37 = vld [vmem:[#allocation7 + $0x1ac] ss:$16 sps:$4 sm:$0xff]  }
 0x269   :  { %v1031_v22 = vpop.f32.mrf.mxu1  ;;  %8920 = vst [vmem:[#allocation31_spill] sm:$0xff] %v7669_v33  ;;  %8922 = vst [vmem:[#allocation29_spill] sm:$0xff] %v7676_v37  ;;  %v7678_v38 = vld [vmem:[#allocation7 + $0x180] ss:$16 sps:$4 sm:$0xff]  }
 0x26a   :  { %v1036_v10 = vpack.c.bf16 %v1034_v2, %v1034_v2  ;;  %8923 = vst [vmem:[#allocation33_spill] sm:$0xff] %v7678_v38  ;;  %v7686_v2 = vld [vmem:[#allocation7 + $0x18c] ss:$16 sps:$4 sm:$0xff]   ;;  %v7693_v22 = vld [vmem:[#allocation7 + $0x164] ss:$16 sps:$4 sm:$0xff]   ;;  %8931 = vst [vmem:[#allocation39_spill] sm:$0xff] %v7705_v11 }
 0x26b   :  { %8925 = vst [vmem:[#allocation30_spill] sm:$0xff] %v7686_v2  ;;  %8927 = vst [vmem:[#allocation37_spill] sm:$0xff] %v7693_v22 }
 0x26c   :  { %1475 = vmatprep.mubr.bf16.mxu0 %v1036_v10  ;;  %1516 = vmatprep.mubr.bf16.mxu1 %v1036_v10  ;;  %v7697_v10 = vld [vmem:[#allocation7 + $0x160] ss:$16 sps:$4 sm:$0xff]   ;;  %8933 = vst [vmem:[#allocation41_spill] sm:$0xff] %v7709_v9 }
 0x26d   :  { %1476 = vmatmul.mubr.bf16.vlgmr.msra.gmra.mxu0 %v1035_v12  ;;  %1517 = vmatmul.mubr.bf16.vlgmr.msra.gmra.mxu1 %v1035_v12  ;;  %8929 = vst [vmem:[#allocation36_spill] sm:$0xff] %v7697_v10  ;;  %v7699_v12 = vld [vmem:[#allocation7 + $0x168] ss:$16 sps:$4 sm:$0xff]  }
 0x26e   :  { %1743 = vmatpush1.bf16.msra.mxu0 %v7544_v54  ;;  %1760 = vmatprep.mubr.bf16.mxu0 %v8867_v13  ;;  %8930 = vst [vmem:[#allocation38_spill] sm:$0xff] %v7699_v12 }
 0x26f   :  { %2180 = vmatpush1.bf16.msra.mxu1 %v7546_v15  ;;  %2220 = vmatprep.subr.bf16.mxu0 %v7548_v23 }
 0x270   :  { %2181 = vmatprep.subr.bf16.mxu1 %v7551_v53 }
 0x273   :  { %2182 = vmatpush1.bf16.msra.mxu1 %v7558_v31 }
 0x274   :  { %2183 = vmatprep.subr.bf16.mxu1 %v7562_v19 }
 0x275   :  { %6118 = vmatmul.mubr.msk.bf16.vlgmr.msra.gmra.mxu0 %vm246_vm9, %v1709_v60  ;;  %v7711_v60 = vld [vmem:[#allocation7 + $0x148] ss:$16 sps:$4 sm:$0xff]  }
 0x276   :  { %2221 = vmatpush1.bf16.msra.mxu0 %v7564_v8  ;;  %8934 = vst [vmem:[#allocation42_spill] sm:$0xff] %v7711_v60 }
 0x277   :  { %2222 = vmatprep.subr.bf16.mxu0 %v7567_v20  ;;  %2184 = vmatpush1.bf16.msra.mxu1 %v7569_v51 }
 0x278   :  { %2185 = vmatprep.subr.bf16.mxu1 %v7572_v55 }
 0x27a   :  { %2223 = vmatpush1.bf16.msra.mxu0 %v7576_v49 }
 0x27b   :  { %2224 = vmatprep.subr.bf16.mxu0 %v7580_v17  ;;  %2186 = vmatpush1.bf16.msra.mxu1 %v7582_v59 }
 0x27c   :  { %2187 = vmatprep.subr.bf16.mxu1 %v7585_v6 }
 0x27e   :  { %2225 = vmatpush1.bf16.msra.mxu0 %v7588_v63 }
 0x27f   :  { %2226 = vmatprep.subr.bf16.mxu0 %v7592_v50  ;;  %2188 = vmatpush1.bf16.msra.mxu1 %v7594_v57 }
 0x280   :  { %2189 = vmatprep.subr.bf16.mxu1 %v7597_v61 }
 0x282   :  { %2227 = vmatpush1.bf16.msra.mxu0 %v7600_v62 }
 0x283   :  { %2228 = vmatprep.subr.bf16.mxu0 %v7604_v1  ;;  %2190 = vmatpush1.bf16.msra.mxu1 %v7606_v16 }
 0x284   :  { %2191 = vmatprep.subr.bf16.mxu1 %v7609_v18 }
 0x286   :  { %2229 = vmatpush1.bf16.msra.mxu0 %v7612_v27 }
 0x287   :  { %2230 = vmatprep.subr.bf16.mxu0 %v7616_v28  ;;  %2192 = vmatpush1.bf16.msra.mxu1 %v7618_v35 }
 0x288   :  { %2193 = vmatprep.subr.bf16.mxu1 %v7621_v36 }
 0x28a   :  { %2231 = vmatpush1.bf16.msra.mxu0 %v7624_v39 }
 0x28b   :  { %2232 = vmatprep.subr.bf16.mxu0 %v7628_v40  ;;  %2194 = vmatpush1.bf16.msra.mxu1 %v7630_v41 }
 0x28c   :  { %2195 = vmatprep.subr.bf16.mxu1 %v7633_v42 }
 0x28e   :  { %2233 = vmatpush1.bf16.msra.mxu0 %v7636_v43 }
 0x28f   :  { %2234 = vmatprep.subr.bf16.mxu0 %v7640_v44  ;;  %2196 = vmatpush2.bf16.msra.mxu1 %v7642_v45 }
 0x290   :  { %2197 = vmatprep.subr.bf16.mxu1 %v7645_v46 }
 0x292   :  { %2235 = vmatpush1.bf16.msra.mxu0 %v7648_v47 }
 0x293   :  { %2236 = vmatprep.subr.bf16.mxu0 %v7652_v48  ;;  %2198 = vmatpush2.bf16.msra.mxu1 %v7654_v52 }
 0x294   :  { %2199 = vmatprep.subr.bf16.mxu1 %v7657_v24 }
 0x296   :  { %2237 = vmatpush2.bf16.msra.mxu0 %v7660_v26 }
 0x297   :  { %2238 = vmatprep.subr.bf16.mxu0 %v7664_v29  ;;  %2200 = vmatpush2.bf16.msra.mxu1 %v7666_v30 }
 0x298   :  { %2201 = vmatprep.subr.bf16.mxu1 %v7669_v33 }
 0x29a   :  { %2239 = vmatpush2.bf16.msra.mxu0 %v7672_v34 }
 0x29b   :  { %2240 = vmatprep.subr.bf16.mxu0 %v7676_v37  ;;  %2202 = vmatpush2.bf16.msra.mxu1 %v7678_v38 }
 0x29c   :  { %2203 = vmatprep.subr.bf16.mxu1 %v7693_v22 }
 0x29e   :  { %2241 = vmatpush2.bf16.msra.mxu0 %v7682_v0 }
 0x29f   :  { %2242 = vmatprep.subr.bf16.mxu0 %v7686_v2  ;;  %2204 = vmatpush2.bf16.msra.mxu1 %v7697_v10  ;;  %v7723_v10 = vld [vmem:[#allocation7 + $0x128] ss:$16 sps:$4 sm:$0xff]   ;;  %v7757_v2 = vld [vmem:[#allocation2 + $0xb0] sm:$0xff]  }
 0x2a0   :  { %2205 = vmatprep.subr.bf16.mxu1 %v7705_v11  ;;  %8938 = vst [vmem:[#allocation46_spill] sm:$0xff] %v7723_v10  ;;  %v7735_v11 = vld [vmem:[#allocation7 + $0x108] ss:$16 sps:$4 sm:$0xff]   ;;  %8948 = vst [vmem:[#allocation55_spill] sm:$0xff] %v7757_v2  ;;  %v3030_v0 = vunpack.c.l.bf16 %v7757_v2  ;;  %v7770_v2 = vld [vmem:[#allocation2 + $0xf0] sm:$0xff]  }
 0x2a1   :  { %8942 = vst [vmem:[#allocation49_spill] sm:$0xff] %v7735_v11  ;;  %8950 = vst [vmem:[#allocation57_spill] sm:$0xff] %v7770_v2 }
 0x2a2   :  { %2243 = vmatpush2.bf16.msra.mxu0 %v7689_v7  ;;  %v7719_v7 = vld [vmem:[#allocation7 + $0x12c] ss:$16 sps:$4 sm:$0xff]   ;;  %v3046_v52 = vcombine.high %v3030_v0, %v3030_v0 }
 0x2a3   :  { %2244 = vmatprep.subr.bf16.mxu0 %v7695_v58  ;;  %2206 = vmatpush2.bf16.msra.mxu1 %v7709_v9  ;;  %v7717_v58 = vld [vmem:[#allocation7 + $0x124] ss:$16 sps:$4 sm:$0xff]   ;;  %8936 = vst [vmem:[#allocation44_spill] sm:$0xff] %v7719_v7  ;;  %v7731_v9 = vld [vmem:[#allocation7 + $0x10c] ss:$16 sps:$4 sm:$0xff]  }
 0x2a4   :  { %8935 = vst [vmem:[#allocation43_spill] sm:$0xff] %v7717_v58  ;;  %2207 = vmatprep.subr.bf16.mxu1 %v7717_v58  ;;  %8940 = vst [vmem:[#allocation47_spill] sm:$0xff] %v7731_v9 }
 0x2a6   :  { %2245 = vmatpush2.bf16.msra.mxu0 %v7699_v12  ;;  %v7721_v12 = vld [vmem:[#allocation7 + $0x120] ss:$16 sps:$4 sm:$0xff]  }
 0x2a7   :  { %2246 = vmatprep.subr.bf16.mxu0 %v7707_v56  ;;  %8937 = vst [vmem:[#allocation45_spill] sm:$0xff] %v7721_v12  ;;  %2208 = vmatpush2.bf16.msra.mxu1 %v7721_v12  ;;  %v7729_v56 = vld [vmem:[#allocation7 + $0x104] ss:$16 sps:$4 sm:$0xff]   ;;  %v7748_v12 = vld [vmem:[#allocation2 + $0x50] sm:$0xff]  }
 0x2a8   :  { %8939 = vst [vmem:[#allocation19_spill] sm:$0xff] %v7729_v56  ;;  %2209 = vmatprep.subr.bf16.mxu1 %v7729_v56  ;;  %8945 = vst [vmem:[#allocation52_spill] sm:$0xff] %v7748_v12 }
 0x2aa   :  { %2247 = vmatpush2.bf16.msra.mxu0 %v7711_v60  ;;  %v7733_v60 = vld [vmem:[#allocation7 + $0x100] ss:$16 sps:$4 sm:$0xff]  }
 0x2ab   :  { %2248 = vmatprep.subr.bf16.mxu0 %v7719_v7  ;;  %8941 = vst [vmem:[#allocation48_spill] sm:$0xff] %v7733_v60  ;;  %2210 = vmatpush2.bf16.msra.mxu1 %v7733_v60  ;;  %v7746_v7 = vld [vmem:[#allocation2 + $0x30] sm:$0xff]  }
 0x2ac   :  { %6186 = vmatprep.subr.msk.bf16.mxu1 %vm250_vm1, %v7481_v32  ;;  %8944 = vst [vmem:[#allocation51_spill] sm:$0xff] %v7746_v7  ;;  %v3026_v56 = vunpack.c.l.bf16 %v7746_v7  ;;  %v7753_v60 = vld [vmem:[#allocation2 + $0x70] sm:$0xff]  }
 0x2ad   :  { %8946 = vst [vmem:[#allocation53_spill] sm:$0xff] %v7753_v60  ;;  %v3028_v32 = vunpack.c.l.bf16 %v7753_v60 }
 0x2ae   :  { %2249 = vmatpush2.bf16.msra.mxu0 %v7723_v10  ;;  %v7744_v10 = vld [vmem:[#allocation2 + $0x10] sm:$0xff]   ;;  %v3062_v7 = vsel %vm101_vm0, %v3026_v56, 0.0 }
 0x2af   :  { %2250 = vmatprep.subr.bf16.mxu0 %v7731_v9  ;;  %8943 = vst [vmem:[#allocation50_spill] sm:$0xff] %v7744_v10  ;;  %v3025_v58 = vunpack.c.l.bf16 %v7744_v10  ;;  %v3027_v9 = vunpack.c.l.bf16 %v7748_v12  ;;  %v3042_v10 = vcombine.high %v3026_v56, %v3026_v56  ;;  %v3044_v34 = vcombine.high %v3028_v32, %v3028_v32 }
 0x2b0   :  { %v3072_v60 = vsel %vm101_vm0, %v3028_v32, 0.0  ;;  %v3032_v32 = vunpack.c.l.bf16 %v7770_v2 }
 0x2b1   :  { %v3041_v22 = vcombine.high %v3025_v58, %v3025_v58  ;;  %v3057_v38 = vsel %vm101_vm0, %v3025_v58, 0.0  ;;  %v3043_v37 = vcombine.high %v3027_v9, %v3027_v9  ;;  %v3067_v12 = vsel %vm101_vm0, %v3027_v9, 0.0 }
 0x2b2   :  { %2251 = vmatpush2.bf16.msra.mxu0 %v7735_v11  ;;  %v7755_v11 = vld [vmem:[#allocation2 + $0x90] sm:$0xff]   ;;  %v3063_v30 = vsel %vm101_vm0, %v3042_v10, 0.0  ;;  %v3073_v56 = vsel %vm101_vm0, %v3044_v34, 0.0 }
 0x2b3   :  { %2915 = vmatprep.subr.bf16.mxu0 %v7489_v5  ;;  %8947 = vst [vmem:[#allocation54_spill] sm:$0xff] %v7755_v11  ;;  %v3029_v5 = vunpack.c.l.bf16 %v7755_v11  ;;  %v3058_v33 = vsel %vm101_vm0, %v3041_v22, 0.0  ;;  %v7768_v11 = vld [vmem:[#allocation2 + $0xd0] sm:$0xff]   ;;  %v3064_v58 = vadd.f32 %v3063_v30, %v3062_v7  ;;  %v3068_v24 = vsel %vm101_vm0, %v3043_v37, 0.0 }
 0x2b4   :  { %8949 = vst [vmem:[#allocation56_spill] sm:$0xff] %v7768_v11  ;;  %v3059_v26 = vadd.f32 %v3058_v33, %v3057_v38  ;;  %v3069_v9 = vadd.f32 %v3068_v24, %v3067_v12  ;;  %v3074_v22 = vadd.f32 %v3073_v56, %v3072_v60  ;;  %v3031_v10 = vunpack.c.l.bf16 %v7768_v11 }
 0x2b5   :  { %v3045_v29 = vcombine.high %v3029_v5, %v3029_v5  ;;  %3065 = vadd.xlane.f32.xlu1 %v3064_v58  ;;  %v3077_v48 = vsel %vm101_vm0, %v3029_v5, 0.0  ;;  %v3082_v33 = vsel %vm101_vm0, %v3030_v0, 0.0  ;;  %v3083_v30 = vsel %vm101_vm0, %v3046_v52, 0.0  ;;  %v2325_v52 = vpop.xlane.xlu0 %2324  ;;  %v2330_v5 = vpop.xlane.xlu1 %2329 }
 0x2b6   :  { %3060 = vadd.xlane.f32.xlu0 %v3059_v26  ;;  %v3047_v37 = vcombine.high %v3031_v10, %v3031_v10  ;;  %v3048_v38 = vcombine.high %v3032_v32, %v3032_v32  ;;  %v3084_v34 = vadd.f32 %v3083_v30, %v3082_v33  ;;  %v3087_v24 = vsel %vm101_vm0, %v3031_v10, 0.0 }
 0x2b7   :  { %v3078_v47 = vsel %vm101_vm0, %v3045_v29, 0.0  ;;  %v3092_v12 = vsel %vm101_vm0, %v3032_v32, 0.0  ;;  %v2361_v58 = vmul.f32 0.00390625, %v2325_v52  ;;  %v2362_v56 = vmul.f32 0.00390625, %v2330_v5 }
 0x2b8   :  { %v3079_v26 = vadd.f32 %v3078_v47, %v3077_v48  ;;  %v3088_v7 = vsel %vm101_vm0, %v3047_v37, 0.0  ;;  %v3093_v60 = vsel %vm101_vm0, %v3048_v38, 0.0 }
 0x2b9   :  { %3075 = vadd.xlane.f32.xlu1 %v3074_v22  ;;  %v3089_v29 = vadd.f32 %v3088_v7, %v3087_v24  ;;  %v3094_v0 = vadd.f32 %v3093_v60, %v3092_v12  ;;  %v2335_v47 = vpop.xlane.xlu0 %2334  ;;  %v2340_v48 = vpop.xlane.xlu1 %2339  ;;  %v2370_v22 = vpack.c.bf16 %v2362_v56, %v2362_v56  ;;  %v1101_v24 = vld [vmem:[%s8654_s4] sm:$0xf] }
 0x2ba   :  { %3070 = vadd.xlane.f32.xlu0 %v3069_v9  ;;  %v2369_v9 = vpack.c.bf16 %v2361_v58, %v2361_v58  ;;  %v2363_v10 = vmul.f32 0.00390625, %v2335_v47  ;;  %v2364_v33 = vmul.f32 0.00390625, %v2340_v48  ;;  %v1106_v52 = vrot.slane %v1101_v24, %v8905_v21 }
 0x2bb   :  { %v2399_v37 = vunpack.c.l.b16 %v2370_v22  ;;  %v1114_v5 = vrot.slane %v1101_v24, %v7513_v3  ;;  %v1110_v58 = vrot.slane %v1101_v24, %v8906_v25  ;;  %v1118_v56 = vrot.slane %v1101_v24, %v7516_v4  ;;  %v1642_v3 = vld [vmem:[%s8652_s2] sm:$0x3] }
 0x2bc   :  { %v2398_v32 = vunpack.c.l.b16 %v2369_v9  ;;  %v2371_v38 = vpack.c.bf16 %v2363_v10, %v2363_v10  ;;  %v1647_v43 = vrot.slane %v1642_v3, %v8905_v21 }
 0x2bd   :  { %3085 = vadd.xlane.f32.xlu1 %v3084_v34  ;;  %v2345_v30 = vpop.xlane.xlu0 %2344  ;;  %v2372_v34 = vpack.c.bf16 %v2364_v33, %v2364_v33  ;;  %v2413_v60 = vrot.slane %v2399_v37, %v7219_v14 }
 0x2be   :  { %3080 = vadd.xlane.f32.xlu0 %v3079_v26  ;;  %v2350_v26 = vpop.xlane.xlu1 %2349  ;;  %v2365_v7 = vmul.f32 0.00390625, %v2345_v30  ;;  %v2409_v12 = vrot.slane %v2398_v32, %v7219_v14 }
 0x2bf   :  { %v2401_v48 = vunpack.c.l.b16 %v2372_v34 }
 0x2c0   :  { %v2373_v10 = vpack.c.bf16 %v2365_v7, %v2365_v7  ;;  %v2438_v30 = vsel %vm222_vm2, %v2413_v60, %v2409_v12 }
 0x2c1   :  { %3095 = vadd.xlane.f32.xlu1 %v3094_v0  ;;  %v2366_v0 = vmul.f32 0.00390625, %v2350_v26  ;;  %v2355_v47 = vpop.xlane.xlu0 %2354  ;;  %v2421_v46 = vrot.slane %v2401_v48, %v7219_v14 }
 0x2c2   :  { %3090 = vadd.xlane.f32.xlu0 %v3089_v29  ;;  %v2400_v29 = vunpack.c.l.b16 %v2371_v38  ;;  %v2360_v33 = vpop.xlane.xlu1 %2359  ;;  %v2367_v2 = vmul.f32 0.00390625, %v2355_v47  ;;  %v2402_v7 = vunpack.c.l.b16 %v2373_v10 }
 0x2c3   :  { %v2374_v26 = vpack.c.bf16 %v2366_v0, %v2366_v0 }
 0x2c4   :  { %v2417_v32 = vrot.slane %v2400_v29, %v7219_v14  ;;  %v2368_v29 = vmul.f32 0.00390625, %v2360_v33  ;;  %v2375_v41 = vpack.c.bf16 %v2367_v2, %v2367_v2 }
 0x2c6   :  { %v2439_v0 = vsel %vm224_vm3, %v2417_v32, %v2438_v30 }
 0x32d   :  { %v1477_v9 = vpop.f32.mrf.mxu0  ;;  %v1518_v22 = vpop.f32.mrf.mxu1 }
 0x32e   :  { %v1478_v11 = vadd.f32 %v1477_v9, %v1106_v52  ;;  %v1519_v24 = vadd.f32 %v1518_v22, %v1114_v5  ;;  %v2403_v52 = vunpack.c.l.b16 %v2374_v26  ;;  %v1651_v5 = vrot.slane %v1642_v3, %v8906_v25 }
 0x32f   :  { %v1479_v37 = vpop.f32.mrf.mxu0  ;;  %v1520_v38 = vpop.f32.mrf.mxu1 }
 0x330   :  { %v1480_v4 = vadd.f32 %v1479_v37, %v1110_v58  ;;  %v1521_v34 = vadd.f32 %v1520_v38, %v1118_v56  ;;  %v2425_v58 = vrot.slane %v2402_v7, %v7219_v14  ;;  %v2429_v9 = vrot.slane %v2403_v52, %v7219_v14  ;;  %v8980_v7 = vld [vmem:[#allocation19_spill] sm:$0xff]  ;;  %v8986_v52 = vld [vmem:[#allocation49_spill] sm:$0xff] }
 0x331   :  { %v1481_v45 = vpop.f32.mrf.mxu0  ;;  %v1522_v44 = vpop.f32.mrf.mxu1 }
 0x332   :  { %v6532_v12 = vpack.c.bf16 %v1480_v4, %v1478_v11  ;;  %v6533_v60 = vpack.c.bf16 %v1521_v34, %v1519_v24  ;;  %v2440_v44 = vsel %vm226_vm4, %v2421_v46, %v2439_v0  ;;  %v2376_v4 = vpack.c.bf16 %v2368_v29, %v2368_v29  ;;  %v8979_v34 = vld [vmem:[#allocation45_spill] sm:$0xff]  ;;  %v8983_v29 = vld [vmem:[#allocation48_spill] sm:$0xff]  ;;  %v8984_v0 = vld [vmem:[#allocation46_spill] sm:$0xff] }
 0x333   :  { %v1482_v47 = vpop.f32.mrf.mxu0  ;;  %v1523_v42 = vpop.f32.mrf.mxu1  ;;  %v2404_v11 = vunpack.c.l.b16 %v2375_v41 }
 0x334   :  { %1542 = vst [vmem:[#allocation8 + $0x10] sm:$0xff] %v6532_v12  ;;  %1543 = vst [vmem:[#allocation8 + $0x18] sm:$0xff] %v6533_v60  ;;  %v2441_v42 = vsel %vm228_vm5, %v2425_v58, %v2440_v44  ;;  %v2405_v33 = vunpack.c.l.b16 %v2376_v4  ;;  %v8981_v12 = vld [vmem:[#allocation42_spill] sm:$0xff]  ;;  %v8982_v60 = vld [vmem:[#allocation44_spill] sm:$0xff] }
 0x335   :  { %v1762_v56 = vpop.f32.mrf.mxu0  ;;  %v2433_v3 = vrot.slane %v2404_v11, %v7219_v14  ;;  %v2442_v37 = vsel %vm230_vm6, %v2429_v9, %v2441_v42  ;;  %v8985_v47 = vld [vmem:[#allocation47_spill] sm:$0xff]  ;;  %v8989_v11 = vld [vmem:[#allocation52_spill] sm:$0xff]  ;;  %v8990_v9 = vld [vmem:[#allocation53_spill] sm:$0xff] }
 0x336   :  { %v1763_v45 = vadd.f32 %v1762_v56, %v1647_v43  ;;  %v2437_v43 = vrot.slane %v2405_v33, %v7219_v14  ;;  %v8987_v56 = vld [vmem:[#allocation50_spill] sm:$0xff]  ;;  %v8988_v4 = vld [vmem:[#allocation51_spill] sm:$0xff] }
 0x337   :  { %v1764_v48 = vpop.f32.mrf.mxu0  ;;  %v2443_v41 = vsel %vm232_vm7, %v2433_v3, %v2442_v37  ;;  %v3761_v44 = vunpack.c.h.bf16 %v8987_v56  ;;  %v7889_v42 = vld [vmem:[#allocation7 + $0xe4] ss:$16 sps:$4 sm:$0xff]   ;;  %v8992_v33 = vld [vmem:[#allocation55_spill] sm:$0xff] }
 0x338   :  { %v1765_v22 = vadd.f32 %v1764_v48, %v1651_v5  ;;  %v1769_v2 = vmax.f32 %v1763_v45, 0.0  ;;  %v2444_v26 = vsel %vm234_vm8, %v2437_v43, %v2443_v41  ;;  %v7877_v5 = vld.sshfl [vmem:[#allocation5] sm:$0x33 pattern:$0x76325410]  ;;  %v3762_v45 = vunpack.c.h.bf16 %v8988_v4  ;;  %v8993_v3 = vld [vmem:[#allocation56_spill] sm:$0xff] }
 0x339   :  { %v1766_v10 = vpop.f32.mrf.mxu0  ;;  %v2445_v24 = vpack.c.b16 %v2444_v26, %v2444_v26  ;;  %v7881_v58 = vcombine.high %v7877_v5, %v7877_v5  ;;  %v3763_v48 = vunpack.c.h.bf16 %v8989_v11  ;;  %v3777_v37 = vcombine.high %v3761_v44, %v3761_v44 }
 0x33a   :  { %v1770_v30 = vmax.f32 %v1765_v22, 0.0  ;;  %v1771_v46 = vpack.c.bf16 %v1769_v2, %v1769_v2  ;;  %v3764_v22 = vunpack.c.h.bf16 %v8990_v9  ;;  %v8991_v2 = vld [vmem:[#allocation54_spill] sm:$0xff]  ;;  %v3798_v43 = vsel %vm101_vm0, %v3762_v45, 0.0 }
 0x33b   :  { %v1767_v32 = vpop.f32.mrf.mxu0  ;;  %v3765_v10 = vunpack.c.h.bf16 %v8991_v2  ;;  %v3779_v41 = vcombine.high %v3763_v48, %v3763_v48  ;;  %v3803_v26 = vsel %vm101_vm0, %v3763_v48, 0.0 }
 0x33c   :  { %v1772_v38 = vpack.c.bf16 %v1770_v30, %v1770_v30  ;;  %v3766_v30 = vunpack.c.h.bf16 %v8992_v33  ;;  %v3767_v32 = vunpack.c.h.bf16 %v8993_v3 }
 0x33e   :  { %2211 = vmatprep.mubr.bf16.mxu1 %v1772_v38  ;;  %2252 = vmatprep.mubr.bf16.mxu0 %v1772_v38  ;;  %v3793_v38 = vsel %vm101_vm0, %v3761_v44, 0.0 }
 0x33f   :  { %2212 = vmatmul.mubr.bf16.vlgmr.msra.gmra.mxu1 %v1771_v46  ;;  %2253 = vmatmul.mubr.bf16.vlgmr.msra.gmra.mxu0 %v1771_v46  ;;  %v3778_v46 = vcombine.high %v3762_v45, %v3762_v45 }
 0x340   :  { %2479 = vmatpush1.bf16.msra.mxu1 %v7544_v54  ;;  %2496 = vmatprep.mubr.bf16.mxu1 %v8867_v13  ;;  %v8951_v54 = vld [vmem:[#allocation12_spill] sm:$0xff] }
 0x341   :  { %2916 = vmatpush1.bf16.msra.mxu0 %v7546_v15  ;;  %2956 = vmatprep.subr.bf16.mxu1 %v7548_v23  ;;  %v8952_v15 = vld [vmem:[#allocation13_spill] sm:$0xff]  ;;  %v8953_v23 = vld [vmem:[#allocation22_spill] sm:$0xff] }
 0x342   :  { %2917 = vmatprep.subr.bf16.mxu0 %v7551_v53  ;;  %v8954_v53 = vld [vmem:[#allocation23_spill] sm:$0xff] }
 0x345   :  { %2918 = vmatpush1.bf16.msra.mxu0 %v7558_v31  ;;  %v8955_v31 = vld [vmem:[#allocation14_spill] sm:$0xff] }
 0x346   :  { %2919 = vmatprep.subr.bf16.mxu0 %v7562_v19  ;;  %v8956_v19 = vld [vmem:[#allocation15_spill] sm:$0xff] }
 0x347   :  { %6187 = vmatmul.mubr.msk.bf16.vlgmr.msra.gmra.mxu1 %vm246_vm9, %v2445_v24  ;;  %v3780_v24 = vcombine.high %v3764_v22, %v3764_v22 }
 0x348   :  { %2957 = vmatpush1.bf16.msra.mxu1 %v7564_v8  ;;  %v8957_v8 = vld [vmem:[#allocation24_spill] sm:$0xff] }
 0x349   :  { %2958 = vmatprep.subr.bf16.mxu1 %v7567_v20  ;;  %2920 = vmatpush1.bf16.msra.mxu0 %v7569_v51  ;;  %v8958_v20 = vld [vmem:[#allocation25_spill] sm:$0xff]  ;;  %v8959_v51 = vld [vmem:[#allocation16_spill] sm:$0xff] }
 0x34a   :  { %2921 = vmatprep.subr.bf16.mxu0 %v7572_v55  ;;  %v8960_v55 = vld [vmem:[#allocation17_spill] sm:$0xff] }
 0x34c   :  { %2959 = vmatpush1.bf16.msra.mxu1 %v7576_v49  ;;  %v8961_v49 = vld [vmem:[#allocation26_spill] sm:$0xff] }
 0x34d   :  { %2960 = vmatprep.subr.bf16.mxu1 %v7580_v17  ;;  %2922 = vmatpush1.bf16.msra.mxu0 %v7582_v59  ;;  %v8962_v17 = vld [vmem:[#allocation27_spill] sm:$0xff]  ;;  %v8963_v59 = vld [vmem:[#allocation18_spill] sm:$0xff] }
 0x34e   :  { %2923 = vmatprep.subr.bf16.mxu0 %v7585_v6  ;;  %v8964_v6 = vld [vmem:[#allocation31_spill] sm:$0xff] }
 0x350   :  { %2961 = vmatpush1.bf16.msra.mxu1 %v7588_v63  ;;  %v8965_v63 = vld [vmem:[#allocation28_spill] sm:$0xff] }
 0x351   :  { %2962 = vmatprep.subr.bf16.mxu1 %v7592_v50  ;;  %2924 = vmatpush1.bf16.msra.mxu0 %v7594_v57  ;;  %v8966_v50 = vld [vmem:[#allocation29_spill] sm:$0xff] }
 0x352   :  { %2925 = vmatprep.subr.bf16.mxu0 %v7597_v61  ;;  %v8967_v57 = vld [vmem:[#allocation33_spill] sm:$0xff] }
 0x353   :  { %v8968_v61 = vld [vmem:[#allocation37_spill] sm:$0xff] }
 0x354   :  { %2963 = vmatpush1.bf16.msra.mxu1 %v7600_v62  ;;  %v8969_v62 = vld [vmem:[#allocation35_spill] sm:$0xff] }
 0x355   :  { %2964 = vmatprep.subr.bf16.mxu1 %v7604_v1  ;;  %2926 = vmatpush1.bf16.msra.mxu0 %v7606_v16  ;;  %v8970_v1 = vld [vmem:[#allocation30_spill] sm:$0xff]  ;;  %v8971_v16 = vld [vmem:[#allocation36_spill] sm:$0xff] }
 0x356   :  { %2927 = vmatprep.subr.bf16.mxu0 %v7609_v18  ;;  %v8972_v18 = vld [vmem:[#allocation39_spill] sm:$0xff] }
 0x358   :  { %2965 = vmatpush1.bf16.msra.mxu1 %v7612_v27  ;;  %v8973_v27 = vld [vmem:[#allocation32_spill] sm:$0xff] }
 0x359   :  { %2966 = vmatprep.subr.bf16.mxu1 %v7616_v28  ;;  %2928 = vmatpush1.bf16.msra.mxu0 %v7618_v35  ;;  %v8974_v28 = vld [vmem:[#allocation34_spill] sm:$0xff]  ;;  %v8975_v35 = vld [vmem:[#allocation41_spill] sm:$0xff] }
 0x35a   :  { %2929 = vmatprep.subr.bf16.mxu0 %v7621_v36  ;;  %v8976_v36 = vld [vmem:[#allocation43_spill] sm:$0xff] }
 0x35c   :  { %2967 = vmatpush1.bf16.msra.mxu1 %v7624_v39  ;;  %v8977_v39 = vld [vmem:[#allocation38_spill] sm:$0xff] }
 0x35d   :  { %2968 = vmatprep.subr.bf16.mxu1 %v7628_v40  ;;  %2930 = vmatpush1.bf16.msra.mxu0 %v8951_v54  ;;  %v8978_v40 = vld [vmem:[#allocation40_spill] sm:$0xff]  ;;  %v8994_v54 = vld [vmem:[#allocation57_spill] sm:$0xff] }
 0x35e   :  { %2931 = vmatprep.subr.bf16.mxu0 %v8952_v15  ;;  %v3768_v15 = vunpack.c.h.bf16 %v8994_v54 }
 0x360   :  { %2969 = vmatpush1.bf16.msra.mxu1 %v8953_v23  ;;  %v3794_v23 = vsel %vm101_vm0, %v3777_v37, 0.0  ;;  %v8995_v37 = vld [vmem:[#allocation20_spill] sm:$0xff] }
 0x361   :  { %2970 = vmatprep.subr.bf16.mxu1 %v8954_v53  ;;  %2932 = vmatpush2.bf16.msra.mxu0 %v8955_v31  ;;  %v3799_v53 = vsel %vm101_vm0, %v3778_v46, 0.0  ;;  %v3808_v31 = vsel %vm101_vm0, %v3764_v22, 0.0  ;;  %v1837_v22 = vld [vmem:[%s8654_s4] sm:$0xf] }
 0x362   :  { %2933 = vmatprep.subr.bf16.mxu0 %v8956_v19  ;;  %v3781_v19 = vcombine.high %v3765_v10, %v3765_v10  ;;  %v1846_v46 = vrot.slane %v1837_v22, %v8906_v25 }
 0x364   :  { %2971 = vmatpush1.bf16.msra.mxu1 %v8957_v8  ;;  %v3795_v8 = vadd.f32 %v3794_v23, %v3793_v38  ;;  %v1850_v38 = vrot.slane %v1837_v22, %v8995_v37 }
 0x365   :  { %2972 = vmatprep.subr.bf16.mxu1 %v8958_v20  ;;  %2934 = vmatpush2.bf16.msra.mxu0 %v8959_v51  ;;  %v3800_v20 = vadd.f32 %v3799_v53, %v3798_v43  ;;  %v3804_v51 = vsel %vm101_vm0, %v3779_v41, 0.0  ;;  %v8996_v43 = vld [vmem:[#allocation21_spill] sm:$0xff] }
 0x366   :  { %2935 = vmatprep.subr.bf16.mxu0 %v8960_v55  ;;  %v3809_v55 = vsel %vm101_vm0, %v3780_v24, 0.0  ;;  %3796 = vadd.xlane.f32.xlu0 %v3795_v8  ;;  %v1854_v41 = vrot.slane %v1837_v22, %v8996_v43 }
 0x367   :  { %3801 = vadd.xlane.f32.xlu1 %v3800_v20 }
 0x368   :  { %2973 = vmatpush2.bf16.msra.mxu1 %v8961_v49  ;;  %v3782_v49 = vcombine.high %v3766_v30, %v3766_v30 }
 0x369   :  { %2974 = vmatprep.subr.bf16.mxu1 %v8962_v17  ;;  %2936 = vmatpush2.bf16.msra.mxu0 %v8963_v59  ;;  %v3805_v17 = vadd.f32 %v3804_v51, %v3803_v26  ;;  %v3810_v59 = vadd.f32 %v3809_v55, %v3808_v31 }
 0x36a   :  { %2937 = vmatprep.subr.bf16.mxu0 %v8964_v6  ;;  %v3813_v6 = vsel %vm101_vm0, %v3765_v10, 0.0 }
 0x36b   :  { %3806 = vadd.xlane.f32.xlu0 %v3805_v17  ;;  %3811 = vadd.xlane.f32.xlu1 %v3810_v59 }
 0x36c   :  { %2975 = vmatpush2.bf16.msra.mxu1 %v8965_v63  ;;  %v3814_v63 = vsel %vm101_vm0, %v3781_v19, 0.0 }
 0x36d   :  { %2976 = vmatprep.subr.bf16.mxu1 %v8966_v50  ;;  %2938 = vmatpush2.bf16.msra.mxu0 %v8967_v57  ;;  %v3818_v50 = vsel %vm101_vm0, %v3766_v30, 0.0  ;;  %v3819_v57 = vsel %vm101_vm0, %v3782_v49, 0.0  ;;  %v2378_v49 = vld [vmem:[%s8652_s2] sm:$0x3] }
 0x36e   :  { %2939 = vmatprep.subr.bf16.mxu0 %v8968_v61  ;;  %v3783_v61 = vcombine.high %v3767_v32, %v3767_v32 }
 0x370   :  { %2977 = vmatpush2.bf16.msra.mxu1 %v8969_v62  ;;  %v3784_v62 = vcombine.high %v3768_v15, %v3768_v15 }
 0x371   :  { %2978 = vmatprep.subr.bf16.mxu1 %v8970_v1  ;;  %2940 = vmatpush2.bf16.msra.mxu0 %v8971_v16  ;;  %v3815_v1 = vadd.f32 %v3814_v63, %v3813_v6  ;;  %v3820_v16 = vadd.f32 %v3819_v57, %v3818_v50 }
 0x372   :  { %2941 = vmatprep.subr.bf16.mxu0 %v8972_v18  ;;  %v3823_v18 = vsel %vm101_vm0, %v3767_v32, 0.0  ;;  %v1842_v32 = vrot.slane %v1837_v22, %v8905_v21 }
 0x373   :  { %3816 = vadd.xlane.f32.xlu0 %v3815_v1  ;;  %3821 = vadd.xlane.f32.xlu1 %v3820_v16 }
 0x374   :  { %2979 = vmatpush2.bf16.msra.mxu1 %v8973_v27  ;;  %v3824_v27 = vsel %vm101_vm0, %v3783_v61, 0.0 }
 0x375   :  { %2980 = vmatprep.subr.bf16.mxu1 %v8974_v28  ;;  %2942 = vmatpush2.bf16.msra.mxu0 %v8975_v35  ;;  %v3828_v28 = vsel %vm101_vm0, %v3768_v15, 0.0  ;;  %v3829_v35 = vsel %vm101_vm0, %v3784_v62, 0.0 }
 0x376   :  { %2943 = vmatprep.subr.bf16.mxu0 %v8976_v36  ;;  %v3825_v36 = vadd.f32 %v3824_v27, %v3823_v18  ;;  %v2383_v27 = vrot.slane %v2378_v49, %v8905_v21 }
 0x378   :  { %2981 = vmatpush2.bf16.msra.mxu1 %v8977_v39  ;;  %v3830_v39 = vadd.f32 %v3829_v35, %v3828_v28  ;;  %3826 = vadd.xlane.f32.xlu0 %v3825_v36 }
 0x379   :  { %2982 = vmatprep.subr.bf16.mxu1 %v8978_v40  ;;  %2944 = vmatpush2.bf16.msra.mxu0 %v8979_v34  ;;  %v3061_v40 = vpop.xlane.xlu0 %3060  ;;  %v3066_v34 = vpop.xlane.xlu1 %3065 }
 0x37a   :  { %2945 = vmatprep.subr.bf16.mxu0 %v8980_v7  ;;  %3831 = vadd.xlane.f32.xlu1 %v3830_v39  ;;  %v3097_v7 = vmul.f32 0.00390625, %v3061_v40 }
 0x37c   :  { %2983 = vmatpush2.bf16.msra.mxu1 %v8981_v12  ;;  %v3098_v12 = vmul.f32 0.00390625, %v3066_v34  ;;  %v2387_v34 = vrot.slane %v2378_v49, %v8906_v25  ;;  %v7982_v49 = vld [vmem:[#allocation7 + $0xa8] ss:$16 sps:$4 sm:$0xff]  }
 0x37d   :  { %2984 = vmatprep.subr.bf16.mxu1 %v8982_v60  ;;  %2946 = vmatpush2.bf16.msra.mxu0 %v8983_v29  ;;  %v3071_v60 = vpop.xlane.xlu0 %3070  ;;  %v3076_v29 = vpop.xlane.xlu1 %3075 }
 0x37e   :  { %6255 = vmatprep.subr.msk.bf16.mxu0 %vm250_vm1, %v7881_v58  ;;  %v3100_v56 = vmul.f32 0.00390625, %v3076_v29 }
 0x380   :  { %2985 = vmatpush2.bf16.msra.mxu1 %v8984_v0  ;;  %v3105_v0 = vpack.c.bf16 %v3097_v7, %v3097_v7  ;;  %v3108_v9 = vpack.c.bf16 %v3100_v56, %v3100_v56 }
 0x381   :  { %2986 = vmatprep.subr.bf16.mxu1 %v8985_v47  ;;  %v3106_v47 = vpack.c.bf16 %v3098_v12, %v3098_v12  ;;  %v3081_v44 = vpop.xlane.xlu0 %3080  ;;  %v3086_v48 = vpop.xlane.xlu1 %3085 }
 0x382   :  { %v3134_v4 = vunpack.c.l.b16 %v3105_v0  ;;  %v3101_v2 = vmul.f32 0.00390625, %v3081_v44  ;;  %v3102_v3 = vmul.f32 0.00390625, %v3086_v48  ;;  %v3137_v24 = vunpack.c.l.b16 %v3108_v9 }
 0x383   :  { %v3135_v45 = vunpack.c.l.b16 %v3106_v47 }
 0x384   :  { %2987 = vmatpush2.bf16.msra.mxu1 %v8986_v52  ;;  %v3099_v52 = vmul.f32 0.00390625, %v3071_v60  ;;  %v3145_v10 = vrot.slane %v3134_v4, %v7219_v14  ;;  %v3109_v23 = vpack.c.bf16 %v3101_v2, %v3101_v2  ;;  %v3110_v51 = vpack.c.bf16 %v3102_v3, %v3102_v3 }
 0x385   :  { %3651 = vmatprep.subr.bf16.mxu1 %v7889_v42  ;;  %v3149_v33 = vrot.slane %v3135_v45, %v7219_v14  ;;  %v3091_v26 = vpop.xlane.xlu0 %3090  ;;  %v3096_v53 = vpop.xlane.xlu1 %3095  ;;  %v3157_v50 = vrot.slane %v3137_v24, %v7219_v14  ;;  %v7938_v3 = vsel %vm250_vm1, %v7877_v5, 0  ;;  %v7952_v5 = vld [vmem:[#allocation7 + $0xc0] ss:$16 sps:$4 sm:$0xff]  }
 0x386   :  { %v3107_v11 = vpack.c.bf16 %v3099_v52, %v3099_v52  ;;  %v3103_v55 = vmul.f32 0.00390625, %v3091_v26  ;;  %v3138_v57 = vunpack.c.l.b16 %v3109_v23  ;;  %v3104_v18 = vmul.f32 0.00390625, %v3096_v53  ;;  %v7961_v53 = vld [vmem:[#allocation7 + $0xcc] ss:$16 sps:$4 sm:$0xff]  }
 0x387   :  { %v3174_v31 = vsel %vm222_vm2, %v3149_v33, %v3145_v10  ;;  %v3139_v40 = vunpack.c.l.b16 %v3110_v51  ;;  %v7976_v51 = vld [vmem:[#allocation7 + $0x80] ss:$16 sps:$4 sm:$0xff]  }
 0x388   :  { %v3136_v30 = vunpack.c.l.b16 %v3107_v11  ;;  %v3111_v39 = vpack.c.bf16 %v3103_v55, %v3103_v55  ;;  %v3161_v7 = vrot.slane %v3138_v57, %v7219_v14  ;;  %v3112_v29 = vpack.c.bf16 %v3104_v18, %v3104_v18  ;;  %v7979_v55 = vld [vmem:[#allocation7 + $0x64] ss:$16 sps:$4 sm:$0xff]   ;;  %v8000_v57 = vld [vmem:[#allocation7 + $0x40] ss:$16 sps:$4 sm:$0xff]  }
 0x389   :  { %v3165_v56 = vrot.slane %v3139_v40, %v7219_v14  ;;  %v8015_v18 = vld [vmem:[#allocation7 + $0x4] ss:$16 sps:$4 sm:$0xff]   ;;  %v8034_v40 = vld [vmem:[#allocation7 + $0xc] ss:$16 sps:$4 sm:$0xff]  }
 0x38a   :  { %v3153_v19 = vrot.slane %v3136_v30, %v7219_v14  ;;  %v3140_v47 = vunpack.c.l.b16 %v3111_v39  ;;  %v3141_v48 = vunpack.c.l.b16 %v3112_v29  ;;  %v8030_v39 = vld [vmem:[#allocation7 + $0x28] ss:$16 sps:$4 sm:$0xff]   ;;  %9000 = vst [vmem:[#allocation23_spill] sm:$0xff] %v8034_v40  ;;  %v8048_v29 = vld [vmem:[#allocation7 + $0x1c0] ss:$16 sps:$4 sm:$0xff]  }
 0x38b   :  { %8999 = vst [vmem:[#allocation22_spill] sm:$0xff] %v8030_v39  ;;  %9005 = vst [vmem:[#allocation16_spill] sm:$0xff] %v8048_v29 }
 0x38c   :  { %v3175_v28 = vsel %vm224_vm3, %v3153_v19, %v3174_v31  ;;  %v3169_v22 = vrot.slane %v3140_v47, %v7219_v14  ;;  %v7963_v31 = vld [vmem:[#allocation7 + $0xa0] ss:$16 sps:$4 sm:$0xff]   ;;  %v7966_v19 = vld [vmem:[#allocation7 + $0x84] ss:$16 sps:$4 sm:$0xff]   ;;  %v8054_v47 = vld [vmem:[#allocation7 + $0x1e8] ss:$16 sps:$4 sm:$0xff]  }
 0x38d   :  { %v3176_v60 = vsel %vm226_vm4, %v3157_v50, %v3175_v28  ;;  %v7998_v50 = vld [vmem:[#allocation7 + $0x6c] ss:$16 sps:$4 sm:$0xff]   ;;  %9007 = vst [vmem:[#allocation26_spill] sm:$0xff] %v8054_v47 }
 0x38e   :  { %v3177_v4 = vsel %vm228_vm5, %v3161_v7, %v3176_v60  ;;  %v8022_v28 = vld [vmem:[#allocation7 + $0x2c] ss:$16 sps:$4 sm:$0xff]   ;;  %v8039_v7 = vld [vmem:[#allocation7 + $0x1c4] ss:$16 sps:$4 sm:$0xff]  }
 0x38f   :  { %v3178_v10 = vsel %vm230_vm6, %v3165_v56, %v3177_v4  ;;  %9002 = vst [vmem:[#allocation15_spill] sm:$0xff] %v8039_v7  ;;  %v8046_v60 = vld [vmem:[#allocation7 + $0x1ec] ss:$16 sps:$4 sm:$0xff]   ;;  %v8060_v56 = vld [vmem:[#allocation7 + $0x1a0] ss:$16 sps:$4 sm:$0xff]  }
 0x390   :  { %v3179_v26 = vsel %vm232_vm7, %v3169_v22, %v3178_v10  ;;  %9004 = vst [vmem:[#allocation25_spill] sm:$0xff] %v8046_v60  ;;  %9009 = vst [vmem:[#allocation18_spill] sm:$0xff] %v8060_v56  ;;  %v8066_v4 = vld [vmem:[#allocation7 + $0x1c8] ss:$16 sps:$4 sm:$0xff]   ;;  %v8089_v10 = vld [vmem:[#allocation7 + $0x16c] ss:$16 sps:$4 sm:$0xff]  }
 0x391   :  { %9011 = vst [vmem:[#allocation28_spill] sm:$0xff] %v8066_v4  ;;  %v8083_v22 = vld [vmem:[#allocation7 + $0x188] ss:$16 sps:$4 sm:$0xff]   ;;  %9018 = vst [vmem:[#allocation39_spill] sm:$0xff] %v8089_v10 }
 0x392   :  { %9016 = vst [vmem:[#allocation30_spill] sm:$0xff] %v8083_v22 }
 0x3ff   :  { %v2213_v54 = vpop.f32.mrf.mxu1  ;;  %v2254_v15 = vpop.f32.mrf.mxu0 }
 0x400   :  { %v2214_v17 = vadd.f32 %v2213_v54, %v1842_v32  ;;  %v2255_v59 = vadd.f32 %v2254_v15, %v1850_v38  ;;  %v7940_v32 = vld [vmem:[#allocation7 + $0xe0] ss:$16 sps:$4 sm:$0xff]   ;;  %v7942_v38 = vld [vmem:[#allocation7 + $0xec] ss:$16 sps:$4 sm:$0xff]   ;;  %v7956_v54 = vld [vmem:[#allocation7 + $0xa4] ss:$16 sps:$4 sm:$0xff]  }
 0x401   :  { %v2215_v8 = vpop.f32.mrf.mxu1  ;;  %v2256_v20 = vpop.f32.mrf.mxu0  ;;  %v7958_v15 = vld [vmem:[#allocation7 + $0xe8] ss:$16 sps:$4 sm:$0xff]  }
 0x402   :  { %v2216_v6 = vadd.f32 %v2215_v8, %v1846_v46  ;;  %v2257_v63 = vadd.f32 %v2256_v20, %v1854_v41  ;;  %v3173_v46 = vrot.slane %v3141_v48, %v7219_v14  ;;  %v7945_v41 = vld [vmem:[#allocation7 + $0xc4] ss:$16 sps:$4 sm:$0xff]   ;;  %v7970_v8 = vld [vmem:[#allocation7 + $0xc8] ss:$16 sps:$4 sm:$0xff]   ;;  %v7974_v20 = vld [vmem:[#allocation7 + $0xac] ss:$16 sps:$4 sm:$0xff]  }
 0x403   :  { %v2217_v61 = vpop.f32.mrf.mxu1  ;;  %v2258_v62 = vpop.f32.mrf.mxu0  ;;  %v8076_v48 = vld [vmem:[#allocation7 + $0x1a8] ss:$16 sps:$4 sm:$0xff]  }
 0x404   :  { %v6534_v1 = vpack.c.bf16 %v2216_v6, %v2214_v17  ;;  %v6535_v16 = vpack.c.bf16 %v2257_v63, %v2255_v59  ;;  %v3180_v24 = vsel %vm234_vm8, %v3173_v46, %v3179_v26  ;;  %v7986_v17 = vld [vmem:[#allocation7 + $0x8c] ss:$16 sps:$4 sm:$0xff]   ;;  %v7988_v59 = vld [vmem:[#allocation7 + $0x60] ss:$16 sps:$4 sm:$0xff]   ;;  %v7991_v6 = vld [vmem:[#allocation7 + $0x44] ss:$16 sps:$4 sm:$0xff]  }
 0x405   :  { %v2218_v35 = vpop.f32.mrf.mxu1  ;;  %v2259_v36 = vpop.f32.mrf.mxu0  ;;  %v3181_v23 = vpack.c.b16 %v3180_v24, %v3180_v24  ;;  %v7994_v63 = vld [vmem:[#allocation7 + $0x88] ss:$16 sps:$4 sm:$0xff]   ;;  %v8003_v61 = vld [vmem:[#allocation7 + $0x24] ss:$16 sps:$4 sm:$0xff]   ;;  %9014 = vst [vmem:[#allocation37_spill] sm:$0xff] %v8076_v48 }
 0x406   :  { %2278 = vst [vmem:[#allocation8 + $0x20] sm:$0xff] %v6534_v1  ;;  %2279 = vst [vmem:[#allocation8 + $0x28] sm:$0xff] %v6535_v16  ;;  %v8006_v62 = vld [vmem:[#allocation7 + $0x68] ss:$16 sps:$4 sm:$0xff]   ;;  %v8010_v1 = vld [vmem:[#allocation7 + $0x4c] ss:$16 sps:$4 sm:$0xff]  }
 0x407   :  { %v2498_v12 = vpop.f32.mrf.mxu1  ;;  %v8012_v16 = vld [vmem:[#allocation7 + $0x20] ss:$16 sps:$4 sm:$0xff]   ;;  %v8027_v36 = vld [vmem:[#allocation7 + $0x1e4] ss:$16 sps:$4 sm:$0xff]   ;;  %v8101_v26 = vld [vmem:[#allocation7 + $0x14c] ss:$16 sps:$4 sm:$0xff]  }
 0x408   :  { %v2499_v0 = vadd.f32 %v2498_v12, %v2383_v27  ;;  %v8018_v27 = vld [vmem:[#allocation7 + $0x48] ss:$16 sps:$4 sm:$0xff]   ;;  %v8024_v35 = vld [vmem:[#allocation7] ss:$16 sps:$4 sm:$0xff]   ;;  %8998 = vst [vmem:[#allocation13_spill] sm:$0xff] %v8027_v36  ;;  %9022 = vst [vmem:[#allocation43_spill] sm:$0xff] %v8101_v26 }
 0x409   :  { %v2500_v52 = vpop.f32.mrf.mxu1  ;;  %8997 = vst [vmem:[#allocation12_spill] sm:$0xff] %v8024_v35  ;;  %v8042_v12 = vld [vmem:[#allocation7 + $0x8] ss:$16 sps:$4 sm:$0xff]   ;;  %v8099_v46 = vld [vmem:[#allocation7 + $0x144] ss:$16 sps:$4 sm:$0xff]  }
 0x40a   :  { %v2501_v44 = vadd.f32 %v2500_v52, %v2387_v34  ;;  %v2505_v45 = vmax.f32 %v2499_v0, 0.0  ;;  %v8036_v34 = vld [vmem:[#allocation7 + $0x1e0] ss:$16 sps:$4 sm:$0xff]   ;;  %9003 = vst [vmem:[#allocation24_spill] sm:$0xff] %v8042_v12  ;;  %v8051_v0 = vld [vmem:[#allocation7 + $0x1a4] ss:$16 sps:$4 sm:$0xff]  }
 0x40b   :  { %v2502_v11 = vpop.f32.mrf.mxu1  ;;  %9001 = vst [vmem:[#allocation14_spill] sm:$0xff] %v8036_v34  ;;  %9006 = vst [vmem:[#allocation17_spill] sm:$0xff] %v8051_v0  ;;  %v8058_v52 = vld [vmem:[#allocation7 + $0x1cc] ss:$16 sps:$4 sm:$0xff]   ;;  %v8103_v24 = vld [vmem:[#allocation7 + $0x140] ss:$16 sps:$4 sm:$0xff]  }
 0x40c   :  { %v2506_v9 = vmax.f32 %v2501_v44, 0.0  ;;  %v2507_v30 = vpack.c.bf16 %v2505_v45, %v2505_v45  ;;  %9008 = vst [vmem:[#allocation27_spill] sm:$0xff] %v8058_v52  ;;  %v8063_v44 = vld [vmem:[#allocation7 + $0x184] ss:$16 sps:$4 sm:$0xff]   ;;  %v8070_v45 = vld [vmem:[#allocation7 + $0x1ac] ss:$16 sps:$4 sm:$0xff]  }
 0x40d   :  { %v2503_v2 = vpop.f32.mrf.mxu1  ;;  %9010 = vst [vmem:[#allocation31_spill] sm:$0xff] %v8063_v44  ;;  %9012 = vst [vmem:[#allocation29_spill] sm:$0xff] %v8070_v45  ;;  %v8072_v11 = vld [vmem:[#allocation7 + $0x180] ss:$16 sps:$4 sm:$0xff]  }
 0x40e   :  { %v2508_v33 = vpack.c.bf16 %v2506_v9, %v2506_v9  ;;  %9013 = vst [vmem:[#allocation33_spill] sm:$0xff] %v8072_v11  ;;  %v8080_v9 = vld [vmem:[#allocation7 + $0x18c] ss:$16 sps:$4 sm:$0xff]   ;;  %v8087_v2 = vld [vmem:[#allocation7 + $0x164] ss:$16 sps:$4 sm:$0xff]   ;;  %9021 = vst [vmem:[#allocation41_spill] sm:$0xff] %v8099_v46 }
 0x40f   :  { %9015 = vst [vmem:[#allocation35_spill] sm:$0xff] %v8080_v9  ;;  %9017 = vst [vmem:[#allocation36_spill] sm:$0xff] %v8087_v2 }
 0x410   :  { %2947 = vmatprep.mubr.bf16.mxu0 %v2508_v33  ;;  %2988 = vmatprep.mubr.bf16.mxu1 %v2508_v33  ;;  %v8091_v33 = vld [vmem:[#allocation7 + $0x160] ss:$16 sps:$4 sm:$0xff]   ;;  %9023 = vst [vmem:[#allocation38_spill] sm:$0xff] %v8103_v24 }
 0x411   :  { %2948 = vmatmul.mubr.bf16.vlgmr.msra.gmra.mxu0 %v2507_v30  ;;  %2989 = vmatmul.mubr.bf16.vlgmr.msra.gmra.mxu1 %v2507_v30  ;;  %9019 = vst [vmem:[#allocation32_spill] sm:$0xff] %v8091_v33  ;;  %v8093_v30 = vld [vmem:[#allocation7 + $0x168] ss:$16 sps:$4 sm:$0xff]  }
 0x412   :  { %3215 = vmatpush1.bf16.msra.mxu0 %v7938_v3  ;;  %3232 = vmatprep.mubr.bf16.mxu0 %v8867_v13  ;;  %9020 = vst [vmem:[#allocation34_spill] sm:$0xff] %v8093_v30 }
 0x413   :  { %3652 = vmatpush1.bf16.msra.mxu1 %v7940_v32  ;;  %3692 = vmatprep.subr.bf16.mxu0 %v7942_v38 }
 0x414   :  { %3653 = vmatprep.subr.bf16.mxu1 %v7945_v41 }
 0x417   :  { %3654 = vmatpush1.bf16.msra.mxu1 %v7952_v5 }
 0x418   :  { %3655 = vmatprep.subr.bf16.mxu1 %v7956_v54 }
 0x419   :  { %6256 = vmatmul.mubr.msk.bf16.vlgmr.msra.gmra.mxu0 %vm246_vm9, %v3181_v23  ;;  %v8105_v23 = vld [vmem:[#allocation7 + $0x148] ss:$16 sps:$4 sm:$0xff]  }
 0x41a   :  { %3693 = vmatpush1.bf16.msra.mxu0 %v7958_v15  ;;  %9024 = vst [vmem:[#allocation40_spill] sm:$0xff] %v8105_v23 }
 0x41b   :  { %3694 = vmatprep.subr.bf16.mxu0 %v7961_v53  ;;  %3656 = vmatpush1.bf16.msra.mxu1 %v7963_v31 }
 0x41c   :  { %3657 = vmatprep.subr.bf16.mxu1 %v7966_v19 }
 0x41e   :  { %3695 = vmatpush1.bf16.msra.mxu0 %v7970_v8 }
 0x41f   :  { %3696 = vmatprep.subr.bf16.mxu0 %v7974_v20  ;;  %3658 = vmatpush1.bf16.msra.mxu1 %v7976_v51 }
 0x420   :  { %3659 = vmatprep.subr.bf16.mxu1 %v7979_v55 }
 0x422   :  { %3697 = vmatpush1.bf16.msra.mxu0 %v7982_v49 }
 0x423   :  { %3698 = vmatprep.subr.bf16.mxu0 %v7986_v17  ;;  %3660 = vmatpush1.bf16.msra.mxu1 %v7988_v59 }
 0x424   :  { %3661 = vmatprep.subr.bf16.mxu1 %v7991_v6 }
 0x426   :  { %3699 = vmatpush1.bf16.msra.mxu0 %v7994_v63 }
 0x427   :  { %3700 = vmatprep.subr.bf16.mxu0 %v7998_v50  ;;  %3662 = vmatpush1.bf16.msra.mxu1 %v8000_v57 }
 0x428   :  { %3663 = vmatprep.subr.bf16.mxu1 %v8003_v61 }
 0x42a   :  { %3701 = vmatpush1.bf16.msra.mxu0 %v8006_v62 }
 0x42b   :  { %3702 = vmatprep.subr.bf16.mxu0 %v8010_v1  ;;  %3664 = vmatpush1.bf16.msra.mxu1 %v8012_v16 }
 0x42c   :  { %3665 = vmatprep.subr.bf16.mxu1 %v8015_v18 }
 0x42e   :  { %3703 = vmatpush1.bf16.msra.mxu0 %v8018_v27 }
 0x42f   :  { %3704 = vmatprep.subr.bf16.mxu0 %v8022_v28  ;;  %3666 = vmatpush1.bf16.msra.mxu1 %v8024_v35 }
 0x430   :  { %3667 = vmatprep.subr.bf16.mxu1 %v8027_v36 }
 0x432   :  { %3705 = vmatpush1.bf16.msra.mxu0 %v8030_v39 }
 0x433   :  { %3706 = vmatprep.subr.bf16.mxu0 %v8034_v40  ;;  %3668 = vmatpush2.bf16.msra.mxu1 %v8036_v34 }
 0x434   :  { %3669 = vmatprep.subr.bf16.mxu1 %v8039_v7 }
 0x436   :  { %3707 = vmatpush1.bf16.msra.mxu0 %v8042_v12 }
 0x437   :  { %3708 = vmatprep.subr.bf16.mxu0 %v8046_v60  ;;  %3670 = vmatpush2.bf16.msra.mxu1 %v8048_v29 }
 0x438   :  { %3671 = vmatprep.subr.bf16.mxu1 %v8051_v0 }
 0x43a   :  { %3709 = vmatpush2.bf16.msra.mxu0 %v8054_v47 }
 0x43b   :  { %3710 = vmatprep.subr.bf16.mxu0 %v8058_v52  ;;  %3672 = vmatpush2.bf16.msra.mxu1 %v8060_v56 }
 0x43c   :  { %3673 = vmatprep.subr.bf16.mxu1 %v8063_v44 }
 0x43e   :  { %3711 = vmatpush2.bf16.msra.mxu0 %v8066_v4 }
 0x43f   :  { %3712 = vmatprep.subr.bf16.mxu0 %v8070_v45  ;;  %3674 = vmatpush2.bf16.msra.mxu1 %v8072_v11 }
 0x440   :  { %3675 = vmatprep.subr.bf16.mxu1 %v8087_v2 }
 0x442   :  { %3713 = vmatpush2.bf16.msra.mxu0 %v8076_v48 }
 0x443   :  { %3714 = vmatprep.subr.bf16.mxu0 %v8080_v9  ;;  %3676 = vmatpush2.bf16.msra.mxu1 %v8091_v33  ;;  %v8117_v33 = vld [vmem:[#allocation7 + $0x128] ss:$16 sps:$4 sm:$0xff]  }
 0x444   :  { %3677 = vmatprep.subr.bf16.mxu1 %v8099_v46  ;;  %9028 = vst [vmem:[#allocation44_spill] sm:$0xff] %v8117_v33  ;;  %v8129_v46 = vld [vmem:[#allocation7 + $0x108] ss:$16 sps:$4 sm:$0xff]  }
 0x445   :  { %9032 = vst [vmem:[#allocation49_spill] sm:$0xff] %v8129_v46  ;;  %v8151_v9 = vld [vmem:[#allocation2 + $0xb8] sm:$0xff]  }
 0x446   :  { %3715 = vmatpush2.bf16.msra.mxu0 %v8083_v22  ;;  %v8113_v22 = vld [vmem:[#allocation7 + $0x12c] ss:$16 sps:$4 sm:$0xff]   ;;  %9038 = vst [vmem:[#allocation55_spill] sm:$0xff] %v8151_v9  ;;  %v4502_v48 = vunpack.c.l.bf16 %v8151_v9  ;;  %v8164_v9 = vld [vmem:[#allocation2 + $0xf8] sm:$0xff]  }
 0x447   :  { %3716 = vmatprep.subr.bf16.mxu0 %v8089_v10  ;;  %3678 = vmatpush2.bf16.msra.mxu1 %v8103_v24  ;;  %v8111_v10 = vld [vmem:[#allocation7 + $0x124] ss:$16 sps:$4 sm:$0xff]   ;;  %9026 = vst [vmem:[#allocation19_spill] sm:$0xff] %v8113_v22  ;;  %v8125_v24 = vld [vmem:[#allocation7 + $0x10c] ss:$16 sps:$4 sm:$0xff]   ;;  %9040 = vst [vmem:[#allocation57_spill] sm:$0xff] %v8164_v9 }
 0x448   :  { %9025 = vst [vmem:[#allocation45_spill] sm:$0xff] %v8111_v10  ;;  %3679 = vmatprep.subr.bf16.mxu1 %v8111_v10  ;;  %9030 = vst [vmem:[#allocation46_spill] sm:$0xff] %v8125_v24  ;;  %v4518_v29 = vcombine.high %v4502_v48, %v4502_v48 }
 0x44a   :  { %3717 = vmatpush2.bf16.msra.mxu0 %v8093_v30  ;;  %v8115_v30 = vld [vmem:[#allocation7 + $0x120] ss:$16 sps:$4 sm:$0xff]  }
 0x44b   :  { %3718 = vmatprep.subr.bf16.mxu0 %v8101_v26  ;;  %9027 = vst [vmem:[#allocation42_spill] sm:$0xff] %v8115_v30  ;;  %3680 = vmatpush2.bf16.msra.mxu1 %v8115_v30  ;;  %v8123_v26 = vld [vmem:[#allocation7 + $0x104] ss:$16 sps:$4 sm:$0xff]  }
 0x44c   :  { %9029 = vst [vmem:[#allocation48_spill] sm:$0xff] %v8123_v26  ;;  %3681 = vmatprep.subr.bf16.mxu1 %v8123_v26  ;;  %v8142_v30 = vld [vmem:[#allocation2 + $0x58] sm:$0xff]  }
 0x44d   :  { %9035 = vst [vmem:[#allocation52_spill] sm:$0xff] %v8142_v30 }
 0x44e   :  { %3719 = vmatpush2.bf16.msra.mxu0 %v8105_v23  ;;  %v8127_v23 = vld [vmem:[#allocation7 + $0x100] ss:$16 sps:$4 sm:$0xff]  }
 0x44f   :  { %3720 = vmatprep.subr.bf16.mxu0 %v8113_v22  ;;  %9031 = vst [vmem:[#allocation47_spill] sm:$0xff] %v8127_v23  ;;  %3682 = vmatpush2.bf16.msra.mxu1 %v8127_v23  ;;  %v8140_v22 = vld [vmem:[#allocation2 + $0x38] sm:$0xff]  }
 0x450   :  { %6324 = vmatprep.subr.msk.bf16.mxu1 %vm250_vm1, %v7881_v58  ;;  %9034 = vst [vmem:[#allocation51_spill] sm:$0xff] %v8140_v22  ;;  %v4498_v26 = vunpack.c.l.bf16 %v8140_v22  ;;  %v8147_v23 = vld [vmem:[#allocation2 + $0x78] sm:$0xff]  }
 0x451   :  { %9036 = vst [vmem:[#allocation53_spill] sm:$0xff] %v8147_v23  ;;  %v4500_v58 = vunpack.c.l.bf16 %v8147_v23 }
 0x452   :  { %3721 = vmatpush2.bf16.msra.mxu0 %v8117_v33  ;;  %v8138_v33 = vld [vmem:[#allocation2 + $0x18] sm:$0xff]   ;;  %v4534_v22 = vsel %vm101_vm0, %v4498_v26, 0.0 }
 0x453   :  { %3722 = vmatprep.subr.bf16.mxu0 %v8125_v24  ;;  %9033 = vst [vmem:[#allocation50_spill] sm:$0xff] %v8138_v33  ;;  %v4497_v10 = vunpack.c.l.bf16 %v8138_v33  ;;  %v4499_v24 = vunpack.c.l.bf16 %v8142_v30  ;;  %v4514_v33 = vcombine.high %v4498_v26, %v4498_v26  ;;  %v4516_v4 = vcombine.high %v4500_v58, %v4500_v58 }
 0x454   :  { %v4544_v23 = vsel %vm101_vm0, %v4500_v58, 0.0  ;;  %v4504_v58 = vunpack.c.l.bf16 %v8164_v9 }
 0x455   :  { %v4513_v2 = vcombine.high %v4497_v10, %v4497_v10  ;;  %v4529_v11 = vsel %vm101_vm0, %v4497_v10, 0.0  ;;  %v4515_v45 = vcombine.high %v4499_v24, %v4499_v24  ;;  %v4539_v30 = vsel %vm101_vm0, %v4499_v24, 0.0 }
 0x456   :  { %3723 = vmatpush2.bf16.msra.mxu0 %v8129_v46  ;;  %v8149_v46 = vld [vmem:[#allocation2 + $0x98] sm:$0xff]   ;;  %v4535_v56 = vsel %vm101_vm0, %v4514_v33, 0.0  ;;  %v4545_v26 = vsel %vm101_vm0, %v4516_v4, 0.0 }
 0x457   :  { %4387 = vmatprep.subr.bf16.mxu0 %v7889_v42  ;;  %9037 = vst [vmem:[#allocation54_spill] sm:$0xff] %v8149_v46  ;;  %v4501_v42 = vunpack.c.l.bf16 %v8149_v46  ;;  %v4530_v44 = vsel %vm101_vm0, %v4513_v2, 0.0  ;;  %v8162_v46 = vld [vmem:[#allocation2 + $0xd8] sm:$0xff]   ;;  %v4536_v10 = vadd.f32 %v4535_v56, %v4534_v22  ;;  %v4540_v0 = vsel %vm101_vm0, %v4515_v45, 0.0 }
 0x458   :  { %9039 = vst [vmem:[#allocation56_spill] sm:$0xff] %v8162_v46  ;;  %v4531_v47 = vadd.f32 %v4530_v44, %v4529_v11  ;;  %v4541_v24 = vadd.f32 %v4540_v0, %v4539_v30  ;;  %v4546_v2 = vadd.f32 %v4545_v26, %v4544_v23  ;;  %v4503_v33 = vunpack.c.l.bf16 %v8162_v46 }
 0x459   :  { %v4517_v52 = vcombine.high %v4501_v42, %v4501_v42  ;;  %4537 = vadd.xlane.f32.xlu1 %v4536_v10  ;;  %v4549_v60 = vsel %vm101_vm0, %v4501_v42, 0.0  ;;  %v4554_v44 = vsel %vm101_vm0, %v4502_v48, 0.0  ;;  %v4555_v56 = vsel %vm101_vm0, %v4518_v29, 0.0  ;;  %v3797_v29 = vpop.xlane.xlu0 %3796  ;;  %v3802_v42 = vpop.xlane.xlu1 %3801 }
 0x45a   :  { %4532 = vadd.xlane.f32.xlu0 %v4531_v47  ;;  %v4519_v45 = vcombine.high %v4503_v33, %v4503_v33  ;;  %v4520_v11 = vcombine.high %v4504_v58, %v4504_v58  ;;  %v4556_v4 = vadd.f32 %v4555_v56, %v4554_v44  ;;  %v4559_v0 = vsel %vm101_vm0, %v4503_v33, 0.0 }
 0x45b   :  { %v4550_v12 = vsel %vm101_vm0, %v4517_v52, 0.0  ;;  %v4564_v30 = vsel %vm101_vm0, %v4504_v58, 0.0  ;;  %v3833_v10 = vmul.f32 0.00390625, %v3797_v29  ;;  %v3834_v26 = vmul.f32 0.00390625, %v3802_v42 }
 0x45c   :  { %v4551_v47 = vadd.f32 %v4550_v12, %v4549_v60  ;;  %v4560_v22 = vsel %vm101_vm0, %v4519_v45, 0.0  ;;  %v4565_v23 = vsel %vm101_vm0, %v4520_v11, 0.0 }
 0x45d   :  { %4547 = vadd.xlane.f32.xlu1 %v4546_v2  ;;  %v4561_v52 = vadd.f32 %v4560_v22, %v4559_v0  ;;  %v4566_v48 = vadd.f32 %v4565_v23, %v4564_v30  ;;  %v3807_v12 = vpop.xlane.xlu0 %3806  ;;  %v3812_v60 = vpop.xlane.xlu1 %3811  ;;  %v3842_v2 = vpack.c.bf16 %v3834_v26, %v3834_v26  ;;  %v2573_v0 = vld [vmem:[%s8654_s4] sm:$0xf] }
 0x45e   :  { %4542 = vadd.xlane.f32.xlu0 %v4541_v24  ;;  %v3841_v24 = vpack.c.bf16 %v3833_v10, %v3833_v10  ;;  %v3835_v33 = vmul.f32 0.00390625, %v3807_v12  ;;  %v3836_v44 = vmul.f32 0.00390625, %v3812_v60  ;;  %v2578_v29 = vrot.slane %v2573_v0, %v8905_v21 }
 0x45f   :  { %v3871_v45 = vunpack.c.l.b16 %v3842_v2  ;;  %v2586_v42 = vrot.slane %v2573_v0, %v8995_v37  ;;  %v2582_v10 = vrot.slane %v2573_v0, %v8906_v25  ;;  %v2590_v26 = vrot.slane %v2573_v0, %v8996_v43  ;;  %v3114_v37 = vld [vmem:[%s8652_s2] sm:$0x3] }
 0x460   :  { %v3870_v58 = vunpack.c.l.b16 %v3841_v24  ;;  %v3843_v11 = vpack.c.bf16 %v3835_v33, %v3835_v33  ;;  %v3119_v39 = vrot.slane %v3114_v37, %v8905_v21 }
 0x461   :  { %4557 = vadd.xlane.f32.xlu1 %v4556_v4  ;;  %v3817_v56 = vpop.xlane.xlu0 %3816  ;;  %v3844_v4 = vpack.c.bf16 %v3836_v44, %v3836_v44  ;;  %v3885_v23 = vrot.slane %v3871_v45, %v7219_v14 }
 0x462   :  { %4552 = vadd.xlane.f32.xlu0 %v4551_v47  ;;  %v3822_v47 = vpop.xlane.xlu1 %3821  ;;  %v3837_v22 = vmul.f32 0.00390625, %v3817_v56  ;;  %v3881_v30 = vrot.slane %v3870_v58, %v7219_v14 }
 0x463   :  { %v3873_v60 = vunpack.c.l.b16 %v3844_v4 }
 0x464   :  { %v3845_v33 = vpack.c.bf16 %v3837_v22, %v3837_v22  ;;  %v3910_v56 = vsel %vm222_vm2, %v3885_v23, %v3881_v30 }
 0x465   :  { %4567 = vadd.xlane.f32.xlu1 %v4566_v48  ;;  %v3838_v48 = vmul.f32 0.00390625, %v3822_v47  ;;  %v3827_v12 = vpop.xlane.xlu0 %3826  ;;  %v3893_v7 = vrot.slane %v3873_v60, %v7219_v14 }
 0x466   :  { %4562 = vadd.xlane.f32.xlu0 %v4561_v52  ;;  %v3872_v52 = vunpack.c.l.b16 %v3843_v11  ;;  %v3832_v44 = vpop.xlane.xlu1 %3831  ;;  %v3839_v9 = vmul.f32 0.00390625, %v3827_v12  ;;  %v3874_v22 = vunpack.c.l.b16 %v3845_v33 }
 0x467   :  { %v3846_v47 = vpack.c.bf16 %v3838_v48, %v3838_v48 }
 0x468   :  { %v3889_v58 = vrot.slane %v3872_v52, %v7219_v14  ;;  %v3840_v52 = vmul.f32 0.00390625, %v3832_v44  ;;  %v3847_v35 = vpack.c.bf16 %v3839_v9, %v3839_v9 }
 0x46a   :  { %v3911_v48 = vsel %vm224_vm3, %v3889_v58, %v3910_v56 }
 0x4d1   :  { %v2949_v24 = vpop.f32.mrf.mxu0  ;;  %v2990_v2 = vpop.f32.mrf.mxu1 }
 0x4d2   :  { %v2950_v46 = vadd.f32 %v2949_v24, %v2578_v29  ;;  %v2991_v0 = vadd.f32 %v2990_v2, %v2586_v42  ;;  %v3875_v29 = vunpack.c.l.b16 %v3846_v47  ;;  %v3123_v42 = vrot.slane %v3114_v37, %v8906_v25 }
 0x4d3   :  { %v2951_v45 = vpop.f32.mrf.mxu0  ;;  %v2992_v11 = vpop.f32.mrf.mxu1 }
 0x4d4   :  { %v2952_v43 = vadd.f32 %v2951_v45, %v2582_v10  ;;  %v2993_v4 = vadd.f32 %v2992_v11, %v2590_v26  ;;  %v3897_v10 = vrot.slane %v3874_v22, %v7219_v14  ;;  %v3901_v24 = vrot.slane %v3875_v29, %v7219_v14  ;;  %v9070_v22 = vld [vmem:[#allocation48_spill] sm:$0xff]  ;;  %v9076_v29 = vld [vmem:[#allocation49_spill] sm:$0xff] }
 0x4d5   :  { %v2953_v34 = vpop.f32.mrf.mxu0  ;;  %v2994_v40 = vpop.f32.mrf.mxu1 }
 0x4d6   :  { %v6536_v30 = vpack.c.bf16 %v2952_v43, %v2950_v46  ;;  %v6537_v23 = vpack.c.bf16 %v2993_v4, %v2991_v0  ;;  %v3912_v40 = vsel %vm226_vm4, %v3893_v7, %v3911_v48  ;;  %v3848_v43 = vpack.c.bf16 %v3840_v52, %v3840_v52  ;;  %v9069_v4 = vld [vmem:[#allocation42_spill] sm:$0xff]  ;;  %v9073_v52 = vld [vmem:[#allocation47_spill] sm:$0xff]  ;;  %v9074_v48 = vld [vmem:[#allocation44_spill] sm:$0xff] }
 0x4d7   :  { %v2954_v12 = vpop.f32.mrf.mxu0  ;;  %v2995_v36 = vpop.f32.mrf.mxu1  ;;  %v3876_v46 = vunpack.c.l.b16 %v3847_v35 }
 0x4d8   :  { %3014 = vst [vmem:[#allocation8 + $0x30] sm:$0xff] %v6536_v30  ;;  %3015 = vst [vmem:[#allocation8 + $0x38] sm:$0xff] %v6537_v23  ;;  %v3913_v36 = vsel %vm228_vm5, %v3897_v10, %v3912_v40  ;;  %v3877_v44 = vunpack.c.l.b16 %v3848_v43  ;;  %v9071_v30 = vld [vmem:[#allocation40_spill] sm:$0xff]  ;;  %v9072_v23 = vld [vmem:[#allocation19_spill] sm:$0xff] }
 0x4d9   :  { %v3234_v26 = vpop.f32.mrf.mxu0  ;;  %v3905_v37 = vrot.slane %v3876_v46, %v7219_v14  ;;  %v3914_v45 = vsel %vm230_vm6, %v3901_v24, %v3913_v36  ;;  %v9075_v12 = vld [vmem:[#allocation46_spill] sm:$0xff]  ;;  %v9078_v43 = vld [vmem:[#allocation51_spill] sm:$0xff]  ;;  %v9079_v46 = vld [vmem:[#allocation52_spill] sm:$0xff] }
 0x4da   :  { %v3235_v34 = vadd.f32 %v3234_v26, %v3119_v39  ;;  %v3909_v39 = vrot.slane %v3877_v44, %v7219_v14  ;;  %v9077_v26 = vld [vmem:[#allocation50_spill] sm:$0xff]  ;;  %v9080_v24 = vld [vmem:[#allocation53_spill] sm:$0xff]  ;;  %v9082_v44 = vld [vmem:[#allocation55_spill] sm:$0xff] }
 0x4db   :  { %v3236_v60 = vpop.f32.mrf.mxu0  ;;  %v3915_v35 = vsel %vm232_vm7, %v3905_v37, %v3914_v45  ;;  %v5233_v40 = vunpack.c.h.bf16 %v9077_v26  ;;  %v8283_v36 = vld [vmem:[#allocation7 + $0xe4] ss:$16 sps:$4 sm:$0xff]  }
 0x4dc   :  { %v3237_v2 = vadd.f32 %v3236_v60, %v3123_v42  ;;  %v3241_v9 = vmax.f32 %v3235_v34, 0.0  ;;  %v3916_v47 = vsel %vm234_vm8, %v3909_v39, %v3915_v35  ;;  %v8271_v42 = vld.sshfl [vmem:[#allocation5] sm:$0x33 pattern:$0x76325410]  ;;  %v5234_v34 = vunpack.c.h.bf16 %v9078_v43  ;;  %v9083_v37 = vld [vmem:[#allocation56_spill] sm:$0xff] }
 0x4dd   :  { %v3238_v33 = vpop.f32.mrf.mxu0  ;;  %v3917_v0 = vpack.c.b16 %v3916_v47, %v3916_v47  ;;  %v8275_v10 = vcombine.high %v8271_v42, %v8271_v42  ;;  %v5235_v60 = vunpack.c.h.bf16 %v9079_v46  ;;  %v5249_v45 = vcombine.high %v5233_v40, %v5233_v40 }
 0x4de   :  { %v3242_v56 = vmax.f32 %v3237_v2, 0.0  ;;  %v3243_v7 = vpack.c.bf16 %v3241_v9, %v3241_v9  ;;  %v5236_v2 = vunpack.c.h.bf16 %v9080_v24  ;;  %v9081_v9 = vld [vmem:[#allocation54_spill] sm:$0xff]  ;;  %v5270_v39 = vsel %vm101_vm0, %v5234_v34, 0.0 }
 0x4df   :  { %v3239_v58 = vpop.f32.mrf.mxu0  ;;  %v5237_v33 = vunpack.c.h.bf16 %v9081_v9  ;;  %v5251_v35 = vcombine.high %v5235_v60, %v5235_v60  ;;  %v5275_v47 = vsel %vm101_vm0, %v5235_v60, 0.0 }
 0x4e0   :  { %v3244_v11 = vpack.c.bf16 %v3242_v56, %v3242_v56  ;;  %v5238_v56 = vunpack.c.h.bf16 %v9082_v44  ;;  %v5239_v58 = vunpack.c.h.bf16 %v9083_v37 }
 0x4e2   :  { %3683 = vmatprep.mubr.bf16.mxu1 %v3244_v11  ;;  %3724 = vmatprep.mubr.bf16.mxu0 %v3244_v11  ;;  %v5265_v11 = vsel %vm101_vm0, %v5233_v40, 0.0 }
 0x4e3   :  { %3684 = vmatmul.mubr.bf16.vlgmr.msra.gmra.mxu1 %v3243_v7  ;;  %3725 = vmatmul.mubr.bf16.vlgmr.msra.gmra.mxu0 %v3243_v7  ;;  %v5250_v7 = vcombine.high %v5234_v34, %v5234_v34 }
 0x4e4   :  { %3951 = vmatpush1.bf16.msra.mxu1 %v7938_v3  ;;  %3968 = vmatprep.mubr.bf16.mxu1 %v8867_v13  ;;  %v9041_v3 = vld [vmem:[#allocation12_spill] sm:$0xff] }
 0x4e5   :  { %4388 = vmatpush1.bf16.msra.mxu0 %v7940_v32  ;;  %4428 = vmatprep.subr.bf16.mxu1 %v7942_v38  ;;  %v9042_v32 = vld [vmem:[#allocation13_spill] sm:$0xff]  ;;  %v9043_v38 = vld [vmem:[#allocation22_spill] sm:$0xff] }
 0x4e6   :  { %4389 = vmatprep.subr.bf16.mxu0 %v7945_v41  ;;  %v9044_v41 = vld [vmem:[#allocation23_spill] sm:$0xff] }
 0x4e9   :  { %4390 = vmatpush1.bf16.msra.mxu0 %v7952_v5  ;;  %v9045_v5 = vld [vmem:[#allocation14_spill] sm:$0xff] }
 0x4ea   :  { %4391 = vmatprep.subr.bf16.mxu0 %v7956_v54  ;;  %v9046_v54 = vld [vmem:[#allocation15_spill] sm:$0xff] }
 0x4eb   :  { %6325 = vmatmul.mubr.msk.bf16.vlgmr.msra.gmra.mxu1 %vm246_vm9, %v3917_v0  ;;  %v5252_v0 = vcombine.high %v5236_v2, %v5236_v2 }
 0x4ec   :  { %4429 = vmatpush1.bf16.msra.mxu1 %v7958_v15  ;;  %v9047_v15 = vld [vmem:[#allocation24_spill] sm:$0xff] }
 0x4ed   :  { %4430 = vmatprep.subr.bf16.mxu1 %v7961_v53  ;;  %4392 = vmatpush1.bf16.msra.mxu0 %v7963_v31  ;;  %v9048_v53 = vld [vmem:[#allocation25_spill] sm:$0xff]  ;;  %v9049_v31 = vld [vmem:[#allocation16_spill] sm:$0xff] }
 0x4ee   :  { %4393 = vmatprep.subr.bf16.mxu0 %v7966_v19  ;;  %v9050_v19 = vld [vmem:[#allocation17_spill] sm:$0xff] }
 0x4f0   :  { %4431 = vmatpush1.bf16.msra.mxu1 %v7970_v8  ;;  %v9051_v8 = vld [vmem:[#allocation26_spill] sm:$0xff] }
 0x4f1   :  { %4432 = vmatprep.subr.bf16.mxu1 %v7974_v20  ;;  %4394 = vmatpush1.bf16.msra.mxu0 %v7976_v51  ;;  %v9052_v20 = vld [vmem:[#allocation27_spill] sm:$0xff]  ;;  %v9053_v51 = vld [vmem:[#allocation18_spill] sm:$0xff] }
 0x4f2   :  { %4395 = vmatprep.subr.bf16.mxu0 %v7979_v55  ;;  %v9054_v55 = vld [vmem:[#allocation31_spill] sm:$0xff] }
 0x4f4   :  { %4433 = vmatpush1.bf16.msra.mxu1 %v7982_v49  ;;  %v9055_v49 = vld [vmem:[#allocation28_spill] sm:$0xff] }
 0x4f5   :  { %4434 = vmatprep.subr.bf16.mxu1 %v7986_v17  ;;  %4396 = vmatpush1.bf16.msra.mxu0 %v7988_v59  ;;  %v9056_v17 = vld [vmem:[#allocation29_spill] sm:$0xff] }
 0x4f6   :  { %4397 = vmatprep.subr.bf16.mxu0 %v7991_v6  ;;  %v9057_v59 = vld [vmem:[#allocation33_spill] sm:$0xff]  ;;  %v9058_v6 = vld [vmem:[#allocation36_spill] sm:$0xff] }
 0x4f8   :  { %4435 = vmatpush1.bf16.msra.mxu1 %v7994_v63  ;;  %v9059_v63 = vld [vmem:[#allocation37_spill] sm:$0xff] }
 0x4f9   :  { %4436 = vmatprep.subr.bf16.mxu1 %v7998_v50  ;;  %4398 = vmatpush1.bf16.msra.mxu0 %v8000_v57  ;;  %v9060_v50 = vld [vmem:[#allocation35_spill] sm:$0xff]  ;;  %v9061_v57 = vld [vmem:[#allocation32_spill] sm:$0xff] }
 0x4fa   :  { %4399 = vmatprep.subr.bf16.mxu0 %v8003_v61  ;;  %v9062_v61 = vld [vmem:[#allocation41_spill] sm:$0xff] }
 0x4fc   :  { %4437 = vmatpush1.bf16.msra.mxu1 %v8006_v62  ;;  %v9063_v62 = vld [vmem:[#allocation30_spill] sm:$0xff] }
 0x4fd   :  { %4438 = vmatprep.subr.bf16.mxu1 %v8010_v1  ;;  %4400 = vmatpush1.bf16.msra.mxu0 %v8012_v16  ;;  %v9064_v1 = vld [vmem:[#allocation39_spill] sm:$0xff]  ;;  %v9065_v16 = vld [vmem:[#allocation38_spill] sm:$0xff] }
 0x4fe   :  { %4401 = vmatprep.subr.bf16.mxu0 %v8015_v18  ;;  %v9066_v18 = vld [vmem:[#allocation45_spill] sm:$0xff] }
 0x500   :  { %4439 = vmatpush1.bf16.msra.mxu1 %v8018_v27  ;;  %v9067_v27 = vld [vmem:[#allocation34_spill] sm:$0xff] }
 0x501   :  { %4440 = vmatprep.subr.bf16.mxu1 %v8022_v28  ;;  %4402 = vmatpush1.bf16.msra.mxu0 %v9041_v3  ;;  %v9068_v28 = vld [vmem:[#allocation43_spill] sm:$0xff]  ;;  %v9084_v3 = vld [vmem:[#allocation57_spill] sm:$0xff] }
 0x502   :  { %4403 = vmatprep.subr.bf16.mxu0 %v9042_v32  ;;  %v5240_v32 = vunpack.c.h.bf16 %v9084_v3 }
 0x504   :  { %4441 = vmatpush1.bf16.msra.mxu1 %v9043_v38  ;;  %v5266_v38 = vsel %vm101_vm0, %v5249_v45, 0.0  ;;  %v9085_v45 = vld [vmem:[#allocation20_spill] sm:$0xff] }
 0x505   :  { %4442 = vmatprep.subr.bf16.mxu1 %v9044_v41  ;;  %4404 = vmatpush2.bf16.msra.mxu0 %v9045_v5  ;;  %v5271_v41 = vsel %vm101_vm0, %v5250_v7, 0.0  ;;  %v5280_v5 = vsel %vm101_vm0, %v5236_v2, 0.0  ;;  %v3309_v2 = vld [vmem:[%s8654_s4] sm:$0xf] }
 0x506   :  { %4405 = vmatprep.subr.bf16.mxu0 %v9046_v54  ;;  %v5253_v54 = vcombine.high %v5237_v33, %v5237_v33  ;;  %v3318_v7 = vrot.slane %v3309_v2, %v8906_v25 }
 0x508   :  { %4443 = vmatpush1.bf16.msra.mxu1 %v9047_v15  ;;  %v5267_v15 = vadd.f32 %v5266_v38, %v5265_v11  ;;  %v3322_v11 = vrot.slane %v3309_v2, %v9085_v45 }
 0x509   :  { %4444 = vmatprep.subr.bf16.mxu1 %v9048_v53  ;;  %4406 = vmatpush2.bf16.msra.mxu0 %v9049_v31  ;;  %v5272_v53 = vadd.f32 %v5271_v41, %v5270_v39  ;;  %v5276_v31 = vsel %vm101_vm0, %v5251_v35, 0.0  ;;  %v9086_v39 = vld [vmem:[#allocation21_spill] sm:$0xff] }
 0x50a   :  { %4407 = vmatprep.subr.bf16.mxu0 %v9050_v19  ;;  %v5281_v19 = vsel %vm101_vm0, %v5252_v0, 0.0  ;;  %5268 = vadd.xlane.f32.xlu0 %v5267_v15  ;;  %v3326_v35 = vrot.slane %v3309_v2, %v9086_v39 }
 0x50b   :  { %5273 = vadd.xlane.f32.xlu1 %v5272_v53 }
 0x50c   :  { %4445 = vmatpush2.bf16.msra.mxu1 %v9051_v8  ;;  %v5254_v8 = vcombine.high %v5238_v56, %v5238_v56 }
 0x50d   :  { %4446 = vmatprep.subr.bf16.mxu1 %v9052_v20  ;;  %4408 = vmatpush2.bf16.msra.mxu0 %v9053_v51  ;;  %v5277_v20 = vadd.f32 %v5276_v31, %v5275_v47  ;;  %v5282_v51 = vadd.f32 %v5281_v19, %v5280_v5 }
 0x50e   :  { %4409 = vmatprep.subr.bf16.mxu0 %v9054_v55  ;;  %v5285_v55 = vsel %vm101_vm0, %v5237_v33, 0.0 }
 0x50f   :  { %5278 = vadd.xlane.f32.xlu0 %v5277_v20  ;;  %5283 = vadd.xlane.f32.xlu1 %v5282_v51 }
 0x510   :  { %4447 = vmatpush2.bf16.msra.mxu1 %v9055_v49  ;;  %v5286_v49 = vsel %vm101_vm0, %v5253_v54, 0.0 }
 0x511   :  { %4448 = vmatprep.subr.bf16.mxu1 %v9056_v17  ;;  %4410 = vmatpush2.bf16.msra.mxu0 %v9057_v59  ;;  %v5290_v17 = vsel %vm101_vm0, %v5238_v56, 0.0  ;;  %v5291_v59 = vsel %vm101_vm0, %v5254_v8, 0.0  ;;  %v3850_v8 = vld [vmem:[%s8652_s2] sm:$0x3] }
 0x512   :  { %4411 = vmatprep.subr.bf16.mxu0 %v9058_v6  ;;  %v5255_v6 = vcombine.high %v5239_v58, %v5239_v58 }
 0x514   :  { %4449 = vmatpush2.bf16.msra.mxu1 %v9059_v63  ;;  %v5256_v63 = vcombine.high %v5240_v32, %v5240_v32 }
 0x515   :  { %4450 = vmatprep.subr.bf16.mxu1 %v9060_v50  ;;  %4412 = vmatpush2.bf16.msra.mxu0 %v9061_v57  ;;  %v5287_v50 = vadd.f32 %v5286_v49, %v5285_v55  ;;  %v5292_v57 = vadd.f32 %v5291_v59, %v5290_v17 }
 0x516   :  { %4413 = vmatprep.subr.bf16.mxu0 %v9062_v61  ;;  %v5295_v61 = vsel %vm101_vm0, %v5239_v58, 0.0  ;;  %v3314_v58 = vrot.slane %v3309_v2, %v8905_v21 }
 0x517   :  { %5288 = vadd.xlane.f32.xlu0 %v5287_v50  ;;  %5293 = vadd.xlane.f32.xlu1 %v5292_v57 }
 0x518   :  { %4451 = vmatpush2.bf16.msra.mxu1 %v9063_v62  ;;  %v5296_v62 = vsel %vm101_vm0, %v5255_v6, 0.0 }
 0x519   :  { %4452 = vmatprep.subr.bf16.mxu1 %v9064_v1  ;;  %4414 = vmatpush2.bf16.msra.mxu0 %v9065_v16  ;;  %v5300_v1 = vsel %vm101_vm0, %v5240_v32, 0.0  ;;  %v5301_v16 = vsel %vm101_vm0, %v5256_v63, 0.0 }
 0x51a   :  { %4415 = vmatprep.subr.bf16.mxu0 %v9066_v18  ;;  %v5297_v18 = vadd.f32 %v5296_v62, %v5295_v61  ;;  %v3855_v62 = vrot.slane %v3850_v8, %v8905_v21 }
 0x51c   :  { %4453 = vmatpush2.bf16.msra.mxu1 %v9067_v27  ;;  %v5302_v27 = vadd.f32 %v5301_v16, %v5300_v1  ;;  %5298 = vadd.xlane.f32.xlu0 %v5297_v18 }
 0x51d   :  { %4454 = vmatprep.subr.bf16.mxu1 %v9068_v28  ;;  %4416 = vmatpush2.bf16.msra.mxu0 %v9069_v4  ;;  %v4533_v28 = vpop.xlane.xlu0 %4532  ;;  %v4538_v4 = vpop.xlane.xlu1 %4537 }
 0x51e   :  { %4417 = vmatprep.subr.bf16.mxu0 %v9070_v22  ;;  %5303 = vadd.xlane.f32.xlu1 %v5302_v27  ;;  %v4569_v22 = vmul.f32 0.00390625, %v4533_v28 }
 0x520   :  { %4455 = vmatpush2.bf16.msra.mxu1 %v9071_v30  ;;  %v4570_v30 = vmul.f32 0.00390625, %v4538_v4  ;;  %v3859_v4 = vrot.slane %v3850_v8, %v8906_v25  ;;  %v8376_v8 = vld [vmem:[#allocation7 + $0xa8] ss:$16 sps:$4 sm:$0xff]  }
 0x521   :  { %4456 = vmatprep.subr.bf16.mxu1 %v9072_v23  ;;  %4418 = vmatpush2.bf16.msra.mxu0 %v9073_v52  ;;  %v4543_v23 = vpop.xlane.xlu0 %4542  ;;  %v4548_v52 = vpop.xlane.xlu1 %4547 }
 0x522   :  { %6393 = vmatprep.subr.msk.bf16.mxu0 %vm250_vm1, %v8275_v10  ;;  %v4572_v26 = vmul.f32 0.00390625, %v4548_v52 }
 0x524   :  { %4457 = vmatpush2.bf16.msra.mxu1 %v9074_v48  ;;  %v4577_v48 = vpack.c.bf16 %v4569_v22, %v4569_v22  ;;  %v4580_v24 = vpack.c.bf16 %v4572_v26, %v4572_v26 }
 0x525   :  { %4458 = vmatprep.subr.bf16.mxu1 %v9075_v12  ;;  %v4578_v12 = vpack.c.bf16 %v4570_v30, %v4570_v30  ;;  %v4553_v40 = vpop.xlane.xlu0 %4552  ;;  %v4558_v60 = vpop.xlane.xlu1 %4557 }
 0x526   :  { %v4606_v43 = vunpack.c.l.b16 %v4577_v48  ;;  %v4573_v9 = vmul.f32 0.00390625, %v4553_v40  ;;  %v4574_v37 = vmul.f32 0.00390625, %v4558_v60  ;;  %v4609_v0 = vunpack.c.l.b16 %v4580_v24 }
 0x527   :  { %v4607_v34 = vunpack.c.l.b16 %v4578_v12 }
 0x528   :  { %4459 = vmatpush2.bf16.msra.mxu1 %v9076_v29  ;;  %v4571_v29 = vmul.f32 0.00390625, %v4543_v23  ;;  %v4617_v33 = vrot.slane %v4606_v43, %v7219_v14  ;;  %v4581_v38 = vpack.c.bf16 %v4573_v9, %v4573_v9  ;;  %v4582_v31 = vpack.c.bf16 %v4574_v37, %v4574_v37 }
 0x529   :  { %5123 = vmatprep.subr.bf16.mxu1 %v8283_v36  ;;  %v4621_v44 = vrot.slane %v4607_v34, %v7219_v14  ;;  %v4563_v47 = vpop.xlane.xlu0 %4562  ;;  %v4568_v41 = vpop.xlane.xlu1 %4567  ;;  %v4629_v17 = vrot.slane %v4609_v0, %v7219_v14  ;;  %v8332_v37 = vsel %vm250_vm1, %v8271_v42, 0  ;;  %v8346_v42 = vld [vmem:[#allocation7 + $0xc0] ss:$16 sps:$4 sm:$0xff]  }
 0x52a   :  { %v4579_v46 = vpack.c.bf16 %v4571_v29, %v4571_v29  ;;  %v4575_v19 = vmul.f32 0.00390625, %v4563_v47  ;;  %v4610_v59 = vunpack.c.l.b16 %v4581_v38  ;;  %v4576_v61 = vmul.f32 0.00390625, %v4568_v41  ;;  %v8355_v41 = vld [vmem:[#allocation7 + $0xcc] ss:$16 sps:$4 sm:$0xff]  }
 0x52b   :  { %v4646_v5 = vsel %vm222_vm2, %v4621_v44, %v4617_v33  ;;  %v4611_v28 = vunpack.c.l.b16 %v4582_v31  ;;  %v8370_v31 = vld [vmem:[#allocation7 + $0x80] ss:$16 sps:$4 sm:$0xff]  }
 0x52c   :  { %v4608_v56 = vunpack.c.l.b16 %v4579_v46  ;;  %v4583_v27 = vpack.c.bf16 %v4575_v19, %v4575_v19  ;;  %v4633_v22 = vrot.slane %v4610_v59, %v7219_v14  ;;  %v4584_v52 = vpack.c.bf16 %v4576_v61, %v4576_v61  ;;  %v8373_v19 = vld [vmem:[#allocation7 + $0x64] ss:$16 sps:$4 sm:$0xff]   ;;  %v8394_v59 = vld [vmem:[#allocation7 + $0x40] ss:$16 sps:$4 sm:$0xff]  }
 0x52d   :  { %v4637_v26 = vrot.slane %v4611_v28, %v7219_v14  ;;  %v8409_v61 = vld [vmem:[#allocation7 + $0x4] ss:$16 sps:$4 sm:$0xff]   ;;  %v8428_v28 = vld [vmem:[#allocation7 + $0xc] ss:$16 sps:$4 sm:$0xff]  }
 0x52e   :  { %v4625_v54 = vrot.slane %v4608_v56, %v7219_v14  ;;  %v4612_v12 = vunpack.c.l.b16 %v4583_v27  ;;  %v4613_v60 = vunpack.c.l.b16 %v4584_v52  ;;  %v8424_v27 = vld [vmem:[#allocation7 + $0x28] ss:$16 sps:$4 sm:$0xff]   ;;  %9090 = vst [vmem:[#allocation23_spill] sm:$0xff] %v8428_v28  ;;  %v8442_v52 = vld [vmem:[#allocation7 + $0x1c0] ss:$16 sps:$4 sm:$0xff]  }
 0x52f   :  { %9089 = vst [vmem:[#allocation22_spill] sm:$0xff] %v8424_v27  ;;  %9095 = vst [vmem:[#allocation16_spill] sm:$0xff] %v8442_v52 }
 0x530   :  { %v4647_v1 = vsel %vm224_vm3, %v4625_v54, %v4646_v5  ;;  %v4641_v2 = vrot.slane %v4612_v12, %v7219_v14  ;;  %v8357_v5 = vld [vmem:[#allocation7 + $0xa0] ss:$16 sps:$4 sm:$0xff]   ;;  %v8360_v54 = vld [vmem:[#allocation7 + $0x84] ss:$16 sps:$4 sm:$0xff]   ;;  %v8448_v12 = vld [vmem:[#allocation7 + $0x1e8] ss:$16 sps:$4 sm:$0xff]  }
 0x531   :  { %v4648_v23 = vsel %vm226_vm4, %v4629_v17, %v4647_v1  ;;  %v8392_v17 = vld [vmem:[#allocation7 + $0x6c] ss:$16 sps:$4 sm:$0xff]   ;;  %9097 = vst [vmem:[#allocation26_spill] sm:$0xff] %v8448_v12 }
 0x532   :  { %v4649_v43 = vsel %vm228_vm5, %v4633_v22, %v4648_v23  ;;  %v8416_v1 = vld [vmem:[#allocation7 + $0x2c] ss:$16 sps:$4 sm:$0xff]   ;;  %v8433_v22 = vld [vmem:[#allocation7 + $0x1c4] ss:$16 sps:$4 sm:$0xff]  }
 0x533   :  { %v4650_v33 = vsel %vm230_vm6, %v4637_v26, %v4649_v43  ;;  %9092 = vst [vmem:[#allocation15_spill] sm:$0xff] %v8433_v22  ;;  %v8440_v23 = vld [vmem:[#allocation7 + $0x1ec] ss:$16 sps:$4 sm:$0xff]   ;;  %v8454_v26 = vld [vmem:[#allocation7 + $0x1a0] ss:$16 sps:$4 sm:$0xff]  }
 0x534   :  { %v4651_v47 = vsel %vm232_vm7, %v4641_v2, %v4650_v33  ;;  %9094 = vst [vmem:[#allocation25_spill] sm:$0xff] %v8440_v23  ;;  %9099 = vst [vmem:[#allocation18_spill] sm:$0xff] %v8454_v26  ;;  %v8460_v43 = vld [vmem:[#allocation7 + $0x1c8] ss:$16 sps:$4 sm:$0xff]   ;;  %v8483_v33 = vld [vmem:[#allocation7 + $0x16c] ss:$16 sps:$4 sm:$0xff]  }
 0x535   :  { %9101 = vst [vmem:[#allocation28_spill] sm:$0xff] %v8460_v43  ;;  %v8477_v2 = vld [vmem:[#allocation7 + $0x188] ss:$16 sps:$4 sm:$0xff]   ;;  %9108 = vst [vmem:[#allocation41_spill] sm:$0xff] %v8483_v33 }
 0x536   :  { %9106 = vst [vmem:[#allocation35_spill] sm:$0xff] %v8477_v2 }
 0x5a3   :  { %v3685_v3 = vpop.f32.mrf.mxu1  ;;  %v3726_v32 = vpop.f32.mrf.mxu0 }
 0x5a4   :  { %v3686_v20 = vadd.f32 %v3685_v3, %v3314_v58  ;;  %v3727_v51 = vadd.f32 %v3726_v32, %v3322_v11  ;;  %v8334_v58 = vld [vmem:[#allocation7 + $0xe0] ss:$16 sps:$4 sm:$0xff]   ;;  %v8336_v11 = vld [vmem:[#allocation7 + $0xec] ss:$16 sps:$4 sm:$0xff]   ;;  %v8350_v3 = vld [vmem:[#allocation7 + $0xa4] ss:$16 sps:$4 sm:$0xff]  }
 0x5a5   :  { %v3687_v15 = vpop.f32.mrf.mxu1  ;;  %v3728_v53 = vpop.f32.mrf.mxu0  ;;  %v8352_v32 = vld [vmem:[#allocation7 + $0xe8] ss:$16 sps:$4 sm:$0xff]  }
 0x5a6   :  { %v3688_v55 = vadd.f32 %v3687_v15, %v3318_v7  ;;  %v3729_v49 = vadd.f32 %v3728_v53, %v3326_v35  ;;  %v4645_v7 = vrot.slane %v4613_v60, %v7219_v14  ;;  %v8339_v35 = vld [vmem:[#allocation7 + $0xc4] ss:$16 sps:$4 sm:$0xff]   ;;  %v8364_v15 = vld [vmem:[#allocation7 + $0xc8] ss:$16 sps:$4 sm:$0xff]   ;;  %v8368_v53 = vld [vmem:[#allocation7 + $0xac] ss:$16 sps:$4 sm:$0xff]  }
 0x5a7   :  { %v3689_v6 = vpop.f32.mrf.mxu1  ;;  %v3730_v63 = vpop.f32.mrf.mxu0  ;;  %v8470_v60 = vld [vmem:[#allocation7 + $0x1a8] ss:$16 sps:$4 sm:$0xff]  }
 0x5a8   :  { %v6538_v50 = vpack.c.bf16 %v3688_v55, %v3686_v20  ;;  %v6539_v57 = vpack.c.bf16 %v3729_v49, %v3727_v51  ;;  %v4652_v0 = vsel %vm234_vm8, %v4645_v7, %v4651_v47  ;;  %v8380_v20 = vld [vmem:[#allocation7 + $0x8c] ss:$16 sps:$4 sm:$0xff]   ;;  %v8382_v51 = vld [vmem:[#allocation7 + $0x60] ss:$16 sps:$4 sm:$0xff]   ;;  %v8385_v55 = vld [vmem:[#allocation7 + $0x44] ss:$16 sps:$4 sm:$0xff]  }
 0x5a9   :  { %v3690_v16 = vpop.f32.mrf.mxu1  ;;  %v3731_v18 = vpop.f32.mrf.mxu0  ;;  %v4653_v38 = vpack.c.b16 %v4652_v0, %v4652_v0  ;;  %v8388_v49 = vld [vmem:[#allocation7 + $0x88] ss:$16 sps:$4 sm:$0xff]   ;;  %v8397_v6 = vld [vmem:[#allocation7 + $0x24] ss:$16 sps:$4 sm:$0xff]   ;;  %9104 = vst [vmem:[#allocation36_spill] sm:$0xff] %v8470_v60 }
 0x5aa   :  { %3750 = vst [vmem:[#allocation8 + $0x40] sm:$0xff] %v6538_v50  ;;  %3751 = vst [vmem:[#allocation8 + $0x48] sm:$0xff] %v6539_v57  ;;  %v8400_v63 = vld [vmem:[#allocation7 + $0x68] ss:$16 sps:$4 sm:$0xff]   ;;  %v8404_v50 = vld [vmem:[#allocation7 + $0x4c] ss:$16 sps:$4 sm:$0xff]  }
 0x5ab   :  { %v3970_v30 = vpop.f32.mrf.mxu1  ;;  %v8406_v57 = vld [vmem:[#allocation7 + $0x20] ss:$16 sps:$4 sm:$0xff]   ;;  %v8421_v18 = vld [vmem:[#allocation7 + $0x1e4] ss:$16 sps:$4 sm:$0xff]   ;;  %v8495_v47 = vld [vmem:[#allocation7 + $0x14c] ss:$16 sps:$4 sm:$0xff]  }
 0x5ac   :  { %v3971_v48 = vadd.f32 %v3970_v30, %v3855_v62  ;;  %v8412_v62 = vld [vmem:[#allocation7 + $0x48] ss:$16 sps:$4 sm:$0xff]   ;;  %v8418_v16 = vld [vmem:[#allocation7] ss:$16 sps:$4 sm:$0xff]   ;;  %9088 = vst [vmem:[#allocation13_spill] sm:$0xff] %v8421_v18  ;;  %9112 = vst [vmem:[#allocation45_spill] sm:$0xff] %v8495_v47 }
 0x5ad   :  { %v3972_v29 = vpop.f32.mrf.mxu1  ;;  %9087 = vst [vmem:[#allocation12_spill] sm:$0xff] %v8418_v16  ;;  %v8436_v30 = vld [vmem:[#allocation7 + $0x8] ss:$16 sps:$4 sm:$0xff]   ;;  %v8493_v7 = vld [vmem:[#allocation7 + $0x144] ss:$16 sps:$4 sm:$0xff]  }
 0x5ae   :  { %v3973_v40 = vadd.f32 %v3972_v29, %v3859_v4  ;;  %v3977_v34 = vmax.f32 %v3971_v48, 0.0  ;;  %v8430_v4 = vld [vmem:[#allocation7 + $0x1e0] ss:$16 sps:$4 sm:$0xff]   ;;  %9093 = vst [vmem:[#allocation24_spill] sm:$0xff] %v8436_v30  ;;  %v8445_v48 = vld [vmem:[#allocation7 + $0x1a4] ss:$16 sps:$4 sm:$0xff]  }
 0x5af   :  { %v3974_v46 = vpop.f32.mrf.mxu1  ;;  %9091 = vst [vmem:[#allocation14_spill] sm:$0xff] %v8430_v4  ;;  %9096 = vst [vmem:[#allocation17_spill] sm:$0xff] %v8445_v48  ;;  %v8452_v29 = vld [vmem:[#allocation7 + $0x1cc] ss:$16 sps:$4 sm:$0xff]   ;;  %v8497_v0 = vld [vmem:[#allocation7 + $0x140] ss:$16 sps:$4 sm:$0xff]  }
 0x5b0   :  { %v3978_v24 = vmax.f32 %v3973_v40, 0.0  ;;  %v3979_v56 = vpack.c.bf16 %v3977_v34, %v3977_v34  ;;  %9098 = vst [vmem:[#allocation27_spill] sm:$0xff] %v8452_v29  ;;  %v8457_v40 = vld [vmem:[#allocation7 + $0x184] ss:$16 sps:$4 sm:$0xff]   ;;  %v8464_v34 = vld [vmem:[#allocation7 + $0x1ac] ss:$16 sps:$4 sm:$0xff]  }
 0x5b1   :  { %v3975_v9 = vpop.f32.mrf.mxu1  ;;  %9100 = vst [vmem:[#allocation31_spill] sm:$0xff] %v8457_v40  ;;  %9102 = vst [vmem:[#allocation29_spill] sm:$0xff] %v8464_v34  ;;  %v8466_v46 = vld [vmem:[#allocation7 + $0x180] ss:$16 sps:$4 sm:$0xff]  }
 0x5b2   :  { %v3980_v44 = vpack.c.bf16 %v3978_v24, %v3978_v24  ;;  %9103 = vst [vmem:[#allocation33_spill] sm:$0xff] %v8466_v46  ;;  %v8474_v24 = vld [vmem:[#allocation7 + $0x18c] ss:$16 sps:$4 sm:$0xff]   ;;  %v8481_v9 = vld [vmem:[#allocation7 + $0x164] ss:$16 sps:$4 sm:$0xff]   ;;  %9111 = vst [vmem:[#allocation38_spill] sm:$0xff] %v8493_v7 }
 0x5b3   :  { %9105 = vst [vmem:[#allocation37_spill] sm:$0xff] %v8474_v24  ;;  %9107 = vst [vmem:[#allocation32_spill] sm:$0xff] %v8481_v9 }
 0x5b4   :  { %4419 = vmatprep.mubr.bf16.mxu0 %v3980_v44  ;;  %4460 = vmatprep.mubr.bf16.mxu1 %v3980_v44  ;;  %v8485_v44 = vld [vmem:[#allocation7 + $0x160] ss:$16 sps:$4 sm:$0xff]   ;;  %9113 = vst [vmem:[#allocation34_spill] sm:$0xff] %v8497_v0 }
 0x5b5   :  { %4420 = vmatmul.mubr.bf16.vlgmr.msra.gmra.mxu0 %v3979_v56  ;;  %4461 = vmatmul.mubr.bf16.vlgmr.msra.gmra.mxu1 %v3979_v56  ;;  %9109 = vst [vmem:[#allocation30_spill] sm:$0xff] %v8485_v44  ;;  %v8487_v56 = vld [vmem:[#allocation7 + $0x168] ss:$16 sps:$4 sm:$0xff]  }
 0x5b6   :  { %4687 = vmatpush1.bf16.msra.mxu0 %v8332_v37  ;;  %4704 = vmatprep.mubr.bf16.mxu0 %v8867_v13  ;;  %9110 = vst [vmem:[#allocation39_spill] sm:$0xff] %v8487_v56 }
 0x5b7   :  { %5124 = vmatpush1.bf16.msra.mxu1 %v8334_v58  ;;  %5164 = vmatprep.subr.bf16.mxu0 %v8336_v11 }
 0x5b8   :  { %5125 = vmatprep.subr.bf16.mxu1 %v8339_v35 }
 0x5bb   :  { %5126 = vmatpush1.bf16.msra.mxu1 %v8346_v42 }
 0x5bc   :  { %5127 = vmatprep.subr.bf16.mxu1 %v8350_v3 }
 0x5bd   :  { %6394 = vmatmul.mubr.msk.bf16.vlgmr.msra.gmra.mxu0 %vm246_vm9, %v4653_v38  ;;  %v8499_v38 = vld [vmem:[#allocation7 + $0x148] ss:$16 sps:$4 sm:$0xff]  }
 0x5be   :  { %5165 = vmatpush1.bf16.msra.mxu0 %v8352_v32  ;;  %9114 = vst [vmem:[#allocation43_spill] sm:$0xff] %v8499_v38 }
 0x5bf   :  { %5166 = vmatprep.subr.bf16.mxu0 %v8355_v41  ;;  %5128 = vmatpush1.bf16.msra.mxu1 %v8357_v5 }
 0x5c0   :  { %5129 = vmatprep.subr.bf16.mxu1 %v8360_v54 }
 0x5c2   :  { %5167 = vmatpush1.bf16.msra.mxu0 %v8364_v15 }
 0x5c3   :  { %5168 = vmatprep.subr.bf16.mxu0 %v8368_v53  ;;  %5130 = vmatpush1.bf16.msra.mxu1 %v8370_v31 }
 0x5c4   :  { %5131 = vmatprep.subr.bf16.mxu1 %v8373_v19 }
 0x5c6   :  { %5169 = vmatpush1.bf16.msra.mxu0 %v8376_v8 }
 0x5c7   :  { %5170 = vmatprep.subr.bf16.mxu0 %v8380_v20  ;;  %5132 = vmatpush1.bf16.msra.mxu1 %v8382_v51 }
 0x5c8   :  { %5133 = vmatprep.subr.bf16.mxu1 %v8385_v55 }
 0x5ca   :  { %5171 = vmatpush1.bf16.msra.mxu0 %v8388_v49 }
 0x5cb   :  { %5172 = vmatprep.subr.bf16.mxu0 %v8392_v17  ;;  %5134 = vmatpush1.bf16.msra.mxu1 %v8394_v59 }
 0x5cc   :  { %5135 = vmatprep.subr.bf16.mxu1 %v8397_v6 }
 0x5ce   :  { %5173 = vmatpush1.bf16.msra.mxu0 %v8400_v63 }
 0x5cf   :  { %5174 = vmatprep.subr.bf16.mxu0 %v8404_v50  ;;  %5136 = vmatpush1.bf16.msra.mxu1 %v8406_v57 }
 0x5d0   :  { %5137 = vmatprep.subr.bf16.mxu1 %v8409_v61 }
 0x5d2   :  { %5175 = vmatpush1.bf16.msra.mxu0 %v8412_v62 }
 0x5d3   :  { %5176 = vmatprep.subr.bf16.mxu0 %v8416_v1  ;;  %5138 = vmatpush1.bf16.msra.mxu1 %v8418_v16 }
 0x5d4   :  { %5139 = vmatprep.subr.bf16.mxu1 %v8421_v18 }
 0x5d6   :  { %5177 = vmatpush1.bf16.msra.mxu0 %v8424_v27 }
 0x5d7   :  { %5178 = vmatprep.subr.bf16.mxu0 %v8428_v28  ;;  %5140 = vmatpush2.bf16.msra.mxu1 %v8430_v4 }
 0x5d8   :  { %5141 = vmatprep.subr.bf16.mxu1 %v8433_v22 }
 0x5da   :  { %5179 = vmatpush1.bf16.msra.mxu0 %v8436_v30 }
 0x5db   :  { %5180 = vmatprep.subr.bf16.mxu0 %v8440_v23  ;;  %5142 = vmatpush2.bf16.msra.mxu1 %v8442_v52 }
 0x5dc   :  { %5143 = vmatprep.subr.bf16.mxu1 %v8445_v48 }
 0x5de   :  { %5181 = vmatpush2.bf16.msra.mxu0 %v8448_v12 }
 0x5df   :  { %5182 = vmatprep.subr.bf16.mxu0 %v8452_v29  ;;  %5144 = vmatpush2.bf16.msra.mxu1 %v8454_v26 }
 0x5e0   :  { %5145 = vmatprep.subr.bf16.mxu1 %v8457_v40 }
 0x5e2   :  { %5183 = vmatpush2.bf16.msra.mxu0 %v8460_v43 }
 0x5e3   :  { %5184 = vmatprep.subr.bf16.mxu0 %v8464_v34  ;;  %5146 = vmatpush2.bf16.msra.mxu1 %v8466_v46 }
 0x5e4   :  { %5147 = vmatprep.subr.bf16.mxu1 %v8481_v9 }
 0x5e6   :  { %5185 = vmatpush2.bf16.msra.mxu0 %v8470_v60 }
 0x5e7   :  { %5186 = vmatprep.subr.bf16.mxu0 %v8474_v24  ;;  %5148 = vmatpush2.bf16.msra.mxu1 %v8485_v44  ;;  %v8511_v44 = vld [vmem:[#allocation7 + $0x128] ss:$16 sps:$4 sm:$0xff]  }
 0x5e8   :  { %5149 = vmatprep.subr.bf16.mxu1 %v8493_v7  ;;  %9118 = vst [vmem:[#allocation19_spill] sm:$0xff] %v8511_v44  ;;  %v8523_v7 = vld [vmem:[#allocation7 + $0x108] ss:$16 sps:$4 sm:$0xff]  }
 0x5e9   :  { %9122 = vst [vmem:[#allocation49_spill] sm:$0xff] %v8523_v7 }
 0x5ea   :  { %5187 = vmatpush2.bf16.msra.mxu0 %v8477_v2  ;;  %v8507_v2 = vld [vmem:[#allocation7 + $0x12c] ss:$16 sps:$4 sm:$0xff]  }
 0x5eb   :  { %5188 = vmatprep.subr.bf16.mxu0 %v8483_v33  ;;  %5150 = vmatpush2.bf16.msra.mxu1 %v8497_v0  ;;  %v8505_v33 = vld [vmem:[#allocation7 + $0x124] ss:$16 sps:$4 sm:$0xff]   ;;  %9116 = vst [vmem:[#allocation48_spill] sm:$0xff] %v8507_v2  ;;  %v8519_v0 = vld [vmem:[#allocation7 + $0x10c] ss:$16 sps:$4 sm:$0xff]  }
 0x5ec   :  { %9115 = vst [vmem:[#allocation42_spill] sm:$0xff] %v8505_v33  ;;  %5151 = vmatprep.subr.bf16.mxu1 %v8505_v33  ;;  %9120 = vst [vmem:[#allocation44_spill] sm:$0xff] %v8519_v0 }
 0x5ee   :  { %5189 = vmatpush2.bf16.msra.mxu0 %v8487_v56  ;;  %v8509_v56 = vld [vmem:[#allocation7 + $0x120] ss:$16 sps:$4 sm:$0xff]  }
 0x5ef   :  { %5190 = vmatprep.subr.bf16.mxu0 %v8495_v47  ;;  %9117 = vst [vmem:[#allocation40_spill] sm:$0xff] %v8509_v56  ;;  %5152 = vmatpush2.bf16.msra.mxu1 %v8509_v56  ;;  %v8517_v47 = vld [vmem:[#allocation7 + $0x104] ss:$16 sps:$4 sm:$0xff]  }
 0x5f0   :  { %9119 = vst [vmem:[#allocation47_spill] sm:$0xff] %v8517_v47  ;;  %5153 = vmatprep.subr.bf16.mxu1 %v8517_v47 }
 0x5f2   :  { %5191 = vmatpush2.bf16.msra.mxu0 %v8499_v38  ;;  %v8521_v38 = vld [vmem:[#allocation7 + $0x100] ss:$16 sps:$4 sm:$0xff]  }
 0x5f3   :  { %5192 = vmatprep.subr.bf16.mxu0 %v8507_v2  ;;  %9121 = vst [vmem:[#allocation46_spill] sm:$0xff] %v8521_v38  ;;  %5154 = vmatpush2.bf16.msra.mxu1 %v8521_v38  ;;  %v5274_v2 = vpop.xlane.xlu1 %5273 }
 0x5f4   :  { %6462 = vmatprep.subr.msk.bf16.mxu1 %vm250_vm1, %v8275_v10  ;;  %v5306_v33 = vmul.f32 0.00390625, %v5274_v2  ;;  %v4045_v10 = vld [vmem:[%s8654_s4] sm:$0xf] }
 0x5f6   :  { %5193 = vmatpush2.bf16.msra.mxu0 %v8511_v44  ;;  %v5269_v44 = vpop.xlane.xlu0 %5268  ;;  %v5314_v46 = vpack.c.bf16 %v5306_v33, %v5306_v33 }
 0x5f7   :  { %5194 = vmatprep.subr.bf16.mxu0 %v8519_v0  ;;  %v5305_v56 = vmul.f32 0.00390625, %v5269_v44  ;;  %v5284_v60 = vpop.xlane.xlu1 %5283 }
 0x5f8   :  { %v5308_v34 = vmul.f32 0.00390625, %v5284_v60  ;;  %v5343_v38 = vunpack.c.l.b16 %v5314_v46  ;;  %v4058_v60 = vrot.slane %v4045_v10, %v9085_v45  ;;  %v4054_v46 = vrot.slane %v4045_v10, %v8906_v25  ;;  %v4586_v45 = vld [vmem:[%s8652_s2] sm:$0x3] }
 0x5f9   :  { %v5313_v9 = vpack.c.bf16 %v5305_v56, %v5305_v56  ;;  %v4591_v27 = vrot.slane %v4586_v45, %v8905_v21 }
 0x5fa   :  { %5195 = vmatpush2.bf16.msra.mxu0 %v8523_v7  ;;  %v5279_v24 = vpop.xlane.xlu0 %5278  ;;  %v5316_v26 = vpack.c.bf16 %v5308_v34, %v5308_v34  ;;  %v5357_v2 = vrot.slane %v5343_v38, %v7219_v14 }
 0x5fb   :  { %5859 = vmatprep.subr.bf16.mxu0 %v8283_v36  ;;  %v5307_v47 = vmul.f32 0.00390625, %v5279_v24  ;;  %v5342_v43 = vunpack.c.l.b16 %v5313_v9  ;;  %v5294_v7 = vpop.xlane.xlu1 %5293  ;;  %v4050_v24 = vrot.slane %v4045_v10, %v8905_v21  ;;  %v4062_v9 = vrot.slane %v4045_v10, %v9086_v39 }
 0x5fc   :  { %v5310_v56 = vmul.f32 0.00390625, %v5294_v7  ;;  %v5345_v33 = vunpack.c.l.b16 %v5316_v26 }
 0x5fd   :  { %v5315_v40 = vpack.c.bf16 %v5307_v47, %v5307_v47  ;;  %v5353_v44 = vrot.slane %v5342_v43, %v7219_v14 }
 0x5fe   :  { %v5289_v0 = vpop.xlane.xlu0 %5288  ;;  %v5318_v52 = vpack.c.bf16 %v5310_v56, %v5310_v56  ;;  %v5365_v22 = vrot.slane %v5345_v33, %v7219_v14 }
 0x5ff   :  { %v5309_v36 = vmul.f32 0.00390625, %v5289_v0  ;;  %v5344_v29 = vunpack.c.l.b16 %v5315_v40  ;;  %v5304_v0 = vpop.xlane.xlu1 %5303  ;;  %v5382_v43 = vsel %vm222_vm2, %v5357_v2, %v5353_v44 }
 0x601   :  { %v5317_v48 = vpack.c.bf16 %v5309_v36, %v5309_v36  ;;  %v5361_v38 = vrot.slane %v5344_v29, %v7219_v14  ;;  %v5312_v29 = vmul.f32 0.00390625, %v5304_v0 }
 0x602   :  { %v5299_v34 = vpop.xlane.xlu0 %5298 }
 0x603   :  { %v5311_v23 = vmul.f32 0.00390625, %v5299_v34  ;;  %v5346_v36 = vunpack.c.l.b16 %v5317_v48  ;;  %v5383_v56 = vsel %vm224_vm3, %v5361_v38, %v5382_v43 }
 0x605   :  { %v5319_v16 = vpack.c.bf16 %v5311_v23, %v5311_v23 }
 0x675   :  { %v4421_v47 = vpop.f32.mrf.mxu0  ;;  %v4462_v12 = vpop.f32.mrf.mxu1 }
 0x676   :  { %v4422_v30 = vadd.f32 %v4421_v47, %v4050_v24  ;;  %v4463_v10 = vadd.f32 %v4462_v12, %v4058_v60  ;;  %v5347_v12 = vunpack.c.l.b16 %v5318_v52  ;;  %v4595_v24 = vrot.slane %v4586_v45, %v8906_v25 }
 0x677   :  { %v4423_v40 = vpop.f32.mrf.mxu0  ;;  %v4464_v7 = vpop.f32.mrf.mxu1  ;;  %v5369_v60 = vrot.slane %v5346_v36, %v7219_v14  ;;  %v9154_v36 = vld [vmem:[#allocation48_spill] sm:$0xff] }
 0x678   :  { %v4424_v39 = vadd.f32 %v4423_v40, %v4054_v46  ;;  %v4465_v26 = vadd.f32 %v4464_v7, %v4062_v9  ;;  %v5373_v9 = vrot.slane %v5347_v12, %v7219_v14 }
 0x679   :  { %v4425_v4 = vpop.f32.mrf.mxu0  ;;  %v4466_v28 = vpop.f32.mrf.mxu1 }
 0x67a   :  { %v6540_v44 = vpack.c.bf16 %v4424_v39, %v4422_v30  ;;  %v6541_v2 = vpack.c.bf16 %v4465_v26, %v4463_v10  ;;  %v5384_v28 = vsel %vm226_vm4, %v5365_v22, %v5383_v56  ;;  %v5320_v39 = vpack.c.bf16 %v5312_v29, %v5312_v29  ;;  %v9153_v26 = vld [vmem:[#allocation43_spill] sm:$0xff]  ;;  %v9157_v29 = vld [vmem:[#allocation44_spill] sm:$0xff]  ;;  %v9158_v56 = vld [vmem:[#allocation49_spill] sm:$0xff] }
 0x67b   :  { %v4426_v34 = vpop.f32.mrf.mxu0  ;;  %v4467_v18 = vpop.f32.mrf.mxu1  ;;  %v5348_v30 = vunpack.c.l.b16 %v5319_v16 }
 0x67c   :  { %4486 = vst [vmem:[#allocation8 + $0x50] sm:$0xff] %v6540_v44  ;;  %4487 = vst [vmem:[#allocation8 + $0x58] sm:$0xff] %v6541_v2  ;;  %v5385_v18 = vsel %vm228_vm5, %v5369_v60, %v5384_v28  ;;  %v5349_v0 = vunpack.c.l.b16 %v5320_v39  ;;  %v9155_v44 = vld [vmem:[#allocation46_spill] sm:$0xff]  ;;  %v9156_v2 = vld [vmem:[#allocation19_spill] sm:$0xff] }
 0x67d   :  { %v4706_v48 = vpop.f32.mrf.mxu0  ;;  %v5377_v45 = vrot.slane %v5348_v30, %v7219_v14  ;;  %v5386_v38 = vsel %vm230_vm6, %v5373_v9, %v5385_v18  ;;  %v4781_v34 = vld [vmem:[%s8654_s4] sm:$0xf]  ;;  %v9160_v28 = vld [vmem:[#allocation21_spill] sm:$0xff] }
 0x67e   :  { %v4707_v4 = vadd.f32 %v4706_v48, %v4591_v27  ;;  %v5381_v27 = vrot.slane %v5349_v0, %v7219_v14  ;;  %v9123_v14 = vld [vmem:[#allocation12_spill] sm:$0xff]  ;;  %v4786_v12 = vrot.slane %v4781_v34, %v8905_v21  ;;  %v4790_v48 = vrot.slane %v4781_v34, %v8906_v25 }
 0x67f   :  { %v4708_v46 = vpop.f32.mrf.mxu0  ;;  %v5387_v16 = vsel %vm232_vm7, %v5377_v45, %v5386_v38  ;;  %v4798_v39 = vrot.slane %v4781_v34, %v9160_v28 }
 0x680   :  { %v4709_v33 = vadd.f32 %v4708_v46, %v4595_v24  ;;  %v4713_v23 = vmax.f32 %v4707_v4, 0.0  ;;  %v5388_v7 = vsel %vm234_vm8, %v5381_v27, %v5387_v16  ;;  %v9159_v24 = vld [vmem:[#allocation20_spill] sm:$0xff] }
 0x681   :  { %v4710_v47 = vpop.f32.mrf.mxu0  ;;  %v5389_v10 = vpack.c.b16 %v5388_v7, %v5388_v7  ;;  %v4794_v60 = vrot.slane %v4781_v34, %v9159_v24 }
 0x682   :  { %v4714_v52 = vmax.f32 %v4709_v33, 0.0  ;;  %v4715_v22 = vpack.c.bf16 %v4713_v23, %v4713_v23  ;;  %v5322_v33 = vld [vmem:[%s8652_s2] sm:$0x3] }
 0x683   :  { %v4711_v43 = vpop.f32.mrf.mxu0  ;;  %v5331_v16 = vrot.slane %v5322_v33, %v8906_v25 }
 0x684   :  { %v4716_v40 = vpack.c.bf16 %v4714_v52, %v4714_v52 }
 0x686   :  { %5155 = vmatprep.mubr.bf16.mxu1 %v4716_v40  ;;  %5196 = vmatprep.mubr.bf16.mxu0 %v4716_v40  ;;  %v5327_v40 = vrot.slane %v5322_v33, %v8905_v21 }
 0x687   :  { %5156 = vmatmul.mubr.bf16.vlgmr.msra.gmra.mxu1 %v4715_v22  ;;  %5197 = vmatmul.mubr.bf16.vlgmr.msra.gmra.mxu0 %v4715_v22 }
 0x688   :  { %5423 = vmatpush1.bf16.msra.mxu1 %v8332_v37  ;;  %5440 = vmatprep.mubr.bf16.mxu1 %v8867_v13  ;;  %v9124_v13 = vld [vmem:[#allocation13_spill] sm:$0xff]  ;;  %v9125_v37 = vld [vmem:[#allocation22_spill] sm:$0xff] }
 0x689   :  { %5900 = vmatprep.subr.bf16.mxu1 %v8336_v11  ;;  %5860 = vmatpush1.bf16.msra.mxu0 %v8334_v58  ;;  %v9126_v58 = vld [vmem:[#allocation23_spill] sm:$0xff]  ;;  %v9127_v11 = vld [vmem:[#allocation14_spill] sm:$0xff] }
 0x68a   :  { %5861 = vmatprep.subr.bf16.mxu0 %v8339_v35  ;;  %v9128_v35 = vld [vmem:[#allocation15_spill] sm:$0xff] }
 0x68d   :  { %5862 = vmatpush1.bf16.msra.mxu0 %v8346_v42  ;;  %v9129_v42 = vld [vmem:[#allocation24_spill] sm:$0xff] }
 0x68e   :  { %5863 = vmatprep.subr.bf16.mxu0 %v8350_v3  ;;  %v9130_v3 = vld [vmem:[#allocation25_spill] sm:$0xff] }
 0x68f   :  { %6463 = vmatmul.mubr.msk.bf16.vlgmr.msra.gmra.mxu1 %vm246_vm9, %v5389_v10 }
 0x690   :  { %5901 = vmatpush1.bf16.msra.mxu1 %v8352_v32  ;;  %v9131_v32 = vld [vmem:[#allocation16_spill] sm:$0xff] }
 0x691   :  { %5902 = vmatprep.subr.bf16.mxu1 %v8355_v41  ;;  %5864 = vmatpush1.bf16.msra.mxu0 %v8357_v5  ;;  %v9132_v41 = vld [vmem:[#allocation17_spill] sm:$0xff]  ;;  %v9133_v5 = vld [vmem:[#allocation26_spill] sm:$0xff] }
 0x692   :  { %5865 = vmatprep.subr.bf16.mxu0 %v8360_v54  ;;  %v9134_v54 = vld [vmem:[#allocation27_spill] sm:$0xff] }
 0x694   :  { %5903 = vmatpush1.bf16.msra.mxu1 %v8364_v15  ;;  %v9135_v15 = vld [vmem:[#allocation18_spill] sm:$0xff] }
 0x695   :  { %5904 = vmatprep.subr.bf16.mxu1 %v8368_v53  ;;  %5866 = vmatpush1.bf16.msra.mxu0 %v8370_v31  ;;  %v9136_v53 = vld [vmem:[#allocation31_spill] sm:$0xff]  ;;  %v9137_v31 = vld [vmem:[#allocation28_spill] sm:$0xff] }
 0x696   :  { %5867 = vmatprep.subr.bf16.mxu0 %v8373_v19  ;;  %v9138_v19 = vld [vmem:[#allocation29_spill] sm:$0xff] }
 0x698   :  { %5905 = vmatpush1.bf16.msra.mxu1 %v8376_v8  ;;  %v9139_v8 = vld [vmem:[#allocation33_spill] sm:$0xff] }
 0x699   :  { %5906 = vmatprep.subr.bf16.mxu1 %v8380_v20  ;;  %5868 = vmatpush1.bf16.msra.mxu0 %v8382_v51  ;;  %v9140_v20 = vld [vmem:[#allocation32_spill] sm:$0xff] }
 0x69a   :  { %5869 = vmatprep.subr.bf16.mxu0 %v8385_v55  ;;  %v9141_v51 = vld [vmem:[#allocation36_spill] sm:$0xff]  ;;  %v9142_v55 = vld [vmem:[#allocation37_spill] sm:$0xff] }
 0x69c   :  { %5907 = vmatpush1.bf16.msra.mxu1 %v8388_v49  ;;  %v9143_v49 = vld [vmem:[#allocation30_spill] sm:$0xff] }
 0x69d   :  { %5908 = vmatprep.subr.bf16.mxu1 %v8392_v17  ;;  %5870 = vmatpush1.bf16.msra.mxu0 %v8394_v59  ;;  %v9144_v17 = vld [vmem:[#allocation38_spill] sm:$0xff]  ;;  %v9145_v59 = vld [vmem:[#allocation35_spill] sm:$0xff] }
 0x69e   :  { %5871 = vmatprep.subr.bf16.mxu0 %v8397_v6  ;;  %v9146_v6 = vld [vmem:[#allocation41_spill] sm:$0xff] }
 0x6a0   :  { %5909 = vmatpush1.bf16.msra.mxu1 %v8400_v63  ;;  %v9147_v63 = vld [vmem:[#allocation34_spill] sm:$0xff] }
 0x6a1   :  { %5910 = vmatprep.subr.bf16.mxu1 %v8404_v50  ;;  %5872 = vmatpush1.bf16.msra.mxu0 %v8406_v57  ;;  %v9148_v50 = vld [vmem:[#allocation42_spill] sm:$0xff]  ;;  %v9149_v57 = vld [vmem:[#allocation39_spill] sm:$0xff] }
 0x6a2   :  { %5873 = vmatprep.subr.bf16.mxu0 %v8409_v61  ;;  %v9150_v61 = vld [vmem:[#allocation45_spill] sm:$0xff] }
 0x6a4   :  { %5911 = vmatpush1.bf16.msra.mxu1 %v8412_v62  ;;  %v9151_v62 = vld [vmem:[#allocation40_spill] sm:$0xff] }
 0x6a5   :  { %5912 = vmatprep.subr.bf16.mxu1 %v8416_v1  ;;  %5874 = vmatpush1.bf16.msra.mxu0 %v9123_v14  ;;  %v9152_v1 = vld [vmem:[#allocation47_spill] sm:$0xff] }
 0x6a6   :  { %5875 = vmatprep.subr.bf16.mxu0 %v9124_v13 }
 0x6a8   :  { %5913 = vmatpush1.bf16.msra.mxu1 %v9125_v37 }
 0x6a9   :  { %5914 = vmatprep.subr.bf16.mxu1 %v9126_v58  ;;  %5876 = vmatpush2.bf16.msra.mxu0 %v9127_v11 }
 0x6aa   :  { %5877 = vmatprep.subr.bf16.mxu0 %v9128_v35 }
 0x6ac   :  { %5915 = vmatpush1.bf16.msra.mxu1 %v9129_v42 }
 0x6ad   :  { %5916 = vmatprep.subr.bf16.mxu1 %v9130_v3  ;;  %5878 = vmatpush2.bf16.msra.mxu0 %v9131_v32  ;;  %v5517_v32 = vld [vmem:[%s8654_s4] sm:$0xf]  ;;  %s6999_s4 = scalar_lea.vmem %s5966_s15, 2048 }
 0x6ae   :  { %5879 = vmatprep.subr.bf16.mxu0 %v9132_v41  ;;  %v5522_v41 = vrot.slane %v5517_v32, %v8905_v21  ;;  %p7000_p1 = scmp.ne.s32.totalorder %s5966_s15, %s6999_s4  ;;  %p7005_p3 = scmp.lt.s32.totalorder %s6999_s4, %s6999_s4 }
 0x6b0   :  { %5917 = vmatpush2.bf16.msra.mxu1 %v9133_v5  ;;  %v5530_v5 = vrot.slane %v5517_v32, %v9159_v24  ;;  %p7006_p4 = por %p7005_p3, %p7004_p2 }
 0x6b1   :  { %5918 = vmatprep.subr.bf16.mxu1 %v9134_v54  ;;  %5880 = vmatpush2.bf16.msra.mxu0 %v9135_v15  ;;  %v5526_v54 = vrot.slane %v5517_v32, %v8906_v25  ;;  %v5534_v15 = vrot.slane %v5517_v32, %v9160_v28 }
 0x6b2   :  { %5881 = vmatprep.subr.bf16.mxu0 %v9136_v53  ;;  %p7007_p5 = pnand %p7006_p4, %p7000_p1 }
 0x6b4   :  { %5919 = vmatpush2.bf16.msra.mxu1 %v9137_v31 }
 0x6b5   :  { %5920 = vmatprep.subr.bf16.mxu1 %v9138_v19  ;;  %5882 = vmatpush2.bf16.msra.mxu0 %v9139_v8 }
 0x6b6   :  { %5883 = vmatprep.subr.bf16.mxu0 %v9140_v20 }
 0x6b8   :  { %5921 = vmatpush2.bf16.msra.mxu1 %v9141_v51 }
 0x6b9   :  { %5922 = vmatprep.subr.bf16.mxu1 %v9142_v55  ;;  %5884 = vmatpush2.bf16.msra.mxu0 %v9143_v49 }
 0x6ba   :  { %5885 = vmatprep.subr.bf16.mxu0 %v9144_v17 }
 0x6bc   :  { %5923 = vmatpush2.bf16.msra.mxu1 %v9145_v59 }
 0x6bd   :  { %5924 = vmatprep.subr.bf16.mxu1 %v9146_v6  ;;  %5886 = vmatpush2.bf16.msra.mxu0 %v9147_v63 }
 0x6be   :  { %5887 = vmatprep.subr.bf16.mxu0 %v9148_v50 }
 0x6c0   :  { %5925 = vmatpush2.bf16.msra.mxu1 %v9149_v57 }
 0x6c1   :  { %5926 = vmatprep.subr.bf16.mxu1 %v9150_v61  ;;  %5888 = vmatpush2.bf16.msra.mxu0 %v9151_v62 }
 0x6c2   :  { %5889 = vmatprep.subr.bf16.mxu0 %v9152_v1 }
 0x6c4   :  { %5927 = vmatpush2.bf16.msra.mxu1 %v9153_v26 }
 0x6c5   :  { %5928 = vmatprep.subr.bf16.mxu1 %v9154_v36  ;;  %5890 = vmatpush2.bf16.msra.mxu0 %v9155_v44 }
 0x6c8   :  { %5929 = vmatpush2.bf16.msra.mxu1 %v9156_v2 }
 0x6c9   :  { %5930 = vmatprep.subr.bf16.mxu1 %v9157_v29 }
 0x6cc   :  { %5931 = vmatpush2.bf16.msra.mxu1 %v9158_v56 }
 0x747   :  { %v5157_v4 = vpop.f32.mrf.mxu1  ;;  %v5198_v30 = vpop.f32.mrf.mxu0 }
 0x748   :  { %v5158_v18 = vadd.f32 %v5157_v4, %v4786_v12  ;;  %v5199_v23 = vadd.f32 %v5198_v30, %v4794_v60 }
 0x749   :  { %v5159_v46 = vpop.f32.mrf.mxu1  ;;  %v5200_v9 = vpop.f32.mrf.mxu0 }
 0x74a   :  { %v5160_v47 = vadd.f32 %v5159_v46, %v4790_v48  ;;  %v5201_v0 = vadd.f32 %v5200_v9, %v4798_v39 }
 0x74b   :  { %v5161_v52 = vpop.f32.mrf.mxu1  ;;  %v5202_v45 = vpop.f32.mrf.mxu0 }
 0x74c   :  { %v6542_v43 = vpack.c.bf16 %v5160_v47, %v5158_v18  ;;  %v6543_v38 = vpack.c.bf16 %v5201_v0, %v5199_v23 }
 0x74d   :  { %v5162_v22 = vpop.f32.mrf.mxu1  ;;  %v5203_v27 = vpop.f32.mrf.mxu0 }
 0x74e   :  { %5222 = vst [vmem:[#allocation8 + $0x60] sm:$0xff] %v6542_v43  ;;  %5223 = vst [vmem:[#allocation8 + $0x68] sm:$0xff] %v6543_v38 }
 0x74f   :  { %v5442_v7 = vpop.f32.mrf.mxu1 }
 0x750   :  { %v5443_v10 = vadd.f32 %v5442_v7, %v5327_v40 }
 0x751   :  { %v5444_v14 = vpop.f32.mrf.mxu1 }
 0x752   :  { %v5445_v13 = vadd.f32 %v5444_v14, %v5331_v16  ;;  %v5449_v37 = vmax.f32 %v5443_v10, 0.0 }
 0x753   :  { %v5446_v58 = vpop.f32.mrf.mxu1 }
 0x754   :  { %v5450_v11 = vmax.f32 %v5445_v13, 0.0  ;;  %v5451_v3 = vpack.c.bf16 %v5449_v37, %v5449_v37 }
 0x755   :  { %v5447_v35 = vpop.f32.mrf.mxu1 }
 0x756   :  { %v5452_v42 = vpack.c.bf16 %v5450_v11, %v5450_v11 }
 0x758   :  { %5891 = vmatprep.mubr.bf16.mxu0 %v5452_v42  ;;  %5932 = vmatprep.mubr.bf16.mxu1 %v5452_v42 }
 0x759   :  { %5892 = vmatmul.mubr.bf16.vlgmr.msra.gmra.mxu0 %v5451_v3  ;;  %5933 = vmatmul.mubr.bf16.vlgmr.msra.gmra.mxu1 %v5451_v3 }
 0x819   :  { %v5893_v53 = vpop.f32.mrf.mxu0  ;;  %v5934_v31 = vpop.f32.mrf.mxu1 }
 0x81a   :  { %v5894_v20 = vadd.f32 %v5893_v53, %v5522_v41  ;;  %v5935_v51 = vadd.f32 %v5934_v31, %v5530_v5 }
 0x81b   :  { %v5895_v19 = vpop.f32.mrf.mxu0  ;;  %v5936_v8 = vpop.f32.mrf.mxu1 }
 0x81c   :  { %v5896_v55 = vadd.f32 %v5895_v19, %v5526_v54  ;;  %v5937_v49 = vadd.f32 %v5936_v8, %v5534_v15 }
 0x81d   :  { %v5897_v17 = vpop.f32.mrf.mxu0  ;;  %v5938_v59 = vpop.f32.mrf.mxu1 }
 0x81e   :  { %v6544_v6 = vpack.c.bf16 %v5896_v55, %v5894_v20  ;;  %v6545_v21 = vpack.c.bf16 %v5937_v49, %v5935_v51 }
 0x81f   :  { %v5898_v63 = vpop.f32.mrf.mxu0  ;;  %v5939_v50 = vpop.f32.mrf.mxu1 }
 0x820   :  { %5958 = vst [vmem:[#allocation8 + $0x70] sm:$0xff] %v6544_v6  ;;  %5959 = vst [vmem:[#allocation8 + $0x78] sm:$0xff] %v6545_v21 }
 0x821   :  { %7010 = shalt.err (!%p7007_p5)
}
 0x822   :  { %5971 = dma.vmem_to_hbm [thread:$0]  %s5966_s15, 2048, %s8655_s5, [#allocation4], %s7030_s1, %s7030_s1, %s7031_s8  }
 0x823   :  { %7023 = dma.done.wait [#allocation4], 2048  }
 0x824   :  { %7024 = vsyncadd [#allocation4], 4294965248 }
 0x825   :  { %5975 = vsyncpa [#allocation3], 1 }
 0x826   :  { %5976 = vsyncpa [#allocation6], 1 }
 0x827   :  { %5977 = vsyncpa [#allocation4], 1 }

</bundles_post_ra>
